<compile_context>
chip_gen: v7x
topology: tpu7x:2x2x1
jax: 0.10.0
libtpu: 0.0.40
codegen_flags: <defaults>
</compile_context>

<pallas_src>
import jax
import jax.numpy as jnp
from jax.experimental import pallas as pl
from jax.experimental.pallas import tpu as pltpu


def _resblock_kernel(xp_ref, w_ref, p_ref, o_ref, h1p_ref):
    # xp_ref : (H+2, W+2, C)  bf16 reflect-padded input (channels zero-padded)
    # w_ref  : (2, 9*C, C)    bf16 packed conv weights (row order: dh, dw, cin)
    # p_ref  : (4, C)         f32 packed affine params [g1, be1, g2, be2]
    # o_ref  : (H*W, C)       output (f32)
    # h1p_ref: (H+2, W+2, C)  bf16 VMEM scratch for the reflect-padded h1
    Hp, Wp, C = xp_ref.shape
    H, W = Hp - 2, Wp - 2
    HW = H * W

    p = p_ref[...]
    g1, be1 = p[0:1], p[1:2]
    g2, be2 = p[2:3], p[3:4]

    w = w_ref[...]                                   # (2, 9C, C) bf16, small

    def conv3x3(src, w_layer):
        # src: (H+2, W+2, C) bf16; w_layer: (9C, C) bf16.
        # Three accumulating K=3C matmuls (one per dh) instead of one K=9C
        # matmul over a materialized (HW, 9C) im2col buffer.
        acc = jnp.zeros((HW, C), jnp.float32)
        for dh in range(3):
            cols = [src[dh:dh + H, dw:dw + W, :].reshape(HW, C)
                    for dw in range(3)]
            patch = jnp.concatenate(cols, axis=1)    # (HW, 3C) bf16
            acc = acc + jnp.dot(patch, w_layer[dh * 3 * C:(dh + 1) * 3 * C, :],
                                preferred_element_type=jnp.float32)
        return acc

    def inorm(a, g, be, eps=1e-5):
        # One-pass per-channel stats + folded affine: a*scale + shift.
        mean = jnp.mean(a, axis=0, keepdims=True)                  # (1, C)
        var = jnp.mean(a * a, axis=0, keepdims=True) - mean * mean
        scale = g * jax.lax.rsqrt(var + eps)
        return a * scale + (be - mean * scale)

    xp16 = xp_ref[...]                               # (H+2, W+2, C) bf16 (no cast)

    # ---- conv1 -> IN1 -> ReLU  (conv bias cancelled by the mean subtraction)
    h1 = jnp.maximum(inorm(conv3x3(xp16, w[0]), g1, be1), 0.0)     # (HW, C) f32
    h1 = h1.astype(jnp.bfloat16).reshape(H, W, C)

    # ---- in-kernel reflect pad of h1 via scratch ref: store center, copy only
    # the 2 border rows and 2 border columns (corners come from the row copies).
    h1p_ref[1:H + 1, 1:W + 1, :] = h1
    h1p_ref[0:1, 1:W + 1, :] = h1[1:2, :, :]
    h1p_ref[H + 1:H + 2, 1:W + 1, :] = h1[H - 2:H - 1, :, :]
    h1p_ref[:, 0:1, :] = h1p_ref[:, 2:3, :]
    h1p_ref[:, W + 1:W + 2, :] = h1p_ref[:, W - 1:W, :]

    # ---- conv2 -> IN2
    h2 = inorm(conv3x3(h1p_ref[...], w[1]), g2, be2)               # (HW, C) f32

    # ---- residual add: center of the padded input is the original image.
    # (bf16 input precision; upcast just this slice to f32 for the add.)
    x_center = xp16[1:H + 1, 1:W + 1, :].astype(jnp.float32).reshape(HW, C)
    o_ref[...] = (h2 + x_center).astype(o_ref.dtype)


def _vmem_limit_bytes():
    # Leave headroom below physical VMEM (v7x has only 64 MiB per TensorCore;
    # v5e/v6e have 128 MiB).  Never request 100% of the physical capacity.
    try:
        cap = pltpu.get_tpu_info().vmem_capacity_bytes
        return min(int(cap * 3 // 4), 100 * 1024 * 1024)
    except Exception:
        return 48 * 1024 * 1024


def residual_block(x_nchw, params):
    """x_nchw: (B, C, H, W) float32.  Returns (B, C, H, W) float32."""
    x = jnp.transpose(x_nchw, (0, 2, 3, 1))                        # NCHW -> NHWC
    B, H, W, C = x.shape
    assert H >= 2 and W >= 2, "ReflectionPad2d(1) needs H, W >= 2"
    Cpad = ((C + 127) // 128) * 128                                # lane-dense channels

    # Spatial reflect pad once in the wrapper; zero-pad channels; cast to bf16
    # so the per-step HBM->VMEM input DMA (and its VMEM footprint) is halved.
    xp = jnp.pad(x, ((0, 0), (1, 1), (1, 1), (0, 0)), mode="reflect")
    xp = jnp.pad(xp, ((0, 0), (0, 0), (0, 0), (0, Cpad - C))).astype(jnp.bfloat16)

    def pack_w(w):  # PyTorch (Cout, Cin, 3, 3) -> (9*Cpad, Cpad), row = (dh, dw, cin)
        w = jnp.transpose(w, (2, 3, 1, 0))                         # (3, 3, Cin, Cout)
        w = jnp.pad(w, ((0, 0), (0, 0), (0, Cpad - C), (0, Cpad - C)))
        return w.reshape(9 * Cpad, Cpad)

    # Packed bf16 weights (one DMA) and packed affine params (one DMA).
    w_packed = jnp.stack([pack_w(params["w1"]),
                          pack_w(params["w2"])]).astype(jnp.bfloat16)
    # NOTE: gamma/beta are zero-padded on the padded channels; this is what
    # keeps the padded lanes exactly zero through InstanceNorm (rsqrt(eps) is
    # large, but it is multiplied by gamma=0).  Do not pad gamma with ones.
    pad_c = lambda v: jnp.pad(v, (0, Cpad - C))
    # Conv biases b1/b2 are mathematically cancelled by InstanceNorm -> dropped.
    p_packed = jnp.stack([pad_c(params["g1"]), pad_c(params["be1"]),
                          pad_c(params["g2"]), pad_c(params["be2"])])  # (4, Cpad)

    out = pl.pallas_call(
        _resblock_kernel,
        out_shape=jax.ShapeDtypeStruct((B, H * W, Cpad), x_nchw.dtype),
        grid_spec=pltpu.PrefetchScalarGridSpec(
            num_scalar_prefetch=0,
            grid=(B,),
            in_specs=[
                pl.BlockSpec((None, H + 2, W + 2, Cpad), lambda b: (b, 0, 0, 0)),
                pl.BlockSpec((2, 9 * Cpad, Cpad), lambda b: (0, 0, 0)),
                pl.BlockSpec((4, Cpad), lambda b: (0, 0)),
            ],
            out_specs=pl.BlockSpec((None, H * W, Cpad), lambda b: (b, 0, 0)),
            scratch_shapes=[pltpu.VMEM((H + 2, W + 2, Cpad), jnp.bfloat16)],
        ),
        compiler_params=pltpu.CompilerParams(
            dimension_semantics=("parallel",),
            vmem_limit_bytes=_vmem_limit_bytes()),
        # TODO(synk): on v7x (2 TCs/chip) an odd/1 batch leaves a core idle;
        #   split H across a second parallel axis with cross-core stats merging.
    )(xp, w_packed, p_packed)

    out = out.reshape(B, H, W, Cpad)[..., :C]
    return jnp.transpose(out, (0, 3, 1, 2))                        # NHWC -> NCHW


# ---------------- plain-JAX reference (for verification only) ----------------
def _ref_conv3x3_reflect(x_nhwc, w_khwcio, b):
    xp = jnp.pad(x_nhwc, ((0, 0), (1, 1), (1, 1), (0, 0)), mode="reflect")
    B, H, W, C = x_nhwc.shape
    out = jnp.zeros((B, H, W, w_khwcio.shape[-1]), jnp.float32)
    for dh in range(3):
        for dw in range(3):
            out = out + jnp.einsum("bhwc,cd->bhwd",
                                   xp[:, dh:dh + H, dw:dw + W, :],
                                   w_khwcio[dh, dw])
    return out + b


def _ref_instance_norm(x_nhwc, g, be, eps=1e-5):
    mean = jnp.mean(x_nhwc, axis=(1, 2), keepdims=True)
    var = jnp.mean((x_nhwc - mean) ** 2, axis=(1, 2), keepdims=True)
    return (x_nhwc - mean) * jax.lax.rsqrt(var + eps) * g + be


def residual_block_ref(x_nchw, params):
    x = jnp.transpose(x_nchw, (0, 2, 3, 1))
    w1 = jnp.transpose(params["w1"], (2, 3, 1, 0))
    w2 = jnp.transpose(params["w2"], (2, 3, 1, 0))
    h = _ref_instance_norm(_ref_conv3x3_reflect(x, w1, params["b1"]),
                           params["g1"], params["be1"])
    h = jnp.maximum(h, 0.0)
    h = _ref_instance_norm(_ref_conv3x3_reflect(h, w2, params["b2"]),
                           params["g2"], params["be2"])
    return jnp.transpose(h + x, (0, 3, 1, 2))


if __name__ == "__main__":
    B, C, H, W = 2, 4, 16, 16
    key = jax.random.PRNGKey(0)
    kx, k1, k2, k3, k4 = jax.random.split(key, 5)

    x = jax.random.normal(kx, (B, C, H, W), jnp.float32)
    params = {
        # Conv2d(channels, channels, 3) weight shape: (Cout, Cin, 3, 3)
        "w1": 0.1 * jax.random.normal(k1, (C, C, 3, 3), jnp.float32),
        "b1": 0.05 * jax.random.normal(k2, (C,), jnp.float32),
        "w2": 0.1 * jax.random.normal(k3, (C, C, 3, 3), jnp.float32),
        "b2": 0.05 * jax.random.normal(k4, (C,), jnp.float32),
        # InstanceNorm2d(affine=True) init: weight=1, bias=0
        "g1": jnp.ones((C,), jnp.float32),
        "be1": jnp.zeros((C,), jnp.float32),
        "g2": jnp.ones((C,), jnp.float32),
        "be2": jnp.zeros((C,), jnp.float32),
    }

    out = residual_block(x, params)
    jax.block_until_ready(out)

    ref = residual_block_ref(x, params)
    assert out.shape == (B, C, H, W)
    # bf16 activations / MXU inputs (f32 accumulation) -> relaxed tolerance.
    assert jnp.allclose(out, ref, rtol=3e-2, atol=3e-2), "mismatch vs reference"

    print("KERNEL_OK")
</pallas_src>

<mosaic_0001>
module attributes {stable_mosaic.version = 11 : i64} {
  func.func @_resblock_kernel(%arg0: i32, %arg1: memref<1x18x18x128xbf16, #tpu.memory_space<vmem>>, %arg2: memref<2x1152x128xbf16, #tpu.memory_space<vmem>>, %arg3: memref<4x128xf32, #tpu.memory_space<vmem>>, %arg4: memref<1x256x128xf32, #tpu.memory_space<vmem>>, %arg5: memref<18x18x128xbf16, #tpu.memory_space<vmem>>) attributes {dimension_semantics = [#tpu.dimension_semantics<parallel>], iteration_bounds = array<i64: 2>, scalar_prefetch = 0 : i64, scratch_operands = 1 : i64, tpu.core_type = #tpu.core_type<tc>, window_params = [{transform_indices = @transform_0, window_bounds = array<i64: 1, 18, 18, 128>}, {pipeline_mode = #tpu.pipeline_mode<synchronous>, transform_indices = @transform_1, window_bounds = array<i64: 2, 1152, 128>}, {pipeline_mode = #tpu.pipeline_mode<synchronous>, transform_indices = @transform_2, window_bounds = array<i64: 4, 128>}, {transform_indices = @transform_3, window_bounds = array<i64: 1, 256, 128>}]} {
    %c0 = arith.constant 0 : index
    %c0_0 = arith.constant 0 : index
    %0 = vector.load %arg3[%c0, %c0_0] : memref<4x128xf32, #tpu.memory_space<vmem>>, vector<4x128xf32>
    %1 = vector.extract_strided_slice %0 {offsets = [0, 0], sizes = [1, 128], strides = [1, 1]} : vector<4x128xf32> to vector<1x128xf32>
    %2 = vector.extract_strided_slice %0 {offsets = [1, 0], sizes = [1, 128], strides = [1, 1]} : vector<4x128xf32> to vector<1x128xf32>
    %3 = vector.extract_strided_slice %0 {offsets = [2, 0], sizes = [1, 128], strides = [1, 1]} : vector<4x128xf32> to vector<1x128xf32>
    %4 = vector.extract_strided_slice %0 {offsets = [3, 0], sizes = [1, 128], strides = [1, 1]} : vector<4x128xf32> to vector<1x128xf32>
    %c0_1 = arith.constant 0 : index
    %c0_2 = arith.constant 0 : index
    %c0_3 = arith.constant 0 : index
    %5 = vector.load %arg2[%c0_1, %c0_2, %c0_3] : memref<2x1152x128xbf16, #tpu.memory_space<vmem>>, vector<2x1152x128xbf16>
    %c0_4 = arith.constant 0 : index
    %c0_5 = arith.constant 0 : index
    %c0_6 = arith.constant 0 : index
    %c0_7 = arith.constant 0 : index
    %6 = vector.load %arg1[%c0_4, %c0_5, %c0_6, %c0_7] : memref<1x18x18x128xbf16, #tpu.memory_space<vmem>>, vector<1x18x18x128xbf16>
    %7 = vector.shape_cast %6 : vector<1x18x18x128xbf16> to vector<18x18x128xbf16>
    %8 = vector.extract_strided_slice %5 {offsets = [0, 0, 0], sizes = [1, 1152, 128], strides = [1, 1, 1]} : vector<2x1152x128xbf16> to vector<1x1152x128xbf16>
    %9 = vector.shape_cast %8 : vector<1x1152x128xbf16> to vector<1152x128xbf16>
    %cst = arith.constant 0.000000e+00 : f32
    %10 = vector.broadcast %cst : f32 to vector<256x128xf32>
    %11 = vector.extract_strided_slice %7 {offsets = [0, 0, 0], sizes = [16, 16, 128], strides = [1, 1, 1]} : vector<18x18x128xbf16> to vector<16x16x128xbf16>
    %12 = vector.shape_cast %11 : vector<16x16x128xbf16> to vector<256x128xbf16>
    %13 = vector.extract_strided_slice %7 {offsets = [0, 1, 0], sizes = [16, 16, 128], strides = [1, 1, 1]} : vector<18x18x128xbf16> to vector<16x16x128xbf16>
    %14 = vector.shape_cast %13 : vector<16x16x128xbf16> to vector<256x128xbf16>
    %15 = vector.extract_strided_slice %7 {offsets = [0, 2, 0], sizes = [16, 16, 128], strides = [1, 1, 1]} : vector<18x18x128xbf16> to vector<16x16x128xbf16>
    %16 = vector.shape_cast %15 : vector<16x16x128xbf16> to vector<256x128xbf16>
    %17 = tpu.concatenate %12, %14, %16 in 1 : vector<256x128xbf16>, vector<256x128xbf16>, vector<256x128xbf16> -> vector<256x384xbf16>
    %18 = vector.extract_strided_slice %9 {offsets = [0, 0], sizes = [384, 128], strides = [1, 1]} : vector<1152x128xbf16> to vector<384x128xbf16>
    %cst_8 = arith.constant dense<0.000000e+00> : vector<256x128xf32>
    %19 = tpu.matmul %17, %18, %cst_8 {dimension_numbers = #tpu.dot_dimension_numbers<[1], [0], [0], [1], [0, 0, 1, 1], [], []>} : vector<256x384xbf16>, vector<384x128xbf16>, vector<256x128xf32> -> vector<256x128xf32>
    %20 = arith.addf %10, %19 : vector<256x128xf32>
    %21 = vector.extract_strided_slice %7 {offsets = [1, 0, 0], sizes = [16, 16, 128], strides = [1, 1, 1]} : vector<18x18x128xbf16> to vector<16x16x128xbf16>
    %22 = vector.shape_cast %21 : vector<16x16x128xbf16> to vector<256x128xbf16>
    %23 = vector.extract_strided_slice %7 {offsets = [1, 1, 0], sizes = [16, 16, 128], strides = [1, 1, 1]} : vector<18x18x128xbf16> to vector<16x16x128xbf16>
    %24 = vector.shape_cast %23 : vector<16x16x128xbf16> to vector<256x128xbf16>
    %25 = vector.extract_strided_slice %7 {offsets = [1, 2, 0], sizes = [16, 16, 128], strides = [1, 1, 1]} : vector<18x18x128xbf16> to vector<16x16x128xbf16>
    %26 = vector.shape_cast %25 : vector<16x16x128xbf16> to vector<256x128xbf16>
    %27 = tpu.concatenate %22, %24, %26 in 1 : vector<256x128xbf16>, vector<256x128xbf16>, vector<256x128xbf16> -> vector<256x384xbf16>
    %28 = vector.extract_strided_slice %9 {offsets = [384, 0], sizes = [384, 128], strides = [1, 1]} : vector<1152x128xbf16> to vector<384x128xbf16>
    %cst_9 = arith.constant dense<0.000000e+00> : vector<256x128xf32>
    %29 = tpu.matmul %27, %28, %cst_9 {dimension_numbers = #tpu.dot_dimension_numbers<[1], [0], [0], [1], [0, 0, 1, 1], [], []>} : vector<256x384xbf16>, vector<384x128xbf16>, vector<256x128xf32> -> vector<256x128xf32>
    %30 = arith.addf %20, %29 : vector<256x128xf32>
    %31 = vector.extract_strided_slice %7 {offsets = [2, 0, 0], sizes = [16, 16, 128], strides = [1, 1, 1]} : vector<18x18x128xbf16> to vector<16x16x128xbf16>
    %32 = vector.shape_cast %31 : vector<16x16x128xbf16> to vector<256x128xbf16>
    %33 = vector.extract_strided_slice %7 {offsets = [2, 1, 0], sizes = [16, 16, 128], strides = [1, 1, 1]} : vector<18x18x128xbf16> to vector<16x16x128xbf16>
    %34 = vector.shape_cast %33 : vector<16x16x128xbf16> to vector<256x128xbf16>
    %35 = vector.extract_strided_slice %7 {offsets = [2, 2, 0], sizes = [16, 16, 128], strides = [1, 1, 1]} : vector<18x18x128xbf16> to vector<16x16x128xbf16>
    %36 = vector.shape_cast %35 : vector<16x16x128xbf16> to vector<256x128xbf16>
    %37 = tpu.concatenate %32, %34, %36 in 1 : vector<256x128xbf16>, vector<256x128xbf16>, vector<256x128xbf16> -> vector<256x384xbf16>
    %38 = vector.extract_strided_slice %9 {offsets = [768, 0], sizes = [384, 128], strides = [1, 1]} : vector<1152x128xbf16> to vector<384x128xbf16>
    %cst_10 = arith.constant dense<0.000000e+00> : vector<256x128xf32>
    %39 = tpu.matmul %37, %38, %cst_10 {dimension_numbers = #tpu.dot_dimension_numbers<[1], [0], [0], [1], [0, 0, 1, 1], [], []>} : vector<256x384xbf16>, vector<384x128xbf16>, vector<256x128xf32> -> vector<256x128xf32>
    %40 = arith.addf %30, %39 : vector<256x128xf32>
    %cst_11 = arith.constant dense<0.000000e+00> : vector<128xf32>
    %41 = vector.multi_reduction <add>, %40, %cst_11 [0] : vector<256x128xf32> to vector<128xf32>
    %42 = vector.shape_cast %41 : vector<128xf32> to vector<1x128xf32>
    %cst_12 = arith.constant 2.560000e+02 : f32
    %43 = vector.broadcast %cst_12 : f32 to vector<1x128xf32>
    %44 = arith.divf %42, %43 : vector<1x128xf32>
    %45 = arith.mulf %40, %40 : vector<256x128xf32>
    %cst_13 = arith.constant dense<0.000000e+00> : vector<128xf32>
    %46 = vector.multi_reduction <add>, %45, %cst_13 [0] : vector<256x128xf32> to vector<128xf32>
    %47 = vector.shape_cast %46 : vector<128xf32> to vector<1x128xf32>
    %cst_14 = arith.constant 2.560000e+02 : f32
    %48 = vector.broadcast %cst_14 : f32 to vector<1x128xf32>
    %49 = arith.divf %47, %48 : vector<1x128xf32>
    %50 = arith.mulf %44, %44 : vector<1x128xf32>
    %51 = arith.subf %49, %50 : vector<1x128xf32>
    %cst_15 = arith.constant 9.99999974E-6 : f32
    %52 = vector.broadcast %cst_15 : f32 to vector<1x128xf32>
    %53 = arith.addf %51, %52 : vector<1x128xf32>
    %54 = math.rsqrt %53 : vector<1x128xf32>
    %55 = arith.mulf %1, %54 : vector<1x128xf32>
    %56 = vector.broadcast %55 : vector<1x128xf32> to vector<256x128xf32>
    %57 = arith.mulf %40, %56 : vector<256x128xf32>
    %58 = arith.mulf %44, %55 : vector<1x128xf32>
    %59 = arith.subf %2, %58 : vector<1x128xf32>
    %60 = vector.broadcast %59 : vector<1x128xf32> to vector<256x128xf32>
    %61 = arith.addf %57, %60 : vector<256x128xf32>
    %cst_16 = arith.constant 0.000000e+00 : f32
    %62 = vector.broadcast %cst_16 : f32 to vector<256x128xf32>
    %63 = arith.maximumf %61, %62 : vector<256x128xf32>
    %64 = arith.truncf %63 : vector<256x128xf32> to vector<256x128xbf16>
    %65 = vector.shape_cast %64 : vector<256x128xbf16> to vector<16x16x128xbf16>
    %c1 = arith.constant 1 : index
    %c1_17 = arith.constant 1 : index
    %c0_18 = arith.constant 0 : index
    %66 = vector.load %arg5[%c1, %c1_17, %c0_18] : memref<18x18x128xbf16, #tpu.memory_space<vmem>>, vector<16x16x128xbf16>
    tpu.vector_store %arg5[%c1, %c1_17, %c0_18], %65 {strides = array<i32>} : memref<18x18x128xbf16, #tpu.memory_space<vmem>>, vector<16x16x128xbf16>,
    %67 = vector.extract_strided_slice %65 {offsets = [1, 0, 0], sizes = [1, 16, 128], strides = [1, 1, 1]} : vector<16x16x128xbf16> to vector<1x16x128xbf16>
    %c0_19 = arith.constant 0 : index
    %c1_20 = arith.constant 1 : index
    %c0_21 = arith.constant 0 : index
    %68 = vector.load %arg5[%c0_19, %c1_20, %c0_21] : memref<18x18x128xbf16, #tpu.memory_space<vmem>>, vector<1x16x128xbf16>
    tpu.vector_store %arg5[%c0_19, %c1_20, %c0_21], %67 {strides = array<i32>} : memref<18x18x128xbf16, #tpu.memory_space<vmem>>, vector<1x16x128xbf16>,
    %69 = vector.extract_strided_slice %65 {offsets = [14, 0, 0], sizes = [1, 16, 128], strides = [1, 1, 1]} : vector<16x16x128xbf16> to vector<1x16x128xbf16>
    %c17 = arith.constant 17 : index
    %c1_22 = arith.constant 1 : index
    %c0_23 = arith.constant 0 : index
    %70 = vector.load %arg5[%c17, %c1_22, %c0_23] : memref<18x18x128xbf16, #tpu.memory_space<vmem>>, vector<1x16x128xbf16>
    tpu.vector_store %arg5[%c17, %c1_22, %c0_23], %69 {strides = array<i32>} : memref<18x18x128xbf16, #tpu.memory_space<vmem>>, vector<1x16x128xbf16>,
    %c0_24 = arith.constant 0 : index
    %c2 = arith.constant 2 : index
    %c0_25 = arith.constant 0 : index
    %71 = vector.load %arg5[%c0_24, %c2, %c0_25] : memref<18x18x128xbf16, #tpu.memory_space<vmem>>, vector<18x1x128xbf16>
    %c0_26 = arith.constant 0 : index
    %c0_27 = arith.constant 0 : index
    %c0_28 = arith.constant 0 : index
    %72 = vector.load %arg5[%c0_26, %c0_27, %c0_28] : memref<18x18x128xbf16, #tpu.memory_space<vmem>>, vector<18x1x128xbf16>
    tpu.vector_store %arg5[%c0_26, %c0_27, %c0_28], %71 {strides = array<i32>} : memref<18x18x128xbf16, #tpu.memory_space<vmem>>, vector<18x1x128xbf16>,
    %c0_29 = arith.constant 0 : index
    %c15 = arith.constant 15 : index
    %c0_30 = arith.constant 0 : index
    %73 = vector.load %arg5[%c0_29, %c15, %c0_30] : memref<18x18x128xbf16, #tpu.memory_space<vmem>>, vector<18x1x128xbf16>
    %c0_31 = arith.constant 0 : index
    %c17_32 = arith.constant 17 : index
    %c0_33 = arith.constant 0 : index
    %74 = vector.load %arg5[%c0_31, %c17_32, %c0_33] : memref<18x18x128xbf16, #tpu.memory_space<vmem>>, vector<18x1x128xbf16>
    tpu.vector_store %arg5[%c0_31, %c17_32, %c0_33], %73 {strides = array<i32>} : memref<18x18x128xbf16, #tpu.memory_space<vmem>>, vector<18x1x128xbf16>,
    %c0_34 = arith.constant 0 : index
    %c0_35 = arith.constant 0 : index
    %c0_36 = arith.constant 0 : index
    %75 = vector.load %arg5[%c0_34, %c0_35, %c0_36] : memref<18x18x128xbf16, #tpu.memory_space<vmem>>, vector<18x18x128xbf16>
    %76 = vector.extract_strided_slice %5 {offsets = [1, 0, 0], sizes = [1, 1152, 128], strides = [1, 1, 1]} : vector<2x1152x128xbf16> to vector<1x1152x128xbf16>
    %77 = vector.shape_cast %76 : vector<1x1152x128xbf16> to vector<1152x128xbf16>
    %cst_37 = arith.constant 0.000000e+00 : f32
    %78 = vector.broadcast %cst_37 : f32 to vector<256x128xf32>
    %79 = vector.extract_strided_slice %75 {offsets = [0, 0, 0], sizes = [16, 16, 128], strides = [1, 1, 1]} : vector<18x18x128xbf16> to vector<16x16x128xbf16>
    %80 = vector.shape_cast %79 : vector<16x16x128xbf16> to vector<256x128xbf16>
    %81 = vector.extract_strided_slice %75 {offsets = [0, 1, 0], sizes = [16, 16, 128], strides = [1, 1, 1]} : vector<18x18x128xbf16> to vector<16x16x128xbf16>
    %82 = vector.shape_cast %81 : vector<16x16x128xbf16> to vector<256x128xbf16>
    %83 = vector.extract_strided_slice %75 {offsets = [0, 2, 0], sizes = [16, 16, 128], strides = [1, 1, 1]} : vector<18x18x128xbf16> to vector<16x16x128xbf16>
    %84 = vector.shape_cast %83 : vector<16x16x128xbf16> to vector<256x128xbf16>
    %85 = tpu.concatenate %80, %82, %84 in 1 : vector<256x128xbf16>, vector<256x128xbf16>, vector<256x128xbf16> -> vector<256x384xbf16>
    %86 = vector.extract_strided_slice %77 {offsets = [0, 0], sizes = [384, 128], strides = [1, 1]} : vector<1152x128xbf16> to vector<384x128xbf16>
    %cst_38 = arith.constant dense<0.000000e+00> : vector<256x128xf32>
    %87 = tpu.matmul %85, %86, %cst_38 {dimension_numbers = #tpu.dot_dimension_numbers<[1], [0], [0], [1], [0, 0, 1, 1], [], []>} : vector<256x384xbf16>, vector<384x128xbf16>, vector<256x128xf32> -> vector<256x128xf32>
    %88 = arith.addf %78, %87 : vector<256x128xf32>
    %89 = vector.extract_strided_slice %75 {offsets = [1, 0, 0], sizes = [16, 16, 128], strides = [1, 1, 1]} : vector<18x18x128xbf16> to vector<16x16x128xbf16>
    %90 = vector.shape_cast %89 : vector<16x16x128xbf16> to vector<256x128xbf16>
    %91 = vector.extract_strided_slice %75 {offsets = [1, 1, 0], sizes = [16, 16, 128], strides = [1, 1, 1]} : vector<18x18x128xbf16> to vector<16x16x128xbf16>
    %92 = vector.shape_cast %91 : vector<16x16x128xbf16> to vector<256x128xbf16>
    %93 = vector.extract_strided_slice %75 {offsets = [1, 2, 0], sizes = [16, 16, 128], strides = [1, 1, 1]} : vector<18x18x128xbf16> to vector<16x16x128xbf16>
    %94 = vector.shape_cast %93 : vector<16x16x128xbf16> to vector<256x128xbf16>
    %95 = tpu.concatenate %90, %92, %94 in 1 : vector<256x128xbf16>, vector<256x128xbf16>, vector<256x128xbf16> -> vector<256x384xbf16>
    %96 = vector.extract_strided_slice %77 {offsets = [384, 0], sizes = [384, 128], strides = [1, 1]} : vector<1152x128xbf16> to vector<384x128xbf16>
    %cst_39 = arith.constant dense<0.000000e+00> : vector<256x128xf32>
    %97 = tpu.matmul %95, %96, %cst_39 {dimension_numbers = #tpu.dot_dimension_numbers<[1], [0], [0], [1], [0, 0, 1, 1], [], []>} : vector<256x384xbf16>, vector<384x128xbf16>, vector<256x128xf32> -> vector<256x128xf32>
    %98 = arith.addf %88, %97 : vector<256x128xf32>
    %99 = vector.extract_strided_slice %75 {offsets = [2, 0, 0], sizes = [16, 16, 128], strides = [1, 1, 1]} : vector<18x18x128xbf16> to vector<16x16x128xbf16>
    %100 = vector.shape_cast %99 : vector<16x16x128xbf16> to vector<256x128xbf16>
    %101 = vector.extract_strided_slice %75 {offsets = [2, 1, 0], sizes = [16, 16, 128], strides = [1, 1, 1]} : vector<18x18x128xbf16> to vector<16x16x128xbf16>
    %102 = vector.shape_cast %101 : vector<16x16x128xbf16> to vector<256x128xbf16>
    %103 = vector.extract_strided_slice %75 {offsets = [2, 2, 0], sizes = [16, 16, 128], strides = [1, 1, 1]} : vector<18x18x128xbf16> to vector<16x16x128xbf16>
    %104 = vector.shape_cast %103 : vector<16x16x128xbf16> to vector<256x128xbf16>
    %105 = tpu.concatenate %100, %102, %104 in 1 : vector<256x128xbf16>, vector<256x128xbf16>, vector<256x128xbf16> -> vector<256x384xbf16>
    %106 = vector.extract_strided_slice %77 {offsets = [768, 0], sizes = [384, 128], strides = [1, 1]} : vector<1152x128xbf16> to vector<384x128xbf16>
    %cst_40 = arith.constant dense<0.000000e+00> : vector<256x128xf32>
    %107 = tpu.matmul %105, %106, %cst_40 {dimension_numbers = #tpu.dot_dimension_numbers<[1], [0], [0], [1], [0, 0, 1, 1], [], []>} : vector<256x384xbf16>, vector<384x128xbf16>, vector<256x128xf32> -> vector<256x128xf32>
    %108 = arith.addf %98, %107 : vector<256x128xf32>
    %cst_41 = arith.constant dense<0.000000e+00> : vector<128xf32>
    %109 = vector.multi_reduction <add>, %108, %cst_41 [0] : vector<256x128xf32> to vector<128xf32>
    %110 = vector.shape_cast %109 : vector<128xf32> to vector<1x128xf32>
    %cst_42 = arith.constant 2.560000e+02 : f32
    %111 = vector.broadcast %cst_42 : f32 to vector<1x128xf32>
    %112 = arith.divf %110, %111 : vector<1x128xf32>
    %113 = arith.mulf %108, %108 : vector<256x128xf32>
    %cst_43 = arith.constant dense<0.000000e+00> : vector<128xf32>
    %114 = vector.multi_reduction <add>, %113, %cst_43 [0] : vector<256x128xf32> to vector<128xf32>
    %115 = vector.shape_cast %114 : vector<128xf32> to vector<1x128xf32>
    %cst_44 = arith.constant 2.560000e+02 : f32
    %116 = vector.broadcast %cst_44 : f32 to vector<1x128xf32>
    %117 = arith.divf %115, %116 : vector<1x128xf32>
    %118 = arith.mulf %112, %112 : vector<1x128xf32>
    %119 = arith.subf %117, %118 : vector<1x128xf32>
    %cst_45 = arith.constant 9.99999974E-6 : f32
    %120 = vector.broadcast %cst_45 : f32 to vector<1x128xf32>
    %121 = arith.addf %119, %120 : vector<1x128xf32>
    %122 = math.rsqrt %121 : vector<1x128xf32>
    %123 = arith.mulf %3, %122 : vector<1x128xf32>
    %124 = vector.broadcast %123 : vector<1x128xf32> to vector<256x128xf32>
    %125 = arith.mulf %108, %124 : vector<256x128xf32>
    %126 = arith.mulf %112, %123 : vector<1x128xf32>
    %127 = arith.subf %4, %126 : vector<1x128xf32>
    %128 = vector.broadcast %127 : vector<1x128xf32> to vector<256x128xf32>
    %129 = arith.addf %125, %128 : vector<256x128xf32>
    %130 = vector.extract_strided_slice %7 {offsets = [1, 1, 0], sizes = [16, 16, 128], strides = [1, 1, 1]} : vector<18x18x128xbf16> to vector<16x16x128xbf16>
    %131 = arith.extf %130 : vector<16x16x128xbf16> to vector<16x16x128xf32>
    %132 = vector.shape_cast %131 : vector<16x16x128xf32> to vector<256x128xf32>
    %133 = arith.addf %129, %132 : vector<256x128xf32>
    %c0_46 = arith.constant 0 : index
    %c0_47 = arith.constant 0 : index
    %c0_48 = arith.constant 0 : index
    %134 = vector.load %arg4[%c0_46, %c0_47, %c0_48] : memref<1x256x128xf32, #tpu.memory_space<vmem>>, vector<1x256x128xf32>
    %135 = vector.shape_cast %134 : vector<1x256x128xf32> to vector<256x128xf32>
    %136 = vector.shape_cast %133 : vector<256x128xf32> to vector<1x256x128xf32>
    tpu.vector_store %arg4[%c0_46, %c0_47, %c0_48], %136 {strides = array<i32>} : memref<1x256x128xf32, #tpu.memory_space<vmem>>, vector<1x256x128xf32>,
    return
  }
  func.func @transform_0(%arg0: i32) -> (i32, i32, i32, i32) {
    %c0_i32 = arith.constant 0 : i32
    %c0_i32_0 = arith.constant 0 : i32
    %c0_i32_1 = arith.constant 0 : i32
    %c0_i32_2 = arith.constant 0 : i32
    return %arg0, %c0_i32, %c0_i32_0, %c0_i32_1 : i32, i32, i32, i32
  }
  func.func @transform_1(%arg0: i32) -> (i32, i32, i32) {
    %c0_i32 = arith.constant 0 : i32
    %c0_i32_0 = arith.constant 0 : i32
    %c0_i32_1 = arith.constant 0 : i32
    %c0_i32_2 = arith.constant 0 : i32
    return %c0_i32, %c0_i32_0, %c0_i32_1 : i32, i32, i32
  }
  func.func @transform_2(%arg0: i32) -> (i32, i32) {
    %c0_i32 = arith.constant 0 : i32
    %c0_i32_0 = arith.constant 0 : i32
    %c0_i32_1 = arith.constant 0 : i32
    return %c0_i32, %c0_i32_0 : i32, i32
  }
  func.func @transform_3(%arg0: i32) -> (i32, i32, i32) {
    %c0_i32 = arith.constant 0 : i32
    %c0_i32_0 = arith.constant 0 : i32
    %c0_i32_1 = arith.constant 0 : i32
    return %arg0, %c0_i32, %c0_i32_0 : i32, i32, i32
  }
}

</mosaic_0001>

<bundles_post_ra>
// kernel: tpu_custom_call.1
= control target key start
LH: loop header
LB: loop body
LE: loop exit
PB: predicated region body
PF: predicated region fallthrough
CT: control target
= control target key end

     0   :  { %8 = vsyncpa [#allocation4], 0  ;;  %s12400_s0 = inlined_call_operand.vmem [shape: bf16[2,18,18,128], index: 0, kind: input, shape index: {}]   ;;  %s12401_s1 = inlined_call_operand.hbm [shape: bf16[2,1152,128], index: 1, kind: input, shape index: {}]   ;;  %s12402_s2 = inlined_call_operand.vmem [shape: f32[4,128], index: 2, kind: input, shape index: {}]   ;;  %s12403_s3 = inlined_call_operand.hbm [shape: f32[2,256,128], index: 3, kind: output, shape index: {}]  }
   0x1   :  { %9 = vsyncpa [#allocation5], 0 }
   0x2   :  { %11 = vsyncpa [#allocation5 + $0x1], 0  ;;  %s8984_s12 = smov 0   ;;  %s8986_s13 = smov 0  }
   0x3   :  { %s8988_s14 = smov 0   ;;  %s8990_s15 = smov 0  }
   0x4 LB: > { %s9005_s16 = sadd.s32 4294967295, %s8956_s15   ;;  %s6719_s17 = sadd.s32 4294967294, %s8956_s15   ;;  %s8956_s15 = sphi %s8990_s15, %s12718_s15   ;;  %s8952_s14 = sphi %s8988_s14, %s12717_s14   ;;  %s8948_s13 = sphi %s8986_s13, %s12716_s13   ;;  %s8944_s12 = sphi %s8984_s12, %s12715_s12  }
   0x5   : > { %s9009_s18 = sadd.s32 1, %s8956_s15   ;;  %s92_s19 = sadd.s32 1, %s8952_s14 }
   0x6   : > { %s89_s20 = ssub.s32 %s8956_s15, %s9009_s18  ;;  %p102_p0 = scmp.ne.s32.totalorder %s8952_s14, %s8948_s13 }
   0x7   : > { %p90_p1 = scmp.eq.s32.totalorder %s89_s20, 0  ;;  %p103_p2 = scmp.eq.s32.totalorder %s9005_s16, 1 }
   0x8   : > { %p108_p3 = scmp.ne.s32.totalorder %s8948_s13, %s8944_s12  ;;  %p109_p4 = scmp.eq.s32.totalorder %s6719_s17, 1 }
   0x9   : > { %s9020_s21 = scalar_select %p90_p1, %s8952_s14, %s92_s19  }
   0xa   : > { %p9022_p5 = por %p103_p2, %p102_p0  ;;  %p9026_p6 = por %p109_p4, %p108_p3 }
   0xb   : > { %p6720_p7 = scmp.ge.s32.totalorder %s8956_s15, 1  ;;  %p116_p8 = scmp.lt.s32.totalorder %s8956_s15, 3 }
   0xc   : > { %s12482_s22 = scalar_select %p9022_p5, 1, 0 }
   0xd   : > { %s12483_s23 = scalar_select %p9026_p6, 1, 0 }
   0xe   : > { %p12404_p9 = scmp.eq.s32.totalorder %s9005_s16, 0  ;;  %p9033_p10 = pnand %p6720_p7, %p116_p8 }
   0xf   : > { %s8958_s25 = smov [#allocation3]   ;;  %s8862_s30 = scalar_lea.hbm %s12401_s1, 18432 }
  0x10   : > { %s12484_s24 = scalar_select %p9033_p10, 1, 0 }
  0x11   : > { %s128_s26 = sshll.u32 %s8958_s25, 4  ;;  %p8552_p11 = pneg %p9033_p10  ;;  %s129_s26 = int_to_ptr.vmem [resolvable:$true] %s128_s26 }
  0x12   : > { %p8863_p13 = scmp.ne.s32.totalorder %s12401_s1, %s8862_s30  ;;  %p8869_p3 = scmp.lt.u32.totalorder %s8862_s30, %s12401_s1 }
  0x13   : > { %p9041_p12 = pnand %p12404_p9, %p8552_p11 }
  0x15   : > { %p8864_p0 = pneg %p9041_p12 }
  0x17   : > { %p8865_p1 = pnand %p8864_p0, %p8863_p13 }
  0x19   : > { %p8866_p2 = pneg %p8865_p1 }
  0x1b   : > { %p8871_p4 = pnand %p8869_p3, %p8866_p2 }
  0x1d   : > { %8874 = shalt.err (!%p8871_p4)
}
  0x1e   : > { %s8875_s8 = scalar_lea.vmem %s129_s26, 18432  ;;  %p8883_p9 = scmp.lt.s32.totalorder %s129_s26, %s129_s26 }
  0x1f   : > { %p8876_p7 = scmp.ne.s32.totalorder %s129_s26, %s8875_s8  ;;  %p8884_p6 = scmp.lt.s32.totalorder %s8875_s8, %s8875_s8 }
  0x21   : > { %p8878_p8 = pnand %p8876_p7, %p8864_p0  ;;  %p8885_p5 = por %p8884_p6, %p8883_p9 }
  0x23   : > { %p8879_p11 = pneg %p8878_p8 }
  0x25   : > { %p8886_p10 = pnand %p8885_p5, %p8879_p11 }
  0x27   : > { %8889 = shalt.err (!%p8886_p10)
}
  0x28   : > { %s8959_s9 = smov 64   ;;  %s8960_s10 = smov 4  }
  0x29   : > { %8555 = dma.hbm_to_vmem [thread:$0]  (!%p9041_p12), %s12401_s1, 18432, %s129_s26, [#allocation4], %s8959_s9, %s8959_s9, %s8960_s10  }
  0x2a   : > { %p12486_p13 = scmp.ne.s32.totalorder %s12484_s24, 0 }
  0x2c   : > { %155 = sbr.rel (%p12486_p13) target bundleno = 1429 (0x595), region = 32 }
  0x33   : > { %p12487_p1 = scmp.eq.s32.totalorder %s9005_s16, 0 }
  0x35   : > { %8935 = dma.done.wait (%p12487_p1), [#allocation4], 18432   ;;  %p12488_p0 = pmov %p12487_p1 }
  0x36   : > { %v8600_v0 = vld [vmem:[#allocation3 + $0x100] sm:$0xff]   ;;  %v8604_v4 = vld [vmem:[#allocation3 + $0x108] sm:$0xff]   ;;  %v8608_v8 = vld [vmem:[#allocation3 + $0x110] sm:$0xff]   ;;  %p179_p5 = scmp.lt.s32.totalorder %s9005_s16, 1  ;;  %vm528_vm0 = vsmask.f32 3328 }
  0x37   : > { %8937 = vsyncadd (%p12488_p0), [#allocation4], 4294948864  ;;  %v8601_v1 = vld [vmem:[#allocation3 + $0x40] sm:$0xff]   ;;  %7121 = vmatprep.subr.bf16.mxu0 %v8600_v0  ;;  %v8605_v5 = vld [vmem:[#allocation3 + $0x48] sm:$0xff]   ;;  %vm529_vm1 = vsmask.f32 7440 }
  0x38   : > { %v8602_v2 = vld [vmem:[#allocation3 + $0xc0] sm:$0xff]   ;;  %7257 = vmatprep.subr.bf16.mxu1 %v8601_v1  ;;  %v8606_v6 = vld [vmem:[#allocation3 + $0xc8] sm:$0xff]   ;;  %v8609_v9 = vld [vmem:[#allocation3 + $0x50] sm:$0xff]   ;;  %s180_s19 = scalar_select %p179_p5, %s9005_s16, 1  ;;  %v12489_v57 = vmov 0  ;;  %vm963_vm3 = vcmask 1042432  }
  0x39   : > { %v8603_v3 = vld [vmem:[#allocation3] sm:$0xff]   ;;  %7122 = vmatpush3.bf16.msra.mxu0 %v8602_v2  ;;  %v8607_v7 = vld [vmem:[#allocation3 + $0x8] sm:$0xff]   ;;  %v8610_v10 = vld [vmem:[#allocation3 + $0xd0] sm:$0xff]   ;;  %vm964_vm4 = vcmask 1046532   ;;  %vm3111_vm6 = vsmask.f32 256 }
  0x3a   : > { %7258 = vmatpush3.bf16.msra.mxu1 %v8603_v3  ;;  %7123 = vmatprep.subr.bf16.mxu0 %v8604_v4  ;;  %v8611_v11 = vld [vmem:[#allocation3 + $0x10] sm:$0xff]   ;;  %v8612_v12 = vld [vmem:[#allocation3 + $0x118] sm:$0xff]   ;;  %v8616_v16 = vld [vmem:[#allocation3 + $0x120] sm:$0xff]   ;;  %s8545_s20 = smul.u32 216, %s180_s19  ;;  %vm3112_vm7 = vsmask.f32 4368 }
  0x3b   : > { %7259 = vmatprep.subr.bf16.mxu1 %v8605_v5  ;;  %v8613_v13 = vld [vmem:[#allocation3 + $0x58] sm:$0xff]   ;;  %v8617_v17 = vld [vmem:[#allocation3 + $0x60] sm:$0xff]   ;;  %v8620_v20 = vld [vmem:[#allocation3 + $0x128] sm:$0xff]   ;;  %vm3442_vm8 = vcmask 1040384   ;;  %vm3436_vm11 = vsmask.f32 7938 }
  0x3c   : > { %v8614_v14 = vld [vmem:[#allocation3 + $0xd8] sm:$0xff]   ;;  %v8618_v18 = vld [vmem:[#allocation3 + $0xe0] sm:$0xff]   ;;  %v8621_v21 = vld [vmem:[#allocation3 + $0x68] sm:$0xff]   ;;  %s9072_s26 = scalar_lea.vmem %s12400_s0, %s8545_s20  ;;  %vm3435_vm13 = vcmask 1043456   ;;  %vm6454_vm15 = vcmask 1046528   ;;  %s176_s4 = sand.u32 1, %s8948_s13  }
  0x3d   : > { %7124 = vmatpush3.bf16.msra.mxu0 %v8606_v6  ;;  %v8615_v15 = vld [vmem:[#allocation3 + $0x18] sm:$0xff]   ;;  %v8619_v19 = vld [vmem:[#allocation3 + $0x20] sm:$0xff]   ;;  %v8622_v22 = vld [vmem:[#allocation3 + $0xe8] sm:$0xff]   ;;  %s6725_s5 = sshll.u32 %s176_s4, 8  ;;  %s7120_s7 = sshll.u32 %s9005_s16, 12 }
  0x3e   : > { %7260 = vmatpush3.bf16.msra.mxu1 %v8607_v7  ;;  %7125 = vmatprep.subr.bf16.mxu0 %v8608_v8  ;;  %v8623_v23 = vld [vmem:[#allocation3 + $0x28] sm:$0xff]   ;;  %v8624_v24 = vld [vmem:[#allocation3 + $0x130] sm:$0xff]   ;;  %v8628_v28 = vld [vmem:[#allocation3 + $0x138] sm:$0xff]   ;;  %s12283_s6 = scalar_lea.vmem [#allocation6], %s6725_s5  ;;  %s12339_s10 = scalar_lea.hbm %s12403_s3, %s7120_s7 }
  0x3f   : > { %7261 = vmatprep.subr.bf16.mxu1 %v8609_v9  ;;  %v8625_v25 = vld [vmem:[#allocation3 + $0x70] sm:$0xff]   ;;  %v8629_v29 = vld [vmem:[#allocation3 + $0x78] sm:$0xff]   ;;  %v477_v32 = vld [vmem:[%s9072_s26 + $0xc] sm:$0xf]  ;;  %s6645_s8 = sshll.u32 %s12283_s6, 4  ;;  %s12359_s11 = scalar_lea.sflag [#allocation5], %s176_s4  ;;  %s12341_s8 = int_to_ptr.vmem [resolvable:$true] %s6645_s8 }
  0x40   : > { %v8626_v26 = vld [vmem:[#allocation3 + $0xf0] sm:$0xff]   ;;  %v8630_v30 = vld [vmem:[#allocation3 + $0xf8] sm:$0xff]   ;;  %v478_v33 = vld [vmem:[%s9072_s26 + $0x10] sm:$0xf]  ;;  %v556_v35 = vshrl.u32 %v477_v32, 16  ;;  %v559_v36 = vshll.u32 %v477_v32, 16 }
  0x41   : > { %7126 = vmatpush3.bf16.msra.mxu0 %v8610_v10  ;;  %v8627_v27 = vld [vmem:[#allocation3 + $0x30] sm:$0xff]   ;;  %v8631_v31 = vld [vmem:[#allocation3 + $0x38] sm:$0xff]   ;;  %v479_v34 = vld [vmem:[%s9072_s26 + $0x14] sm:$0x1]  ;;  %v565_v37 = vshll.u32 %v478_v33, 16  ;;  %v569_v38 = vshrl.u32 %v478_v33, 16  ;;  %v9095_v60 = vcombine.low %v477_v32, %v478_v33 }
  0x42   : > { %7262 = vmatpush3.bf16.msra.mxu1 %v8611_v11  ;;  %7127 = vmatprep.subr.bf16.mxu0 %v8612_v12  ;;  %v9078_v39 = vld [vmem:[%s9072_s26] sm:$0xf]  ;;  %v575_v40 = vshll.u32 %v479_v34, 16  ;;  %v9081_v41 = vld [vmem:[%s9072_s26 + $0x4] sm:$0xf]  ;;  %v558_v44 = vrot.slane %v556_v35, 4  ;;  %vm9091_vm2 = vmor %vm528_vm0, %vm529_vm1 }
  0x43   : > { %7263 = vmatprep.subr.bf16.mxu1 %v8613_v13  ;;  %v476_v42 = vld [vmem:[%s9072_s26 + $0x8] sm:$0x1]  ;;  %v532_v43 = vshrl.u32 %v9078_v39, 16  ;;  %v561_v45 = vrot.slane %v559_v36, 5  ;;  %v567_v46 = vrot.slane %v565_v37, 5  ;;  %v571_v47 = vrot.slane %v569_v38, 4  ;;  %vm9511_vm5 = vmor %vm963_vm3, %vm964_vm4 }
  0x44   : > { %v577_v48 = vrot.slane %v575_v40, 5  ;;  %v535_v50 = vshll.u32 %v9078_v39, 16  ;;  %v541_v53 = vshll.u32 %v9081_v41, 16  ;;  %v545_v54 = vshrl.u32 %v9081_v41, 16  ;;  %v8633_v55 = vld [vmem:[#allocation3 + $0x140] sm:$0xff]   ;;  %v8637_v12 = vld [vmem:[#allocation3 + $0x148] sm:$0xff]   ;;  %vm10383_vm9 = vmor %vm3111_vm6, %vm3112_vm7 }
  0x45   : > { %7128 = vmatpush3.bf16.msra.mxu0 %v8614_v14  ;;  %v534_v49 = vrot.slane %v532_v43, 4  ;;  %v562_v51 = vor.u32 %v561_v45, %v558_v44  ;;  %v572_v52 = vor.u32 %v571_v47, %v567_v46  ;;  %v480_v56 = vld [vmem:[%s9072_s26 + $0x18] sm:$0xf]  ;;  %v12490_v57 = vsel %vm9091_vm2, 4294967295, %v12489_v57  ;;  %v481_v61 = vld [vmem:[%s9072_s26 + $0x1c] sm:$0xf]  ;;  %vm10397_vm10 = vmand %vm3442_vm8, %vm3111_vm6 }
  0x46   : > { %7264 = vmatpush3.bf16.msra.mxu1 %v8615_v15  ;;  %7129 = vmatprep.subr.bf16.mxu0 %v8616_v16  ;;  %12491 = vst [vmem:[#allocation9_spill] sm:$0xff] %v12490_v57  ;;  %v537_v58 = vrot.slane %v535_v50, 5  ;;  %v551_v59 = vshll.u32 %v476_v42, 16  ;;  %v543_v0 = vrot.slane %v541_v53, 5  ;;  %v547_v1 = vrot.slane %v545_v54, 4  ;;  %v8640_v35 = vld [vmem:[#allocation3 + $0x150] sm:$0xff]   ;;  %vm10481_vm12 = vmand %vm3442_vm8, %vm3436_vm11 }
  0x47   : > { %7265 = vmatprep.subr.bf16.mxu1 %v8617_v17  ;;  %v563_v62 = vrot.slane %v562_v51, 4  ;;  %v573_v63 = vrot.slane %v572_v52, 4  ;;  %v9099_v4 = vld [vmem:[%s9072_s26 + $0x20] sm:$0x1]  ;;  %v580_v5 = vshrl.u32 %v480_v56, 16  ;;  %v583_v6 = vshll.u32 %v480_v56, 16  ;;  %vm10693_vm14 = vmand %vm3435_vm13, %vm3436_vm11 }
  0x48   : > { %v538_v2 = vor.u32 %v537_v58, %v534_v49  ;;  %v553_v3 = vrot.slane %v551_v59, 5  ;;  %v548_v9 = vor.u32 %v547_v1, %v543_v0  ;;  %v589_v10 = vshll.u32 %v481_v61, 16  ;;  %v9106_v11 = vld [vmem:[%s9072_s26 + $0x24] sm:$0xf]  ;;  %v8647_v17 = vld [vmem:[#allocation3 + $0x80] sm:$0xff]   ;;  %s8890_s17 = scalar_lea.vmem %s12341_s8, 4096 }
  0x49   : > { %7130 = vmatpush3.bf16.msra.mxu0 %v8618_v18  ;;  %v568_v7 = vsel %vm9091_vm2, %v563_v62, %v567_v46  ;;  %v578_v8 = vsel %vm9091_vm2, %v573_v63, %v577_v48  ;;  %v582_v15 = vrot.slane %v580_v5, 4  ;;  %v585_v16 = vrot.slane %v583_v6, 5  ;;  %v9123_v34 = vld [vmem:[%s9072_s26 + $0x30] sm:$0xf]  ;;  %v488_v51 = vld [vmem:[%s9072_s26 + $0x38] sm:$0x1]  ;;  %p8891_p6 = scmp.ne.s32.totalorder %s12341_s8, %s8890_s17 }
  0x4a   : > { %7266 = vmatpush3.bf16.msra.mxu1 %v8619_v19  ;;  %7131 = vmatprep.subr.bf16.mxu0 %v8620_v20  ;;  %v6760_v13 = vcombine.low %v568_v7, %v578_v8  ;;  %v539_v14 = vrot.slane %v538_v2, 4  ;;  %v549_v18 = vrot.slane %v548_v9, 4  ;;  %v591_v19 = vrot.slane %v589_v10, 5  ;;  %v9142_v59 = vld [vmem:[%s9072_s26 + $0x3c] sm:$0xf]  ;;  %p12713_p9 = scmp.ne.s32.totalorder %s12482_s22, 0 }
  0x4b   : > { %7267 = vmatprep.subr.bf16.mxu1 %v8621_v21  ;;  %v593_v20 = vshrl.u32 %v481_v61, 16  ;;  %v599_v21 = vshll.u32 %v9099_v4, 16  ;;  %v604_v32 = vshrl.u32 %v9106_v11, 16  ;;  %v607_v33 = vshll.u32 %v9106_v11, 16  ;;  %v9147_v2 = vld [vmem:[%s9072_s26 + $0x40] sm:$0xf] }
  0x4c   : > { %1492 = vmatprep.mubr.bf16.mxu0 %v6760_v13  ;;  %v9130_v42 = vcombine.low %v480_v56, %v481_v61  ;;  %v628_v52 = vshrl.u32 %v9123_v34, 16  ;;  %v631_v53 = vshll.u32 %v9123_v34, 16  ;;  %v8643_v61 = vld [vmem:[#allocation3 + $0x158] sm:$0xff]   ;;  %v647_v8 = vshll.u32 %v488_v51, 16  ;;  %p8892_p10 = pnand %p8891_p6, %p12713_p9  ;;  %s8961_s19 = smov [#allocation6]  }
  0x4d   : > { %7132 = vmatpush3.bf16.msra.mxu0 %v8622_v22  ;;  %v544_v22 = vsel %vm9091_vm2, %v539_v14, %v543_v0  ;;  %v606_v43 = vrot.slane %v604_v32, 4  ;;  %v609_v44 = vrot.slane %v607_v33, 5  ;;  %s8894_s20 = sshll.u32 %s8961_s19, 4  ;;  %s8895_s20 = int_to_ptr.vmem [resolvable:$false] %s8894_s20 }
  0x4e   : > { %7268 = vmatpush3.bf16.msra.mxu1 %v8623_v23  ;;  %7133 = vmatprep.subr.bf16.mxu0 %v8624_v24  ;;  %v586_v23 = vor.u32 %v585_v16, %v582_v15  ;;  %v9112_v24 = vld [vmem:[%s9072_s26 + $0x28] sm:$0xf]  ;;  %v630_v0 = vrot.slane %v628_v52, 4  ;;  %v633_v1 = vrot.slane %v631_v53, 5  ;;  %v649_v15 = vrot.slane %v647_v8, 5  ;;  %p8893_p12 = pneg %p8892_p10  ;;  %s8896_s24 = scalar_lea.vmem %s8895_s20, 8192 }
  0x4f   : > { %7269 = vmatprep.subr.bf16.mxu1 %v8625_v25  ;;  %v485_v25 = vld [vmem:[%s9072_s26 + $0x2c] sm:$0x1]  ;;  %v613_v37 = vshll.u32 %v9112_v24, 16  ;;  %v617_v38 = vshrl.u32 %v9112_v24, 16  ;;  %v610_v49 = vor.u32 %v609_v44, %v606_v43  ;;  %v652_v16 = vshrl.u32 %v9142_v59, 16  ;;  %p8897_p2 = scmp.lt.s32.totalorder %s12341_s8, %s8895_s20  ;;  %p8898_p3 = scmp.lt.s32.totalorder %s8896_s24, %s8890_s17 }
  0x50   : > { %v623_v40 = vshll.u32 %v485_v25, 16  ;;  %v634_v10 = vor.u32 %v633_v1, %v630_v0 }
  0x51   : > { %7134 = vmatpush3.bf16.msra.mxu0 %v8626_v26  ;;  %v554_v26 = vsel %vm9091_vm2, %v549_v18, %v553_v3  ;;  %v615_v47 = vrot.slane %v613_v37, 5  ;;  %v619_v48 = vrot.slane %v617_v38, 4  ;;  %v611_v63 = vrot.slane %v610_v49, 4  ;;  %v8655_v3 = vld [vmem:[#allocation3 + $0x90] sm:$0xff]   ;;  %v494_v38 = vld [vmem:[%s9072_s26 + $0x50] sm:$0x1]  ;;  %p8899_p4 = por %p8898_p3, %p8897_p2 }
  0x52   : > { %7270 = vmatpush3.bf16.msra.mxu1 %v8627_v27  ;;  %7135 = vmatprep.subr.bf16.mxu0 %v8628_v28  ;;  %v6743_v27 = vcombine.low %v9078_v39, %v9081_v41  ;;  %v595_v28 = vrot.slane %v593_v20, 4  ;;  %v9128_v39 = vld [vmem:[%s9072_s26 + $0x34] sm:$0xf]  ;;  %v625_v50 = vrot.slane %v623_v40, 5  ;;  %v655_v20 = vshll.u32 %v9142_v59, 16 }
  0x53   : > { %7271 = vmatprep.subr.bf16.mxu1 %v8629_v29  ;;  %v601_v29 = vrot.slane %v599_v21, 5  ;;  %v8651_v41 = vld [vmem:[#allocation3 + $0x88] sm:$0xff]   ;;  %v637_v56 = vshll.u32 %v9128_v39, 16  ;;  %v641_v58 = vshrl.u32 %v9128_v39, 16  ;;  %v616_v9 = vsel %vm9091_vm2, %v611_v63, %v615_v47  ;;  %v8654_v63 = vld [vmem:[#allocation3 + $0x170] sm:$0xff]   ;;  %p8900_p7 = pnand %p8899_p4, %p8893_p12 }
  0x54   : > { %v596_v36 = vor.u32 %v595_v28, %v591_v19  ;;  %v661_v21 = vshll.u32 %v9147_v2, 16 }
  0x55   : > { %7136 = vmatpush3.bf16.msra.mxu0 %v8630_v30  ;;  %v6759_v30 = vcombine.low %v544_v22, %v554_v26  ;;  %v639_v6 = vrot.slane %v637_v56, 5  ;;  %v643_v7 = vrot.slane %v641_v58, 4  ;;  %v9165_v22 = vld [vmem:[%s9072_s26 + $0x4c] sm:$0xf]  ;;  %v654_v26 = vrot.slane %v652_v16, 4 }
  0x56   : > { %7272 = vmatpush3.bf16.msra.mxu1 %v8631_v31  ;;  %7937 = vmatprep.subr.bf16.mxu0 %v8633_v55  ;;  %v587_v31 = vrot.slane %v586_v23, 4  ;;  %v597_v46 = vrot.slane %v596_v36, 4  ;;  %v8646_v23 = vld [vmem:[#allocation3 + $0x160] sm:$0xff]   ;;  %v663_v32 = vrot.slane %v661_v21, 5  ;;  %v9214_v21 = vld [vmem:[%s9072_s26 + $0x60] sm:$0xf] }
  0x57   : > { %7985 = vmatprep.subr.bf16.mxu1 %v8647_v17  ;;  %1958 = vmatprep.mubr.bf16.mxu1 %v6759_v30  ;;  %v644_v14 = vor.u32 %v643_v7, %v639_v6  ;;  %v9206_v7 = vcombine.low %v9123_v34, %v9128_v39  ;;  %v8659_v34 = vld [vmem:[#allocation3 + $0x178] sm:$0xff]  }
  0x58   : > { %1493 = vmatmul.mubr.bf16.vlgmr.msra.gmra.mrb[0].mxu0 %v9095_v60  ;;  %v592_v45 = vsel %vm9091_vm2, %v587_v31, %v591_v19  ;;  %v602_v54 = vsel %vm9091_vm2, %v597_v46, %v601_v29  ;;  %v635_v19 = vrot.slane %v634_v10, 4  ;;  %v8657_v29 = vld [vmem:[#allocation3 + $0x98] sm:$0xff]   ;;  %v657_v31 = vrot.slane %v655_v20, 5  ;;  %v8650_v46 = vld [vmem:[#allocation3 + $0x168] sm:$0xff]  }
  0x59   : > { %7938 = vmatpush3.bf16.msra.mxu0 %v8633_v55  ;;  %1959 = vmatmul.mubr.bf16.vlgmr.msra.gmra.mrb[0].mxu1 %v6743_v27  ;;  %v620_v55 = vor.u32 %v619_v48, %v615_v47  ;;  %v9144_v62 = vcombine.low %v592_v45, %v602_v54  ;;  %v645_v25 = vrot.slane %v644_v14, 4  ;;  %v665_v27 = vshrl.u32 %v9147_v2, 16  ;;  %v9187_v45 = vld [vmem:[%s9072_s26 + $0x54] sm:$0xf]  ;;  %v497_v14 = vld [vmem:[%s9072_s26 + $0x5c] sm:$0x1] }
  0x5a   : > { %7939 = vmatprep.subr.bf16.mxu0 %v8637_v12  ;;  %1966 = vmatprep.mubr.bf16.mxu1 %v6760_v13  ;;  %v640_v30 = vsel %vm9091_vm2, %v635_v19, %v639_v6  ;;  %v658_v37 = vor.u32 %v657_v31, %v654_v26  ;;  %v695_v54 = vshll.u32 %v494_v38, 16  ;;  %v8661_v10 = vld [vmem:[#allocation3 + $0xa8] sm:$0xff]   ;;  %v8663_v26 = vld [vmem:[#allocation3 + $0xb0] sm:$0xff]   ;;  %v9233_v38 = vld [vmem:[%s9072_s26 + $0x6c] sm:$0xf] }
  0x5b   : > { %7986 = vmatpush3.bf16.msra.mxu1 %v8647_v17  ;;  %v621_v5 = vrot.slane %v620_v55, 4  ;;  %1500 = vmatprep.mubr.bf16.mxu0 %v9144_v62  ;;  %v9158_v17 = vld [vmem:[%s9072_s26 + $0x48] sm:$0xf]  ;;  %v650_v33 = vsel %vm9091_vm2, %v645_v25, %v649_v15  ;;  %v719_v25 = vshll.u32 %v497_v14, 16  ;;  %v9269_v14 = vld [vmem:[%s9072_s26 + $0x7c] sm:$0xf] }
  0x5c   : > { %7987 = vmatprep.subr.bf16.mxu1 %v8651_v41  ;;  %v9179_v36 = vcombine.low %v640_v30, %v650_v33  ;;  %v676_v40 = vshrl.u32 %v9158_v17, 16  ;;  %v659_v47 = vrot.slane %v658_v37, 4  ;;  %v8660_v55 = vld [vmem:[#allocation3 + $0xa0] sm:$0xff]   ;;  %v724_v30 = vshrl.u32 %v9214_v21, 16 }
  0x5d   : > { %7940 = vmatpush3.bf16.msra.mxu0 %v8637_v12  ;;  %v491_v12 = vld [vmem:[%s9072_s26 + $0x44] sm:$0x1]  ;;  %v626_v13 = vsel %vm9091_vm2, %v621_v5, %v625_v50  ;;  %v9190_v50 = vld [vmem:[%s9072_s26 + $0x58] sm:$0xf]  ;;  %v8665_v37 = vld [vmem:[#allocation3 + $0x1c0] sm:$0xff]  }
  0x5e   : > { %7941 = vmatprep.subr.bf16.mxu0 %v8640_v35  ;;  %v9160_v18 = vcombine.low %v616_v9, %v626_v13  ;;  %v671_v28 = vshll.u32 %v491_v12, 16  ;;  %v678_v48 = vrot.slane %v676_v40, 4  ;;  %v664_v56 = vsel %vm9091_vm2, %v659_v47, %v663_v32 }
  0x5f   : > { %7988 = vmatpush3.bf16.msra.mxu1 %v8651_v41  ;;  %v679_v41 = vshll.u32 %v9158_v17, 16  ;;  %v709_v5 = vshll.u32 %v9190_v50, 16  ;;  %v713_v6 = vshrl.u32 %v9190_v50, 16  ;;  %v697_v9 = vrot.slane %v695_v54, 5 }
  0x60   : > { %1501 = vmatmul.mubr.bf16.gmra.mrb[4].mxu0 %v9130_v42  ;;  %7989 = vmatprep.subr.bf16.mxu1 %v8655_v3  ;;  %v673_v44 = vrot.slane %v671_v28, 5  ;;  %v9237_v40 = vcombine.low %v9142_v59, %v9147_v2  ;;  %v751_v59 = vshll.u32 %v9233_v38, 16 }
  0x61   : > { %7942 = vmatpush3.bf16.msra.mxu0 %v8640_v35  ;;  %1967 = vmatmul.mubr.bf16.gmra.mrb[4].mxu1 %v9095_v60  ;;  %v9175_v60 = vcombine.low %v9106_v11, %v9112_v24  ;;  %v667_v35 = vrot.slane %v665_v27, 4  ;;  %v685_v11 = vshll.u32 %v9165_v22, 16  ;;  %v689_v24 = vshrl.u32 %v9165_v22, 16 }
  0x62   : > { %7943 = vmatprep.subr.bf16.mxu0 %v8643_v61  ;;  %1508 = vmatprep.mubr.bf16.mxu0 %v9160_v18  ;;  %v681_v49 = vrot.slane %v679_v41, 5  ;;  %v9211_v19 = vrot.slane %v709_v5, 5  ;;  %v715_v20 = vrot.slane %v713_v6, 4  ;;  %12493 = vst [vmem:[#allocation11_spill] sm:$0xff] %v9237_v40  ;;  %v8664_v41 = vld [vmem:[#allocation3 + $0xb8] sm:$0xff]   ;;  %v753_v6 = vrot.slane %v751_v59, 5 }
  0x63   : > { %1974 = vmatprep.mubr.bf16.mxu1 %v9144_v62  ;;  %7990 = vmatpush3.bf16.msra.mxu1 %v8655_v3  ;;  %v668_v43 = vor.u32 %v667_v35, %v663_v32  ;;  %v687_v52 = vrot.slane %v685_v11, 5  ;;  %v691_v53 = vrot.slane %v689_v24, 4  ;;  %v703_v3 = vshll.u32 %v9187_v45, 16 }
  0x64   : > { %7991 = vmatprep.subr.bf16.mxu1 %v8657_v29  ;;  %v682_v58 = vor.u32 %v681_v49, %v678_v48  ;;  %v716_v31 = vor.u32 %v715_v20, %v9211_v19  ;;  %v727_v32 = vshll.u32 %v9214_v21, 16  ;;  %v721_v11 = vrot.slane %v719_v25, 5  ;;  %v500_v48 = vld [vmem:[%s9072_s26 + $0x68] sm:$0x1] }
  0x65   : > { %7944 = vmatpush3.bf16.msra.mxu0 %v8643_v61  ;;  %v669_v51 = vrot.slane %v668_v43, 4  ;;  %v700_v61 = vshrl.u32 %v9187_v45, 16  ;;  %v692_v1 = vor.u32 %v691_v53, %v687_v52  ;;  %v705_v16 = vrot.slane %v703_v3, 5  ;;  %v503_v3 = vld [vmem:[%s9072_s26 + $0x74] sm:$0x1] }
  0x66   : > { %7945 = vmatprep.subr.bf16.mxu0 %v8646_v23  ;;  %v683_v12 = vrot.slane %v682_v58, 4  ;;  %v726_v24 = vrot.slane %v724_v30, 4  ;;  %v717_v47 = vrot.slane %v716_v31, 4  ;;  %v729_v49 = vrot.slane %v727_v32, 5  ;;  %v9288_v32 = vld [vmem:[%s9072_s26 + $0x80] sm:$0x1] }
  0x67   : > { %v674_v0 = vsel %vm9091_vm2, %v669_v51, %v673_v44  ;;  %7992 = vmatpush3.bf16.msra.mxu1 %v8657_v29  ;;  %v693_v13 = vrot.slane %v692_v1, 4  ;;  %v702_v15 = vrot.slane %v700_v61, 4  ;;  %v748_v53 = vshrl.u32 %v9233_v38, 16 }
  0x68   : > { %1509 = vmatmul.mubr.bf16.gmra.mrb[8].mxu0 %v9175_v60  ;;  %v9208_v8 = vcombine.low %v664_v56, %v674_v0  ;;  %7993 = vmatprep.subr.bf16.mxu1 %v8660_v55  ;;  %v688_v27 = vsel %vm9091_vm2, %v683_v12, %v687_v52  ;;  %v743_v56 = vshll.u32 %v500_v48, 16  ;;  %v722_v61 = vsel %vm9091_vm2, %v717_v47, %v721_v11  ;;  %v9264_v12 = vld [vmem:[%s9072_s26 + $0x78] sm:$0xf]  ;;  %v9293_v47 = vld [vmem:[%s9072_s26 + $0x84] sm:$0xf] }
  0x69   : > { %1516 = vmatprep.mubr.bf16.mxu0 %v9179_v36  ;;  %7946 = vmatpush3.bf16.msra.mxu0 %v8646_v23  ;;  %v9217_v23 = vld [vmem:[%s9072_s26 + $0x64] sm:$0xf]  ;;  %v698_v28 = vsel %vm9091_vm2, %v693_v13, %v697_v9  ;;  %v706_v29 = vor.u32 %v705_v16, %v702_v15  ;;  %v9260_v1 = vcombine.low %v9158_v17, %v9165_v22  ;;  %v750_v5 = vrot.slane %v748_v53, 4  ;;  %v9296_v48 = vld [vmem:[%s9072_s26 + $0x88] sm:$0xf] }
  0x6a   : > { %1975 = vmatmul.mubr.bf16.gmra.mrb[8].mxu1 %v9130_v42  ;;  %7947 = vmatprep.subr.bf16.mxu0 %v8650_v46  ;;  %12492 = vst [vmem:[#allocation10_spill] sm:$0xff] %v9208_v8  ;;  %v733_v33 = vshll.u32 %v9217_v23, 16  ;;  %v737_v35 = vshrl.u32 %v9217_v23, 16  ;;  %v9239_v43 = vcombine.low %v688_v27, %v698_v28  ;;  %v767_v20 = vshll.u32 %v503_v3, 16 }
  0x6b   : > { %1982 = vmatprep.mubr.bf16.mxu1 %v9160_v18  ;;  %7994 = vmatpush3.bf16.msra.mxu1 %v8660_v55  ;;  %v707_v44 = vrot.slane %v706_v29, 4  ;;  %12495 = vst [vmem:[#allocation13_spill] sm:$0xff] %v9260_v1  ;;  %v754_v17 = vor.u32 %v753_v6, %v750_v5  ;;  %v775_v25 = vshll.u32 %v9264_v12, 16  ;;  %v785_v27 = vshrl.u32 %v9269_v14, 16  ;;  %v9324_v5 = vld [vmem:[%s9072_s26 + $0x8c] sm:$0x1] }
  0x6c   : > { %7995 = vmatprep.subr.bf16.mxu1 %v8661_v10  ;;  %12494 = vst [vmem:[#allocation12_spill] sm:$0xff] %v9239_v43  ;;  %v735_v51 = vrot.slane %v733_v33, 5  ;;  %v739_v52 = vrot.slane %v737_v35, 4  ;;  %v9285_v30 = vcombine.low %v9187_v45, %v9190_v50  ;;  %v769_v31 = vrot.slane %v767_v20, 5  ;;  %v9327_v6 = vld [vmem:[%s9072_s26 + $0x94] sm:$0xf] }
  0x6d   : > { %7948 = vmatpush3.bf16.msra.mxu0 %v8650_v46  ;;  %v9242_v46 = vld [vmem:[%s9072_s26 + $0x70] sm:$0xf]  ;;  %v712_v58 = vsel %vm9091_vm2, %v707_v44, %v9211_v19  ;;  %v745_v19 = vrot.slane %v743_v56, 5  ;;  %v755_v33 = vrot.slane %v754_v17, 4  ;;  %v796_v59 = vshrl.u32 %v9293_v47, 16 }
  0x6e   : > { %7949 = vmatprep.subr.bf16.mxu0 %v8654_v63  ;;  %v757_v54 = vshll.u32 %v9242_v46, 16  ;;  %v761_v55 = vshrl.u32 %v9242_v46, 16  ;;  %v740_v0 = vor.u32 %v739_v52, %v735_v51  ;;  %v9266_v13 = vcombine.low %v712_v58, %v722_v61  ;;  %12497 = vst [vmem:[#allocation15_spill] sm:$0xff] %v9285_v30  ;;  %v9314_v61 = vld [vmem:[%s9072_s26 + $0x90] sm:$0xf] }
  0x6f   : > { %7996 = vmatpush3.bf16.msra.mxu1 %v8661_v10  ;;  %v805_v56 = vshll.u32 %v9296_v48, 16  ;;  %v809_v58 = vshrl.u32 %v9296_v48, 16  ;;  %v820_v17 = vshrl.u32 %v9314_v61, 16 }
  0x70   : > { %1517 = vmatmul.mubr.bf16.gmra.mrb[12].mxu0 %v9206_v7  ;;  %7997 = vmatprep.subr.bf16.mxu1 %v8663_v26  ;;  %v759_v9 = vrot.slane %v757_v54, 5  ;;  %v763_v10 = vrot.slane %v761_v55, 4  ;;  %12496 = vst [vmem:[#allocation14_spill] sm:$0xff] %v9266_v13  ;;  %v741_v16 = vrot.slane %v740_v0, 4  ;;  %v799_v54 = vshll.u32 %v9293_v47, 16  ;;  %v9307_v55 = vld [vmem:[#allocation3 + $0x200] sm:$0xff]  }
  0x71   : > { %1524 = vmatprep.mubr.bf16.mxu0 %v9208_v8  ;;  %7950 = vmatpush3.bf16.msra.mxu0 %v8654_v63  ;;  %v730_v63 = vor.u32 %v729_v49, %v726_v24  ;;  %v787_v24 = vrot.slane %v785_v27, 4  ;;  %v811_v20 = vrot.slane %v809_v58, 4 }
  0x72   : > { %1983 = vmatmul.mubr.bf16.gmra.mrb[12].mxu1 %v9175_v60  ;;  %7951 = vmatprep.subr.bf16.mxu0 %v8659_v34  ;;  %v764_v22 = vor.u32 %v763_v10, %v759_v9  ;;  %v746_v29 = vsel %vm9091_vm2, %v741_v16, %v745_v19  ;;  %v760_v45 = vsel %vm9091_vm2, %v755_v33, %v759_v9  ;;  %v801_v16 = vrot.slane %v799_v54, 5 }
  0x73   : > { %1990 = vmatprep.mubr.bf16.mxu1 %v9179_v36  ;;  %7998 = vmatpush3.bf16.msra.mxu1 %v8663_v26  ;;  %v731_v15 = vrot.slane %v730_v63, 4  ;;  %v781_v26 = vshll.u32 %v9269_v14, 16  ;;  %v9319_v63 = vcombine.low %v9214_v21, %v9217_v23  ;;  %v807_v19 = vrot.slane %v805_v56, 5 }
  0x74   : > { %7999 = vmatprep.subr.bf16.mxu1 %v8664_v41  ;;  %v765_v35 = vrot.slane %v764_v22, 4  ;;  %v823_v21 = vshll.u32 %v9314_v61, 16  ;;  %v829_v23 = vshll.u32 %v9327_v6, 16  ;;  %v833_v22 = vshrl.u32 %v9327_v6, 16 }
  0x75   : > { %7952 = vmatpush3.bf16.msra.mxu0 %v8659_v34  ;;  %v772_v34 = vshrl.u32 %v9264_v12, 16  ;;  %v736_v28 = vsel %vm9091_vm2, %v731_v15, %v735_v51  ;;  %v783_v11 = vrot.slane %v781_v26, 5  ;;  %v791_v51 = vshll.u32 %v9288_v32, 16  ;;  %12499 = vst [vmem:[#allocation17_spill] sm:$0xff] %v9319_v63 }
  0x76   : > { %7393 = vmatprep.subr.bf16.mxu0 %v8665_v37  ;;  %v9290_v44 = vcombine.low %v736_v28, %v746_v29  ;;  %v770_v49 = vsel %vm9091_vm2, %v765_v35, %v769_v31  ;;  %v798_v15 = vrot.slane %v796_v59, 4  ;;  %v812_v28 = vor.u32 %v811_v20, %v807_v19  ;;  %v9342_v29 = vld [vmem:[%s9072_s26 + $0x9c] sm:$0xf]  ;;  %v9346_v35 = vld [vmem:[%s9072_s26 + $0xa0] sm:$0xf] }
  0x77   : > { %8000 = vmatpush3.bf16.msra.mxu1 %v8664_v41  ;;  %v774_v37 = vrot.slane %v772_v34, 4  ;;  %v777_v41 = vrot.slane %v775_v25, 5  ;;  %v788_v53 = vor.u32 %v787_v24, %v783_v11  ;;  %v9321_v0 = vcombine.low %v760_v45, %v770_v49  ;;  %v9355_v45 = vld [vmem:[%s9072_s26 + $0x98] sm:$0x1] }
  0x78   : > { %1525 = vmatmul.mubr.bf16.gmra.mrb[16].mxu0 %v9237_v40  ;;  %12498 = vst [vmem:[#allocation16_spill] sm:$0xff] %v9290_v44  ;;  %8033 = vmatprep.subr.bf16.mxu1 %v9307_v55  ;;  %v793_v3 = vrot.slane %v791_v51, 5  ;;  %v815_v34 = vshll.u32 %v9324_v5, 16  ;;  %v802_v27 = vor.u32 %v801_v16, %v798_v15  ;;  %v822_v31 = vrot.slane %v820_v17, 4 }
  0x79   : > { %1532 = vmatprep.mubr.bf16.mxu0 %v9239_v43  ;;  %v778_v52 = vor.u32 %v777_v41, %v774_v37  ;;  %12500 = vst [vmem:[#allocation18_spill] sm:$0xff] %v9321_v0  ;;  %v789_v10 = vrot.slane %v788_v53, 4  ;;  %v825_v33 = vrot.slane %v823_v21, 5  ;;  %v9350_v37 = vcombine.low %v9233_v38, %v9242_v46 }
  0x7a   : > { %1991 = vmatmul.mubr.bf16.gmra.mrb[16].mxu1 %v9206_v7  ;;  %v831_v41 = vrot.slane %v829_v23, 5  ;;  %v835_v24 = vrot.slane %v833_v22, 4  ;;  %v803_v49 = vrot.slane %v802_v27, 4  ;;  %v813_v51 = vrot.slane %v812_v28, 4  ;;  %v9389_v28 = vld [vmem:[%s9072_s26 + $0xb4] sm:$0xf] }
  0x7b   : > { %1998 = vmatprep.mubr.bf16.mxu1 %v9208_v8  ;;  %v779_v9 = vrot.slane %v778_v52, 4  ;;  %v794_v26 = vsel %vm9091_vm2, %v789_v10, %v793_v3  ;;  %12501 = vst [vmem:[#allocation19_spill] sm:$0xff] %v9350_v37  ;;  %v817_v52 = vrot.slane %v815_v34, 5  ;;  %v844_v53 = vshrl.u32 %v9342_v29, 16  ;;  %v9370_v10 = vld [vmem:[%s9072_s26 + $0xa4] sm:$0x1] }
  0x7c   : > { %v847_v59 = vshll.u32 %v9342_v29, 16  ;;  %v853_v54 = vshll.u32 %v9346_v35, 16  ;;  %v857_v56 = vshrl.u32 %v9346_v35, 16  ;;  %v826_v38 = vor.u32 %v825_v33, %v822_v31  ;;  %v9380_v34 = vld [vmem:[%s9072_s26 + $0xa8] sm:$0xf] }
  0x7d   : > { %v784_v25 = vsel %vm9091_vm2, %v779_v9, %v783_v11  ;;  %v836_v46 = vor.u32 %v835_v24, %v831_v41  ;;  %v839_v58 = vshll.u32 %v9355_v45, 16  ;;  %v808_v3 = vsel %vm9091_vm2, %v803_v49, %v807_v19  ;;  %v9398_v24 = vld [vmem:[%s9072_s26 + $0xb8] sm:$0xf] }
  0x7e   : > { %v9352_v11 = vcombine.low %v784_v25, %v794_v26  ;;  %v818_v9 = vsel %vm9091_vm2, %v813_v51, %v817_v52  ;;  %v846_v15 = vrot.slane %v844_v53, 4  ;;  %v849_v16 = vrot.slane %v847_v59, 5  ;;  %v9385_v26 = vld [vmem:[%s9072_s26 + $0xac] sm:$0xf] }
  0x7f   : > { %v9373_v20 = vrot.slane %v853_v54, 5  ;;  %v859_v17 = vrot.slane %v857_v56, 4  ;;  %v9377_v21 = vcombine.low %v9264_v12, %v9269_v14  ;;  %v827_v23 = vrot.slane %v826_v38, 4  ;;  %v9409_v56 = vld [vmem:[%s9072_s26 + $0xc0] sm:$0xf] }
  0x80   : > { %1533 = vmatmul.mubr.bf16.gmra.mrb[20].mxu0 %v9260_v1  ;;  %12502 = vst [vmem:[#allocation20_spill] sm:$0xff] %v9352_v11  ;;  %v837_v19 = vrot.slane %v836_v46, 4  ;;  %v841_v22 = vrot.slane %v839_v58, 5  ;;  %v9382_v25 = vcombine.low %v808_v3, %v818_v9  ;;  %v863_v27 = vshll.u32 %v9370_v10, 16  ;;  %v9413_v58 = vld [vmem:[%s9072_s26 + $0xc4] sm:$0xf] }
  0x81   : > { %1540 = vmatprep.mubr.bf16.mxu0 %v9266_v13  ;;  %12503 = vst [vmem:[#allocation21_spill] sm:$0xff] %v9377_v21  ;;  %v850_v31 = vor.u32 %v849_v16, %v846_v15  ;;  %v860_v33 = vor.u32 %v859_v17, %v9373_v20  ;;  %v832_v12 = vsel %vm9091_vm2, %v827_v23, %v831_v41  ;;  %v868_v49 = vshrl.u32 %v9380_v34, 16  ;;  %v9422_v15 = vld [vmem:[%s9072_s26 + $0xb0] sm:$0x1] }
  0x82   : > { %1999 = vmatmul.mubr.bf16.gmra.mrb[20].mxu1 %v9237_v40  ;;  %12504 = vst [vmem:[#allocation22_spill] sm:$0xff] %v9382_v25  ;;  %v842_v14 = vsel %vm9091_vm2, %v837_v19, %v841_v22  ;;  %v871_v51 = vshll.u32 %v9380_v34, 16  ;;  %v877_v52 = vshll.u32 %v9385_v26, 16  ;;  %v881_v53 = vshrl.u32 %v9385_v26, 16  ;;  %v8793_v40 = vld [vmem:[%s9072_s26 + $0x28] sm:$0xf] }
  0x83   : > { %2006 = vmatprep.mubr.bf16.mxu1 %v9239_v43  ;;  %v865_v41 = vrot.slane %v863_v27, 5  ;;  %v892_v59 = vshrl.u32 %v9389_v28, 16  ;;  %v895_v54 = vshll.u32 %v9389_v28, 16  ;;  %v851_v38 = vrot.slane %v850_v31, 4  ;;  %v9429_v31 = vld [vmem:[%s9072_s26 + $0xbc] sm:$0x1] }
  0x84   : > { %v861_v46 = vrot.slane %v860_v33, 4  ;;  %v9417_v3 = vcombine.low %v9293_v47, %v9296_v48  ;;  %v9419_v9 = vcombine.low %v832_v12, %v842_v14  ;;  %v901_v16 = vshll.u32 %v9398_v24, 16  ;;  %v8791_v43 = vld [vmem:[%s9072_s26 + $0x1c] sm:$0xf] }
  0x85   : > { %v905_v17 = vshrl.u32 %v9398_v24, 16  ;;  %v870_v23 = vrot.slane %v868_v49, 4  ;;  %v873_v19 = vrot.slane %v871_v51, 5  ;;  %v9426_v22 = vrot.slane %v877_v52, 5 }
  0x86   : > { %12505 = vst [vmem:[#allocation23_spill] sm:$0xff] %v9417_v3  ;;  %12506 = vst [vmem:[#allocation24_spill] sm:$0xff] %v9419_v9  ;;  %v883_v27 = vrot.slane %v881_v53, 4  ;;  %v894_v33 = vrot.slane %v892_v59, 4  ;;  %v1274_v12 = vshll.u32 %v9409_v56, 16  ;;  %v9434_v14 = vrot.slane %v901_v16, 5 }
  0x87   : > { %v1280_v49 = vshll.u32 %v9413_v58, 16  ;;  %v1284_v51 = vshrl.u32 %v9413_v58, 16  ;;  %v856_v52 = vsel %vm9091_vm2, %v851_v38, %v9373_v20  ;;  %v887_v53 = vshll.u32 %v9422_v15, 16  ;;  %v9444_v59 = vld [vmem:[%s9072_s26 + $0xc8] sm:$0x1] }
  0x88   : > { %1541 = vmatmul.mubr.bf16.gmra.mrb[24].mxu0 %v9285_v30  ;;  %v874_v16 = vor.u32 %v873_v19, %v870_v23  ;;  %v9454_v20 = vcombine.low %v9314_v61, %v9327_v6  ;;  %v1290_v19 = vshll.u32 %v9444_v59, 16  ;;  %v989_v8 = vrot.slane %v8793_v40, 5 }
  0x89   : > { %1548 = vmatprep.mubr.bf16.mxu0 %v9290_v44  ;;  %v889_v23 = vrot.slane %v887_v53, 5  ;;  %v9505_v40 = vcombine.low %v9380_v34, %v9385_v26 }
  0x8a   : > { %2007 = vmatmul.mubr.bf16.gmra.mrb[24].mxu1 %v9260_v1  ;;  %v9463_v1 = vld [vmem:[%s9072_s26 + $0x8] sm:$0x1] }
  0x8b   : > { %2014 = vmatprep.mubr.bf16.mxu1 %v9266_v13  ;;  %v9457_v13 = vrot.slane %v1280_v49, 5  ;;  %12508 = vst [vmem:[#allocation26_spill] sm:$0xff] %v9505_v40 }
  0x90   : > { %1549 = vmatmul.mubr.bf16.gmra.mrb[28].mxu0 %v9319_v63 }
  0x91   : > { %1556 = vmatprep.mubr.bf16.mxu0 %v9321_v0 }
  0x92   : > { %2015 = vmatmul.mubr.bf16.gmra.mrb[28].mxu1 %v9285_v30 }
  0x93   : > { %2022 = vmatprep.mubr.bf16.mxu1 %v9290_v44  ;;  %v1276_v44 = vrot.slane %v1274_v12, 5 }
  0x98   : > { %1557 = vmatmul.mubr.bf16.gmra.mrb[32].mxu0 %v9350_v37 }
  0x99   : > { %1564 = vmatprep.mubr.bf16.mxu0 %v9352_v11 }
  0x9a   : > { %2023 = vmatmul.mubr.bf16.gmra.mrb[32].mxu1 %v9319_v63  ;;  %v911_v63 = vshll.u32 %v9429_v31, 16 }
  0x9b   : > { %2030 = vmatprep.mubr.bf16.mxu1 %v9321_v0  ;;  %v907_v0 = vrot.slane %v905_v17, 4  ;;  %v884_v17 = vor.u32 %v883_v27, %v9426_v22  ;;  %v875_v27 = vrot.slane %v874_v16, 4  ;;  %v8787_v16 = vld [vmem:[%s9072_s26 + $0xc] sm:$0xf] }
  0x9c   : > { %v913_v12 = vrot.slane %v911_v63, 5  ;;  %v8786_v63 = vld [vmem:[%s9072_s26 + $0x4] sm:$0xf] }
  0xa0   : > { %1565 = vmatmul.mubr.bf16.gmra.mrb[36].mxu0 %v9377_v21 }
  0xa1   : > { %1572 = vmatprep.mubr.bf16.mxu0 %v9382_v25 }
  0xa2   : > { %2031 = vmatmul.mubr.bf16.gmra.mrb[36].mxu1 %v9350_v37  ;;  %v1271_v37 = vshrl.u32 %v9409_v56, 16 }
  0xa3   : > { %2038 = vmatprep.mubr.bf16.mxu1 %v9352_v11  ;;  %v897_v11 = vrot.slane %v895_v54, 5  ;;  %v866_v54 = vsel %vm9091_vm2, %v861_v46, %v865_v41  ;;  %v1286_v41 = vrot.slane %v1284_v51, 4  ;;  %v1292_v51 = vrot.slane %v1290_v19, 5 }
  0xa4   : > { %v1273_v38 = vrot.slane %v1271_v37, 4  ;;  %v9459_v46 = vcombine.low %v856_v52, %v866_v54  ;;  %v8785_v52 = vld [vmem:[%s9072_s26 + $0x10] sm:$0xf] }
  0xa5   : > { %v898_v30 = vor.u32 %v897_v11, %v894_v33  ;;  %v1287_v49 = vor.u32 %v1286_v41, %v9457_v13  ;;  %v975_v53 = vrot.slane %v8785_v52, 5 }
  0xa6   : > { %v1277_v11 = vor.u32 %v1276_v44, %v1273_v38  ;;  %v880_v44 = vsel %vm9091_vm2, %v875_v27, %v9426_v22  ;;  %v8788_v38 = vld [vmem:[%s9072_s26 + $0x14] sm:$0x1]  ;;  %v9483_v22 = vcombine.low %v9342_v29, %v9346_v35 }
  0xa7   : > { %v978_v41 = vrot.slane %v8788_v38, 5  ;;  %v977_v52 = vrot.slane %v975_v53, 4  ;;  %v996_v38 = vrot.slane %v9128_v39, 5  ;;  %v8678_v39 = vld [vmem:[#allocation3 + $0x210] sm:$0xff]  }
  0xa8   : > { %1573 = vmatmul.mubr.bf16.gmra.mrb[40].mxu0 %v9417_v3  ;;  %v1278_v54 = vrot.slane %v1277_v11, 4 }
  0xa9   : > { %1580 = vmatprep.mubr.bf16.mxu0 %v9419_v9 }
  0xaa   : > { %2039 = vmatmul.mubr.bf16.gmra.mrb[40].mxu1 %v9377_v21  ;;  %v908_v21 = vor.u32 %v907_v0, %v9434_v14  ;;  %v899_v0 = vrot.slane %v898_v30, 4 }
  0xab   : > { %2046 = vmatprep.mubr.bf16.mxu1 %v9382_v25  ;;  %v885_v25 = vrot.slane %v884_v17, 4  ;;  %v6728_v17 = vrot.slane %v8787_v16, 9 }
  0xac   : > { %v909_v33 = vrot.slane %v908_v21, 4  ;;  %v968_v21 = vrot.slane %v8786_v63, 5  ;;  %v8790_v63 = vld [vmem:[%s9072_s26 + $0x18] sm:$0xf] }
  0xad   : > { %v890_v30 = vsel %vm9091_vm2, %v885_v25, %v889_v23  ;;  %v1288_v25 = vrot.slane %v1287_v49, 4  ;;  %v8789_v23 = vld [vmem:[%s9072_s26] sm:$0xf]  ;;  %v6729_v37 = vrot.slane %v8790_v63, 9  ;;  %v991_v63 = vrot.slane %v989_v8, 4 }
  0xae   : > { %v6727_v19 = vrot.slane %v8789_v23, 9  ;;  %v9486_v27 = vcombine.low %v880_v44, %v890_v30  ;;  %v970_v11 = vrot.slane %v968_v21, 4  ;;  %v904_v44 = vsel %vm9091_vm2, %v899_v0, %v9434_v14  ;;  %v8797_v49 = vld [vmem:[%s9072_s26 + $0x3c] sm:$0xf] }
  0xaf   : > { %v12510_v30 = vmov 0  ;;  %v1283_v14 = vsel %vm9091_vm2, %v1278_v54, %v9457_v13  ;;  %v1293_v0 = vsel %vm9091_vm2, %v1288_v25, %v1292_v51  ;;  %v976_v23 = vsel %vm9511_vm5, %v6728_v17, %v975_v53 }
  0xb0   : > { %1581 = vmatmul.mubr.bf16.gmra.mrb[44].mxu0 %v9454_v20  ;;  %12507 = vst [vmem:[#allocation25_spill] sm:$0xff] %v9486_v27  ;;  %v12511_v30 = vsel %vm9511_vm5, 4294967295, %v12510_v30  ;;  %v979_v13 = vsel %vm9511_vm5, %v977_v52, %v978_v41  ;;  %v9539_v51 = vcombine.low %v9409_v56, %v9413_v58  ;;  %v969_v54 = vsel %vm9511_vm5, %v6727_v19, %v968_v21  ;;  %v8794_v52 = vld [vmem:[%s9072_s26 + $0x2c] sm:$0x1]  ;;  %v8796_v21 = vld [vmem:[%s9072_s26 + $0x38] sm:$0x1] }
  0xb1   : > { %1588 = vmatprep.mubr.bf16.mxu0 %v9459_v46  ;;  %12512 = vst [vmem:[#allocation28_spill] sm:$0xff] %v12511_v30  ;;  %v6776_v53 = vcombine.low %v976_v23, %v979_v13  ;;  %v12514_v17 = vrot.slane %v9463_v1, 5  ;;  %v999_v19 = vrot.slane %v8796_v21, 5  ;;  %v6732_v57 = vrot.slane %v8797_v49, 9  ;;  %v8799_v13 = vld [vmem:[%s9072_s26 + $0x48] sm:$0xf] }
  0xb2   : > { %2047 = vmatmul.mubr.bf16.gmra.mrb[44].mxu1 %v9417_v3  ;;  %v8792_v3 = vld [vmem:[%s9072_s26 + $0x24] sm:$0xf]  ;;  %v12515_v23 = vrot.slane %v9147_v2, 5  ;;  %v12516_v49 = vrot.slane %v9099_v4, 5  ;;  %v8668_v4 = vld [vmem:[#allocation3 + $0x188] sm:$0xff]  }
  0xb3   : > { %2054 = vmatprep.mubr.bf16.mxu1 %v9419_v9  ;;  %v982_v9 = vrot.slane %v8791_v43, 5  ;;  %v6730_v16 = vrot.slane %v8792_v3, 9  ;;  %v914_v43 = vsel %vm9091_vm2, %v909_v33, %v913_v12  ;;  %v9526_v33 = vcombine.low %v9389_v28, %v9398_v24 }
  0xb4   : > { %v9507_v3 = vcombine.low %v904_v44, %v914_v43  ;;  %v9528_v12 = vcombine.low %v1283_v14, %v1293_v0  ;;  %v972_v41 = vsel %vm9511_vm5, %v970_v11, %v12514_v17  ;;  %v992_v44 = vrot.slane %v8794_v52, 5  ;;  %v8795_v43 = vld [vmem:[%s9072_s26 + $0x30] sm:$0xf] }
  0xb5   : > { %v984_v25 = vrot.slane %v982_v9, 4  ;;  %v6731_v14 = vrot.slane %v8795_v43, 9  ;;  %v998_v0 = vrot.slane %v996_v38, 4  ;;  %v1005_v1 = vrot.slane %v12515_v23, 4 }
  0xb6   : > { %12509 = vst [vmem:[#allocation27_spill] sm:$0xff] %v9507_v3  ;;  %12513 = vst [vmem:[#allocation29_spill] sm:$0xff] %v9528_v12  ;;  %v1017_v17 = vrot.slane %v9190_v50, 5  ;;  %v6775_v52 = vcombine.low %v969_v54, %v972_v41  ;;  %v983_v43 = vsel %vm9511_vm5, %v6729_v37, %v982_v9  ;;  %v990_v21 = vsel %vm9511_vm5, %v6730_v16, %v989_v8  ;;  %v8667_v41 = vld [vmem:[#allocation3 + $0x1c8] sm:$0xff]   ;;  %v8669_v37 = vld [vmem:[#allocation3 + $0x1d0] sm:$0xff]  }
  0xb7   : > { %v993_v50 = vsel %vm9511_vm5, %v991_v63, %v992_v44  ;;  %v8676_v9 = vld [vmem:[#allocation3 + $0x208] sm:$0xff]   ;;  %v997_v8 = vsel %vm9511_vm5, %v6731_v14, %v996_v38  ;;  %v1000_v16 = vsel %vm9511_vm5, %v998_v0, %v999_v19 }
  0xb8   : > { %1589 = vmatmul.mubr.bf16.gmra.mrb[48].mxu0 %v9483_v22  ;;  %v9574_v23 = vcombine.low %v990_v21, %v993_v50  ;;  %v9592_v38 = vcombine.low %v997_v8, %v1000_v16  ;;  %v8801_v14 = vld [vmem:[%s9072_s26 + $0x50] sm:$0x1]  ;;  %v1019_v19 = vrot.slane %v1017_v17, 4  ;;  %v8804_v21 = vld [vmem:[%s9072_s26 + $0x64] sm:$0xf]  ;;  %v8682_v8 = vld [vmem:[#allocation3 + $0x220] sm:$0xff]  }
  0xb9   : > { %1596 = vmatprep.mubr.bf16.mxu0 %v9486_v27  ;;  %v1013_v0 = vrot.slane %v8801_v14, 5  ;;  %v1024_v50 = vrot.slane %v8804_v21, 5  ;;  %v8808_v14 = vld [vmem:[%s9072_s26 + $0x6c] sm:$0xf]  ;;  %v8679_v21 = vld [vmem:[#allocation3 + $0x1a8] sm:$0xff]  }
  0xba   : > { %2055 = vmatmul.mubr.bf16.gmra.mrb[48].mxu1 %v9454_v20 }
  0xbb   : > { %2062 = vmatprep.mubr.bf16.mxu1 %v9459_v46 }
  0xc0   : > { %1597 = vmatmul.mubr.bf16.gmra.mrb[52].mxu0 %v9505_v40 }
  0xc1   : > { %1604 = vmatprep.mubr.bf16.mxu0 %v9507_v3 }
  0xc2   : > { %2063 = vmatmul.mubr.bf16.gmra.mrb[52].mxu1 %v9483_v22 }
  0xc3   : > { %2070 = vmatprep.mubr.bf16.mxu1 %v9486_v27  ;;  %v8800_v27 = vld [vmem:[%s9072_s26 + $0x4c] sm:$0xf] }
  0xc4   : > { %v1010_v11 = vrot.slane %v8800_v27, 5  ;;  %v8666_v27 = vld [vmem:[#allocation3 + $0x180] sm:$0xff]  }
  0xc8   : > { %1605 = vmatmul.mubr.bf16.gmra.mrb[56].mxu0 %v9526_v33 }
  0xc9   : > { %1612 = vmatprep.mubr.bf16.mxu0 %v9528_v12  ;;  %v8798_v12 = vld [vmem:[%s9072_s26 + $0x44] sm:$0x1] }
  0xca   : > { %2071 = vmatmul.mubr.bf16.gmra.mrb[56].mxu1 %v9505_v40  ;;  %v6733_v40 = vrot.slane %v8799_v13, 9  ;;  %v8670_v13 = vld [vmem:[#allocation3 + $0x190] sm:$0xff]  }
  0xcb   : > { %2078 = vmatprep.mubr.bf16.mxu1 %v9507_v3  ;;  %v1006_v3 = vrot.slane %v8798_v12, 5  ;;  %v986_v12 = vsel %vm9511_vm5, %v984_v25, %v12516_v49  ;;  %v12517_v25 = vrot.slane %v9147_v2, 5  ;;  %v1012_v2 = vrot.slane %v1010_v11, 4 }
  0xcc   : > { %v9572_v54 = vcombine.low %v983_v43, %v986_v12  ;;  %v8671_v43 = vld [vmem:[#allocation3 + $0x1d8] sm:$0xff]   ;;  %v1011_v49 = vsel %vm9511_vm5, %v6733_v40, %v1010_v11  ;;  %v8673_v11 = vld [vmem:[#allocation3 + $0x1e0] sm:$0xff]  }
  0xcd   : > { %v1004_v63 = vsel %vm9511_vm5, %v6732_v57, %v12517_v25  ;;  %v1007_v44 = vsel %vm9511_vm5, %v1005_v1, %v1006_v3  ;;  %v8802_v57 = vld [vmem:[%s9072_s26 + $0x54] sm:$0xf]  ;;  %v8803_v1 = vld [vmem:[%s9072_s26 + $0x5c] sm:$0x1]  ;;  %v1014_v12 = vsel %vm9511_vm5, %v1012_v2, %v1013_v0  ;;  %v8806_v25 = vld [vmem:[%s9072_s26 + $0x60] sm:$0xf] }
  0xce   : > { %v6734_v3 = vrot.slane %v8802_v57, 9  ;;  %v8675_v2 = vld [vmem:[#allocation3 + $0x1a0] sm:$0xff]   ;;  %v6736_v0 = vrot.slane %v8808_v14, 9  ;;  %v8688_v14 = vld [vmem:[#allocation3 + $0x238] sm:$0xff]  }
  0xd0   : > { %1613 = vmatmul.mubr.bf16.gmra.mrb[60].mxu0 %v9539_v51 }
  0xd1   : > { %7953 = vmatprep.mubr.bf16.mxu0 %v6776_v53 }
  0xd2   : > { %2079 = vmatmul.mubr.bf16.gmra.mrb[60].mxu1 %v9526_v33 }
  0xd3   : > { %8001 = vmatprep.mubr.bf16.mxu1 %v6775_v52  ;;  %v1020_v52 = vrot.slane %v8803_v1, 5  ;;  %v8684_v1 = vld [vmem:[#allocation3 + $0x228] sm:$0xff]  }
  0xd8   : > { %7954 = vmatmul.mubr.bf16.vlgmr.msra.gmra.mrb[64].mxu0 %v9572_v54 }
  0xd9   : > { %7394 = vmatpush3.bf16.msra.mxu0 %v8666_v27  ;;  %7957 = vmatprep.mubr.bf16.mxu0 %v9574_v23  ;;  %v8672_v27 = vld [vmem:[#allocation3 + $0x198] sm:$0xff]  }
  0xda   : > { %8002 = vmatmul.mubr.bf16.vlgmr.msra.gmra.mrb[64].mxu1 %v6776_v53  ;;  %7395 = vmatprep.subr.bf16.mxu0 %v8667_v41  ;;  %v9594_v53 = vcombine.low %v1004_v63, %v1007_v44  ;;  %v1018_v41 = vsel %vm9511_vm5, %v6734_v3, %v1017_v17  ;;  %v6735_v17 = vrot.slane %v8806_v25, 9  ;;  %v1026_v63 = vrot.slane %v1024_v50, 4  ;;  %v8807_v44 = vld [vmem:[%s9072_s26 + $0x68] sm:$0x1]  ;;  %v8809_v3 = vld [vmem:[%s9072_s26 + $0x74] sm:$0x1] }
  0xdb   : > { %8005 = vmatprep.mubr.bf16.mxu1 %v9572_v54  ;;  %8034 = vmatpush3.bf16.msra.mxu1 %v9307_v55  ;;  %v8680_v55 = vld [vmem:[#allocation3 + $0x218] sm:$0xff]   ;;  %v8811_v25 = vld [vmem:[%s9072_s26 + $0x78] sm:$0xf] }
  0xdc   : > { %8035 = vmatprep.subr.bf16.mxu1 %v8676_v9 }
  0xdd   : > { %7396 = vmatpush3.bf16.msra.mxu0 %v8668_v4  ;;  %v8805_v4 = vld [vmem:[%s9072_s26 + $0x70] sm:$0xf] }
  0xde   : > { %7397 = vmatprep.subr.bf16.mxu0 %v8669_v37  ;;  %v1031_v40 = vrot.slane %v8805_v4, 5  ;;  %v9613_v37 = vcombine.low %v1011_v49, %v1014_v12  ;;  %v8810_v49 = vld [vmem:[%s9072_s26 + $0x7c] sm:$0xf] }
  0xdf   : > { %8036 = vmatpush3.bf16.msra.mxu1 %v8676_v9  ;;  %v1021_v9 = vsel %vm9511_vm5, %v1019_v19, %v1020_v52  ;;  %v1034_v19 = vrot.slane %v8809_v3, 5  ;;  %v1025_v52 = vsel %vm9511_vm5, %v6735_v17, %v1024_v50  ;;  %v1038_v12 = vrot.slane %v8810_v49, 5  ;;  %v8681_v50 = vld [vmem:[#allocation3 + $0x1f0] sm:$0xff]  }
  0xe0   : > { %7958 = vmatmul.mubr.bf16.gmra.mrb[68].mxu0 %v9592_v38  ;;  %8037 = vmatprep.subr.bf16.mxu1 %v8678_v39  ;;  %v9615_v16 = vcombine.low %v1018_v41, %v1021_v9  ;;  %v1033_v57 = vrot.slane %v1031_v40, 4  ;;  %v1045_v41 = vrot.slane %v9296_v48, 5  ;;  %v8686_v4 = vld [vmem:[#allocation3 + $0x230] sm:$0xff]   ;;  %v6737_v17 = vrot.slane %v8811_v25, 9 }
  0xe1   : > { %7961 = vmatprep.mubr.bf16.mxu0 %v9594_v53  ;;  %7398 = vmatpush3.bf16.msra.mxu0 %v8670_v13  ;;  %v1027_v13 = vrot.slane %v8807_v44, 5  ;;  %v8683_v44 = vld [vmem:[#allocation3 + $0x1b0] sm:$0xff]   ;;  %v6738_v48 = vrot.slane %v9293_v47, 9  ;;  %v1052_v47 = vrot.slane %v9327_v6, 5  ;;  %v6740_v49 = vrot.slane %v9342_v29, 9 }
  0xe2   : > { %8006 = vmatmul.mubr.bf16.gmra.mrb[68].mxu1 %v9574_v23  ;;  %7399 = vmatprep.subr.bf16.mxu0 %v8671_v43  ;;  %v6742_v25 = vrot.slane %v9389_v28, 9 }
  0xe3   : > { %8009 = vmatprep.mubr.bf16.mxu1 %v9592_v38  ;;  %8038 = vmatpush3.bf16.msra.mxu1 %v8678_v39  ;;  %v8677_v39 = vld [vmem:[#allocation3 + $0x1e8] sm:$0xff]   ;;  %v1028_v43 = vsel %vm9511_vm5, %v1026_v63, %v1027_v13  ;;  %v1040_v63 = vrot.slane %v1038_v12, 4  ;;  %v1047_v13 = vrot.slane %v1045_v41, 4 }
  0xe4   : > { %8039 = vmatprep.subr.bf16.mxu1 %v8680_v55  ;;  %v9635_v9 = vcombine.low %v1025_v52, %v1028_v43  ;;  %v1054_v52 = vrot.slane %v1052_v47, 4  ;;  %v1055_v43 = vrot.slane %v9355_v45, 5 }
  0xe5   : > { %7400 = vmatpush3.bf16.msra.mxu0 %v8672_v27  ;;  %v1035_v27 = vsel %vm9511_vm5, %v1033_v57, %v1034_v19  ;;  %v8687_v57 = vld [vmem:[#allocation3 + $0x1b8] sm:$0xff]   ;;  %v1059_v19 = vrot.slane %v9346_v35, 5  ;;  %v1062_v35 = vrot.slane %v9370_v10, 5  ;;  %v1073_v10 = vrot.slane %v9398_v24, 5 }
  0xe6   : > { %7401 = vmatprep.subr.bf16.mxu0 %v8673_v11 }
  0xe7   : > { %8040 = vmatpush3.bf16.msra.mxu1 %v8680_v55  ;;  %v1032_v55 = vsel %vm9511_vm5, %v6736_v0, %v1031_v40  ;;  %v1041_v40 = vrot.slane %v9288_v32, 5  ;;  %v1039_v0 = vsel %vm9511_vm5, %v6737_v17, %v1038_v12  ;;  %v1061_v12 = vrot.slane %v1059_v19, 4 }
  0xe8   : > { %7962 = vmatmul.mubr.bf16.gmra.mrb[72].mxu0 %v9613_v37  ;;  %8041 = vmatprep.subr.bf16.mxu1 %v8682_v8  ;;  %v9637_v11 = vcombine.low %v1032_v55, %v1035_v27  ;;  %v1066_v55 = vrot.slane %v9385_v26, 5  ;;  %v1060_v29 = vsel %vm9511_vm5, %v6740_v49, %v1059_v19  ;;  %v1069_v26 = vrot.slane %v9422_v15, 5  ;;  %v12521_v49 = vld [vmem:[#allocation13_spill] sm:$0xff] }
  0xe9   : > { %7965 = vmatprep.mubr.bf16.mxu0 %v9615_v16  ;;  %7402 = vmatpush3.bf16.msra.mxu0 %v8675_v2  ;;  %v1048_v2 = vrot.slane %v9324_v5, 5  ;;  %v1042_v32 = vsel %vm9511_vm5, %v1040_v63, %v1041_v40  ;;  %v1046_v5 = vsel %vm9511_vm5, %v6738_v48, %v1045_v41  ;;  %v1063_v45 = vsel %vm9511_vm5, %v1061_v12, %v1062_v35  ;;  %v12522_v35 = vld [vmem:[#allocation14_spill] sm:$0xff] }
  0xea   : > { %8010 = vmatmul.mubr.bf16.gmra.mrb[72].mxu1 %v9594_v53  ;;  %7403 = vmatprep.subr.bf16.mxu0 %v8677_v39  ;;  %v9657_v39 = vcombine.low %v1039_v0, %v1042_v32  ;;  %v9681_v41 = vcombine.low %v1060_v29, %v1063_v45  ;;  %v1075_v17 = vrot.slane %v1073_v10, 4  ;;  %v1076_v63 = vrot.slane %v9429_v31, 5  ;;  %v12520_v0 = vld [vmem:[#allocation12_spill] sm:$0xff] }
  0xeb   : > { %8013 = vmatprep.mubr.bf16.mxu1 %v9613_v37  ;;  %8042 = vmatpush3.bf16.msra.mxu1 %v8682_v8  ;;  %v8685_v8 = vld [vmem:[#allocation3 + $0x1f8] sm:$0xff]   ;;  %v1049_v3 = vsel %vm9511_vm5, %v1047_v13, %v1048_v2  ;;  %v1074_v28 = vsel %vm9511_vm5, %v6742_v25, %v1073_v10  ;;  %v6791_v48 = vrot.slane %v9409_v56, 9  ;;  %v1302_v2 = vrot.slane %v9444_v59, 5  ;;  %v12518_v56 = vld [vmem:[#allocation10_spill] sm:$0xff]  ;;  %v12523_v25 = vld [vmem:[#allocation15_spill] sm:$0xff] }
  0xec   : > { %8043 = vmatprep.subr.bf16.mxu1 %v8684_v1  ;;  %v9659_v6 = vcombine.low %v1046_v5, %v1049_v3  ;;  %v1077_v15 = vsel %vm9511_vm5, %v1075_v17, %v1076_v63 }
  0xed   : > { %7404 = vmatpush3.bf16.msra.mxu0 %v8679_v21 }
  0xee   : > { %7405 = vmatprep.subr.bf16.mxu0 %v8681_v50  ;;  %v6741_v50 = vrot.slane %v9380_v34, 9  ;;  %v1299_v34 = vrot.slane %v9413_v58, 5 }
  0xef   : > { %8044 = vmatpush3.bf16.msra.mxu1 %v8684_v1  ;;  %v6739_v1 = vrot.slane %v9314_v61, 9  ;;  %v1056_v61 = vsel %vm9511_vm5, %v1054_v52, %v1055_v43 }
  0xf0   : > { %7966 = vmatmul.mubr.bf16.gmra.mrb[76].mxu0 %v9635_v9  ;;  %8045 = vmatprep.subr.bf16.mxu1 %v8686_v4  ;;  %v1067_v24 = vsel %vm9511_vm5, %v6741_v50, %v1066_v55  ;;  %v1301_v13 = vrot.slane %v1299_v34, 4  ;;  %v1300_v58 = vsel %vm9511_vm5, %v6791_v48, %v1299_v34 }
  0xf1   : > { %7969 = vmatprep.mubr.bf16.mxu0 %v9637_v11  ;;  %7406 = vmatpush3.bf16.msra.mxu0 %v8683_v44  ;;  %v1053_v21 = vsel %vm9511_vm5, %v6739_v1, %v1052_v47  ;;  %v9702_v44 = vcombine.low %v1074_v28, %v1077_v15  ;;  %v9776_v15 = vld [vmem:[%s9072_s26 + $0xd4] sm:$0x1] }
  0xf2   : > { %8014 = vmatmul.mubr.bf16.gmra.mrb[76].mxu1 %v9615_v16  ;;  %7407 = vmatprep.subr.bf16.mxu0 %v8685_v8  ;;  %v9679_v27 = vcombine.low %v1053_v21, %v1056_v61  ;;  %v1303_v8 = vsel %vm9511_vm5, %v1301_v13, %v1302_v2 }
  0xf3   : > { %8017 = vmatprep.mubr.bf16.mxu1 %v9635_v9  ;;  %8046 = vmatpush3.bf16.msra.mxu1 %v8686_v4  ;;  %v1068_v4 = vrot.slane %v1066_v55, 4 }
  0xf4   : > { %8047 = vmatprep.subr.bf16.mxu1 %v8688_v14 }
  0xf5   : > { %7408 = vmatpush3.bf16.msra.mxu0 %v8687_v57  ;;  %v1070_v40 = vsel %vm9511_vm5, %v1068_v4, %v1069_v26 }
  0xf6   : > { %v9700_v31 = vcombine.low %v1067_v24, %v1070_v40  ;;  %v9772_v40 = vld [vmem:[%s9072_s26 + $0xcc] sm:$0xf] }
  0xf7   : > { %8048 = vmatpush3.bf16.msra.mxu1 %v8688_v14  ;;  %v9714_v14 = vcombine.low %v1300_v58, %v1303_v8  ;;  %v6843_v8 = vrot.slane %v9772_v40, 9 }
  0xf8   : > { %7970 = vmatmul.mubr.bf16.gmra.mrb[80].mxu0 %v9657_v39 }
  0xf9   : > { %7973 = vmatprep.mubr.bf16.mxu0 %v9659_v6 }
  0xfa   : > { %8018 = vmatmul.mubr.bf16.gmra.mrb[80].mxu1 %v9637_v11 }
  0xfb   : > { %8021 = vmatprep.mubr.bf16.mxu1 %v9657_v39 }
 0x100   : > { %7974 = vmatmul.mubr.bf16.gmra.mrb[84].mxu0 %v9679_v27 }
 0x101   : > { %7977 = vmatprep.mubr.bf16.mxu0 %v9681_v41 }
 0x102   : > { %8022 = vmatmul.mubr.bf16.gmra.mrb[84].mxu1 %v9659_v6 }
 0x103   : > { %8025 = vmatprep.mubr.bf16.mxu1 %v9679_v27 }
 0x108   : > { %7978 = vmatmul.mubr.bf16.gmra.mrb[88].mxu0 %v9700_v31 }
 0x109   : > { %7981 = vmatprep.mubr.bf16.mxu0 %v9702_v44 }
 0x10a   : > { %8026 = vmatmul.mubr.bf16.gmra.mrb[88].mxu1 %v9681_v41 }
 0x10b   : > { %8029 = vmatprep.mubr.bf16.mxu1 %v9700_v31 }
 0x110   : > { %7982 = vmatmul.mubr.bf16.gmra.mrb[92].mxu0 %v9714_v14 }
 0x111   : > { %2470 = vmatprep.mubr.bf16.mxu0 %v9144_v62 }
 0x112   : > { %8030 = vmatmul.mubr.bf16.gmra.mrb[92].mxu1 %v9702_v44 }
 0x113   : > { %8049 = vmatprep.mubr.bf16.mxu1 %v9572_v54 }
 0x118   : > { %2471 = vmatmul.mubr.bf16.vlgmr.msra.gmra.mrb[96].mxu0 %v9130_v42 }
 0x119   : > { %2478 = vmatprep.mubr.bf16.mxu0 %v9160_v18 }
 0x11a   : > { %8050 = vmatmul.mubr.bf16.vlgmr.msra.gmra.mrb[64].mxu1 %v9574_v23 }
 0x11b   : > { %8053 = vmatprep.mubr.bf16.mxu1 %v9592_v38 }
 0x120   : > { %2479 = vmatmul.mubr.bf16.gmra.mrb[100].mxu0 %v9175_v60 }
 0x121   : > { %2486 = vmatprep.mubr.bf16.mxu0 %v9179_v36 }
 0x122   : > { %8054 = vmatmul.mubr.bf16.gmra.mrb[68].mxu1 %v9594_v53 }
 0x123   : > { %8057 = vmatprep.mubr.bf16.mxu1 %v9613_v37 }
 0x128   : > { %2487 = vmatmul.mubr.bf16.gmra.mrb[104].mxu0 %v9206_v7  ;;  %v12519_v7 = vld [vmem:[#allocation11_spill] sm:$0xff] }
 0x129   : > { %2494 = vmatprep.mubr.bf16.mxu0 %v12518_v56 }
 0x12a   : > { %8058 = vmatmul.mubr.bf16.gmra.mrb[72].mxu1 %v9615_v16 }
 0x12b   : > { %v7137_v62 = vpop.f32.mrb[0].mxu0  ;;  %8061 = vmatprep.mubr.bf16.mxu1 %v9635_v9 }
 0x12c   : > { %v7138_v42 = vpop.f32.mrb[1].mxu0  ;;  %v7273_v54 = vpop.f32.mrb[0].mxu1 }
 0x12d   : > { %v7140_v18 = vpop.f32.mrb[2].mxu0  ;;  %v9732_v59 = vadd.f32 %v7138_v42, %v7137_v62  ;;  %v7274_v23 = vpop.f32.mrb[1].mxu1 }
 0x12e   : > { %v7141_v60 = vpop.f32.mrb[3].mxu0  ;;  %v9736_v38 = vadd.f32 %v7274_v23, %v7273_v54  ;;  %v7276_v53 = vpop.f32.mrb[2].mxu1  ;;  %v12526_v23 = vld [vmem:[#allocation18_spill] sm:$0xff] }
 0x12f   : > { %v9734_v36 = vadd.f32 %v7141_v60, %v7140_v18  ;;  %v7277_v37 = vpop.f32.mrb[3].mxu1  ;;  %v12525_v60 = vld [vmem:[#allocation17_spill] sm:$0xff] }
 0x130   : > { %2495 = vmatmul.mubr.bf16.gmra.mrb[108].mxu0 %v12519_v7  ;;  %v9740_v16 = vadd.f32 %v7277_v37, %v7276_v53 }
 0x131   : > { %2502 = vmatprep.mubr.bf16.mxu0 %v12520_v0 }
 0x132   : > { %8062 = vmatmul.mubr.bf16.gmra.mrb[76].mxu1 %v9637_v11 }
 0x133   : > { %v7143_v9 = vpop.f32.mrb[4].mxu0  ;;  %8065 = vmatprep.mubr.bf16.mxu1 %v9657_v39 }
 0x134   : > { %v7144_v32 = vpop.f32.mrb[5].mxu0  ;;  %v7279_v57 = vpop.f32.mrb[4].mxu1 }
 0x135   : > { %v7146_v47 = vpop.f32.mrb[6].mxu0  ;;  %v9744_v5 = vadd.f32 %v7144_v32, %v7143_v9  ;;  %v7280_v19 = vpop.f32.mrb[5].mxu1 }
 0x136   : > { %v7147_v3 = vpop.f32.mrb[7].mxu0  ;;  %v9746_v1 = vadd.f32 %v7280_v19, %v7279_v57  ;;  %v7282_v52 = vpop.f32.mrb[6].mxu1 }
 0x137   : > { %v9748_v43 = vadd.f32 %v7147_v3, %v7146_v47  ;;  %v7283_v12 = vpop.f32.mrb[7].mxu1 }
 0x138   : > { %2503 = vmatmul.mubr.bf16.gmra.mrb[112].mxu0 %v12521_v49  ;;  %v9752_v11 = vadd.f32 %v7283_v12, %v7282_v52 }
 0x139   : > { %2510 = vmatprep.mubr.bf16.mxu0 %v12522_v35 }
 0x13a   : > { %8066 = vmatmul.mubr.bf16.gmra.mrb[80].mxu1 %v9659_v6  ;;  %v9764_v6 = vld [vmem:[%s9072_s26 + $0xd0] sm:$0xf] }
 0x13b   : > { %v7149_v39 = vpop.f32.mrb[8].mxu0  ;;  %8069 = vmatprep.mubr.bf16.mxu1 %v9679_v27  ;;  %v12524_v27 = vld [vmem:[#allocation16_spill] sm:$0xff]  ;;  %v2277_v34 = vrot.slane %v9764_v6, 5 }
 0x13c   : > { %v7150_v21 = vpop.f32.mrb[9].mxu0 }
 0x13d   : > { %v7152_v61 = vpop.f32.mrb[10].mxu0  ;;  %v7285_v55 = vpop.f32.mrb[8].mxu1  ;;  %v9756_v29 = vadd.f32 %v7150_v21, %v7149_v39  ;;  %v2279_v56 = vrot.slane %v2277_v34, 4  ;;  %v2278_v37 = vsel %vm9511_vm5, %v6843_v8, %v2277_v34  ;;  %v12528_v39 = vld [vmem:[#allocation20_spill] sm:$0xff] }
 0x13e   : > { %v7153_v45 = vpop.f32.mrb[11].mxu0  ;;  %v7286_v10 = vpop.f32.mrb[9].mxu1 }
 0x13f   : > { %v9758_v50 = vadd.f32 %v7286_v10, %v7285_v55  ;;  %v7288_v4 = vpop.f32.mrb[10].mxu1  ;;  %v9760_v26 = vadd.f32 %v7153_v45, %v7152_v61 }
 0x140   : > { %2511 = vmatmul.mubr.bf16.gmra.mrb[116].mxu0 %v12523_v25  ;;  %v7289_v17 = vpop.f32.mrb[11].mxu1 }
 0x141   : > { %2518 = vmatprep.mubr.bf16.mxu0 %v12524_v27  ;;  %v9767_v63 = vadd.f32 %v7289_v17, %v7288_v4 }
 0x142   : > { %8070 = vmatmul.mubr.bf16.gmra.mrb[84].mxu1 %v9681_v41  ;;  %v2280_v41 = vrot.slane %v9776_v15, 5 }
 0x143   : > { %v7155_v24 = vpop.f32.mrb[12].mxu0  ;;  %8073 = vmatprep.mubr.bf16.mxu1 %v9700_v31 }
 0x144   : > { %v7156_v28 = vpop.f32.mrb[13].mxu0  ;;  %v2281_v0 = vsel %vm9511_vm5, %v2279_v56, %v2280_v41 }
 0x145   : > { %v7158_v48 = vpop.f32.mrb[14].mxu0  ;;  %v7291_v13 = vpop.f32.mrb[12].mxu1  ;;  %v9778_v2 = vadd.f32 %v7156_v28, %v7155_v24  ;;  %v6846_v19 = vcombine.low %v2278_v37, %v2281_v0  ;;  %v12529_v28 = vld [vmem:[#allocation21_spill] sm:$0xff]  ;;  %v12531_v0 = vld [vmem:[#allocation23_spill] sm:$0xff] }
 0x146   : > { %v7159_v58 = vpop.f32.mrb[15].mxu0  ;;  %v7292_v62 = vpop.f32.mrb[13].mxu1 }
 0x147   : > { %v9782_v42 = vadd.f32 %v7292_v62, %v7291_v13  ;;  %v7294_v31 = vpop.f32.mrb[14].mxu1  ;;  %v9784_v18 = vadd.f32 %v7159_v58, %v7158_v48  ;;  %v12530_v13 = vld [vmem:[#allocation22_spill] sm:$0xff] }
 0x148   : > { %2519 = vmatmul.mubr.bf16.gmra.mrb[120].mxu0 %v12525_v60  ;;  %v7295_v54 = vpop.f32.mrb[15].mxu1 }
 0x149   : > { %2526 = vmatprep.mubr.bf16.mxu0 %v12526_v23  ;;  %v9788_v53 = vadd.f32 %v7295_v54, %v7294_v31 }
 0x14a   : > { %8074 = vmatmul.mubr.bf16.gmra.mrb[88].mxu1 %v9702_v44 }
 0x14b   : > { %v7161_v7 = vpop.f32.mrb[16].mxu0  ;;  %8077 = vmatprep.mubr.bf16.mxu1 %v9714_v14  ;;  %v12527_v14 = vld [vmem:[#allocation19_spill] sm:$0xff] }
 0x14c   : > { %v7162_v9 = vpop.f32.mrb[17].mxu0 }
 0x14d   : > { %v7164_v32 = vpop.f32.mrb[18].mxu0  ;;  %v7297_v47 = vpop.f32.mrb[16].mxu1  ;;  %v9796_v57 = vadd.f32 %v7162_v9, %v7161_v7 }
 0x14e   : > { %v7165_v3 = vpop.f32.mrb[19].mxu0  ;;  %v7298_v52 = vpop.f32.mrb[17].mxu1 }
 0x14f   : > { %v9798_v49 = vadd.f32 %v7298_v52, %v7297_v47  ;;  %v7300_v44 = vpop.f32.mrb[18].mxu1  ;;  %v9800_v12 = vadd.f32 %v7165_v3, %v7164_v32  ;;  %v12532_v32 = vld [vmem:[#allocation24_spill] sm:$0xff] }
 0x150   : > { %2527 = vmatmul.mubr.bf16.gmra.mrb[124].mxu0 %v12527_v14  ;;  %v7301_v35 = vpop.f32.mrb[19].mxu1 }
 0x151   : > { %2534 = vmatprep.mubr.bf16.mxu0 %v12528_v39  ;;  %v9804_v21 = vadd.f32 %v7301_v35, %v7300_v44 }
 0x152   : > { %8078 = vmatmul.mubr.bf16.gmra.mrb[92].mxu1 %v6846_v19 }
 0x153   : > { %v7167_v61 = vpop.f32.mrb[20].mxu0 }
 0x154   : > { %v7168_v55 = vpop.f32.mrb[21].mxu0 }
 0x155   : > { %v7170_v45 = vpop.f32.mrb[22].mxu0  ;;  %v7303_v10 = vpop.f32.mrb[20].mxu1  ;;  %v9806_v4 = vadd.f32 %v7168_v55, %v7167_v61 }
 0x156   : > { %v7171_v25 = vpop.f32.mrb[23].mxu0  ;;  %v7304_v17 = vpop.f32.mrb[21].mxu1 }
 0x157   : > { %v9808_v27 = vadd.f32 %v7304_v17, %v7303_v10  ;;  %v7306_v24 = vpop.f32.mrb[22].mxu1  ;;  %v9810_v34 = vadd.f32 %v7171_v25, %v7170_v45 }
 0x158   : > { %2535 = vmatmul.mubr.bf16.gmra.mrb[128].mxu0 %v12529_v28  ;;  %v7307_v48 = vpop.f32.mrb[23].mxu1 }
 0x159   : > { %2542 = vmatprep.mubr.bf16.mxu0 %v12530_v13  ;;  %v9814_v58 = vadd.f32 %v7307_v48, %v7306_v24 }
 0x15b   : > { %v7173_v8 = vpop.f32.mrb[24].mxu0 }
 0x15c   : > { %v7174_v62 = vpop.f32.mrb[25].mxu0 }
 0x15d   : > { %v7176_v56 = vpop.f32.mrb[26].mxu0  ;;  %v7309_v41 = vpop.f32.mrb[24].mxu1  ;;  %v9816_v31 = vadd.f32 %v7174_v62, %v7173_v8 }
 0x15e   : > { %v7177_v60 = vpop.f32.mrb[27].mxu0  ;;  %v7310_v54 = vpop.f32.mrb[25].mxu1 }
 0x15f   : > { %v9818_v23 = vadd.f32 %v7310_v54, %v7309_v41  ;;  %v7312_v7 = vpop.f32.mrb[26].mxu1  ;;  %v9820_v37 = vadd.f32 %v7177_v60, %v7176_v56  ;;  %v12534_v54 = vld [vmem:[#allocation25_spill] sm:$0xff] }
 0x160   : > { %2543 = vmatmul.mubr.bf16.gmra.mrb[132].mxu0 %v12531_v0  ;;  %v7313_v9 = vpop.f32.mrb[27].mxu1  ;;  %v2252_v0 = vshll.u32 %v9772_v40, 16 }
 0x161   : > { %2550 = vmatprep.mubr.bf16.mxu0 %v12532_v32  ;;  %v9824_v47 = vadd.f32 %v7313_v9, %v7312_v7  ;;  %v2249_v7 = vshrl.u32 %v9772_v40, 16  ;;  %v2258_v9 = vshll.u32 %v9764_v6, 16  ;;  %v2262_v32 = vshrl.u32 %v9764_v6, 16 }
 0x163   : > { %v7179_v3 = vpop.f32.mrb[28].mxu0 }
 0x164   : > { %v7180_v19 = vpop.f32.mrb[29].mxu0 }
 0x165   : > { %v7182_v52 = vpop.f32.mrb[30].mxu0  ;;  %v7315_v44 = vpop.f32.mrb[28].mxu1  ;;  %v9826_v14 = vadd.f32 %v7180_v19, %v7179_v3 }
 0x166   : > { %v7183_v35 = vpop.f32.mrb[31].mxu0  ;;  %v7316_v39 = vpop.f32.mrb[29].mxu1 }
 0x167   : > { %v9828_v61 = vadd.f32 %v7316_v39, %v7315_v44  ;;  %v7318_v55 = vpop.f32.mrb[30].mxu1  ;;  %v9830_v45 = vadd.f32 %v7183_v35, %v7182_v52  ;;  %v2251_v39 = vrot.slane %v2249_v7, 4  ;;  %v2268_v7 = vshll.u32 %v9776_v15, 16  ;;  %v12538_v15 = vld [vmem:[#allocation29_spill] sm:$0xff] }
 0x168   : > { %2551 = vmatmul.mubr.bf16.gmra.mrb[136].mxu0 %v9454_v20  ;;  %v7319_v10 = vpop.f32.mrb[31].mxu1 }
 0x169   : > { %2558 = vmatprep.mubr.bf16.mxu0 %v9459_v46  ;;  %v9834_v25 = vadd.f32 %v7319_v10, %v7318_v55  ;;  %v2254_v55 = vrot.slane %v2252_v0, 5  ;;  %v2260_v10 = vrot.slane %v2258_v9, 5 }
 0x16b   : > { %v7185_v17 = vpop.f32.mrb[32].mxu0 }
 0x16c   : > { %v7186_v24 = vpop.f32.mrb[33].mxu0 }
 0x16d   : > { %v9836_v28 = vadd.f32 %v7186_v24, %v7185_v17  ;;  %v7188_v48 = vpop.f32.mrb[34].mxu0  ;;  %v7321_v13 = vpop.f32.mrb[32].mxu1  ;;  %v2264_v17 = vrot.slane %v2262_v32, 4 }
 0x16e   : > { %v7189_v8 = vpop.f32.mrb[35].mxu0  ;;  %v7322_v62 = vpop.f32.mrb[33].mxu1 }
 0x16f   : > { %v9838_v56 = vadd.f32 %v7189_v8, %v7188_v48  ;;  %v9840_v41 = vadd.f32 %v7322_v62, %v7321_v13  ;;  %v7324_v60 = vpop.f32.mrb[34].mxu1  ;;  %v12536_v62 = vld [vmem:[#allocation26_spill] sm:$0xff] }
 0x170   : > { %2559 = vmatmul.mubr.bf16.gmra.mrb[140].mxu0 %v9483_v22  ;;  %v7325_v20 = vpop.f32.mrb[35].mxu1 }
 0x171   : > { %12533 = vst [vmem:[#allocation10_spill] sm:$0xff] %v9838_v56  ;;  %2566 = vmatprep.mubr.bf16.mxu0 %v12534_v54  ;;  %v9844_v46 = vadd.f32 %v7325_v20, %v7324_v60  ;;  %v12537_v20 = vld [vmem:[#allocation27_spill] sm:$0xff] }
 0x173   : > { %12535 = vst [vmem:[#allocation11_spill] sm:$0xff] %v9844_v46  ;;  %v7191_v3 = vpop.f32.mrb[36].mxu0  ;;  %v2270_v46 = vrot.slane %v2268_v7, 5 }
 0x174   : > { %v7192_v19 = vpop.f32.mrb[37].mxu0 }
 0x175   : > { %v9850_v52 = vadd.f32 %v7192_v19, %v7191_v3  ;;  %v7194_v44 = vpop.f32.mrb[38].mxu0  ;;  %v7327_v35 = vpop.f32.mrb[36].mxu1  ;;  %v2255_v3 = vor.u32 %v2254_v55, %v2251_v39  ;;  %v2265_v19 = vor.u32 %v2264_v17, %v2260_v10 }
 0x176   : > { %v7195_v22 = vpop.f32.mrb[39].mxu0  ;;  %v7328_v24 = vpop.f32.mrb[37].mxu1 }
 0x177   : > { %v9852_v48 = vadd.f32 %v7195_v22, %v7194_v44  ;;  %v9854_v13 = vadd.f32 %v7328_v24, %v7327_v35  ;;  %v7330_v8 = vpop.f32.mrb[38].mxu1  ;;  %v2256_v24 = vrot.slane %v2255_v3, 4  ;;  %v2266_v30 = vrot.slane %v2265_v19, 4 }
 0x178   : > { %2567 = vmatmul.mubr.bf16.gmra.mrb[144].mxu0 %v12536_v62  ;;  %v7331_v60 = vpop.f32.mrb[39].mxu1 }
 0x179   : > { %2574 = vmatprep.mubr.bf16.mxu0 %v12537_v20  ;;  %v9858_v54 = vadd.f32 %v7331_v60, %v7330_v8  ;;  %v2261_v60 = vsel %vm9091_vm2, %v2256_v24, %v2260_v10  ;;  %v2271_v3 = vsel %vm9091_vm2, %v2266_v30, %v2270_v46 }
 0x17b   : > { %v7197_v0 = vpop.f32.mrb[40].mxu0 }
 0x17c   : > { %v7198_v9 = vpop.f32.mrb[41].mxu0 }
 0x17d   : > { %v9861_v32 = vadd.f32 %v7198_v9, %v7197_v0  ;;  %v7200_v44 = vpop.f32.mrb[42].mxu0  ;;  %v7333_v22 = vpop.f32.mrb[40].mxu1 }
 0x17e   : > { %v7201_v35 = vpop.f32.mrb[43].mxu0  ;;  %v7334_v62 = vpop.f32.mrb[41].mxu1 }
 0x17f   : > { %v9863_v56 = vadd.f32 %v7201_v35, %v7200_v44  ;;  %v9865_v20 = vadd.f32 %v7334_v62, %v7333_v22  ;;  %v7336_v8 = vpop.f32.mrb[42].mxu1  ;;  %v6845_v44 = vcombine.low %v2261_v60, %v2271_v3 }
 0x180   : > { %2575 = vmatmul.mubr.bf16.gmra.mrb[148].mxu0 %v9526_v33  ;;  %v7337_v39 = vpop.f32.mrb[43].mxu1 }
 0x181   : > { %2582 = vmatprep.mubr.bf16.mxu0 %v12538_v15  ;;  %v9869_v55 = vadd.f32 %v7337_v39, %v7336_v8  ;;  %v6844_v39 = vcombine.low %v9772_v40, %v9764_v6 }
 0x183   : > { %12539 = vst [vmem:[#allocation12_spill] sm:$0xff] %v9869_v55  ;;  %v7203_v19 = vpop.f32.mrb[44].mxu0 }
 0x184   : > { %v7204_v7 = vpop.f32.mrb[45].mxu0 }
 0x185   : > { %v9875_v0 = vadd.f32 %v7204_v7, %v7203_v19  ;;  %v7206_v9 = vpop.f32.mrb[46].mxu0  ;;  %v7339_v22 = vpop.f32.mrb[44].mxu1 }
 0x186   : > { %v7207_v35 = vpop.f32.mrb[47].mxu0  ;;  %v7340_v33 = vpop.f32.mrb[45].mxu1 }
 0x187   : > { %v9877_v62 = vadd.f32 %v7207_v35, %v7206_v9  ;;  %v9879_v15 = vadd.f32 %v7340_v33, %v7339_v22  ;;  %v7342_v8 = vpop.f32.mrb[46].mxu1 }
 0x188   : > { %2583 = vmatmul.mubr.bf16.gmra.mrb[152].mxu0 %v9539_v51  ;;  %v7343_v10 = vpop.f32.mrb[47].mxu1 }
 0x189   : > { %2590 = vmatprep.mubr.bf16.mxu0 %v6845_v44  ;;  %v9882_v24 = vadd.f32 %v7343_v10, %v7342_v8 }
 0x18b   : > { %v7209_v30 = vpop.f32.mrb[48].mxu0 }
 0x18c   : > { %v7210_v46 = vpop.f32.mrb[49].mxu0 }
 0x18d   : > { %v9886_v60 = vadd.f32 %v7210_v46, %v7209_v30  ;;  %v7212_v3 = vpop.f32.mrb[50].mxu0  ;;  %v7345_v19 = vpop.f32.mrb[48].mxu1 }
 0x18e   : > { %v7213_v7 = vpop.f32.mrb[51].mxu0  ;;  %v7346_v9 = vpop.f32.mrb[49].mxu1 }
 0x18f   : > { %12541 = vst [vmem:[#allocation13_spill] sm:$0xff] %v9886_v60  ;;  %v9888_v22 = vadd.f32 %v7213_v7, %v7212_v3  ;;  %v9890_v35 = vadd.f32 %v7346_v9, %v7345_v19  ;;  %v7348_v51 = vpop.f32.mrb[50].mxu1 }
 0x190   : > { %2591 = vmatmul.mubr.bf16.gmra.mrb[156].mxu0 %v6844_v39  ;;  %v7349_v44 = vpop.f32.mrb[51].mxu1 }
 0x191   : > { %12542 = vst [vmem:[#allocation14_spill] sm:$0xff] %v9888_v22  ;;  %12543 = vst [vmem:[#allocation15_spill] sm:$0xff] %v9890_v35  ;;  %v9892_v33 = vadd.f32 %v7349_v44, %v7348_v51 }
 0x193   : > { %12544 = vst [vmem:[#allocation16_spill] sm:$0xff] %v9892_v33  ;;  %v7215_v8 = vpop.f32.mrb[52].mxu0 }
 0x194   : > { %v7216_v10 = vpop.f32.mrb[53].mxu0 }
 0x195   : > { %v9894_v17 = vadd.f32 %v7216_v10, %v7215_v8  ;;  %v7218_v6 = vpop.f32.mrb[54].mxu0  ;;  %v7351_v40 = vpop.f32.mrb[52].mxu1 }
 0x196   : > { %v7219_v30 = vpop.f32.mrb[55].mxu0  ;;  %v7352_v46 = vpop.f32.mrb[53].mxu1 }
 0x197   : > { %v9896_v60 = vadd.f32 %v7219_v30, %v7218_v6  ;;  %v9898_v55 = vadd.f32 %v7352_v46, %v7351_v40  ;;  %v7354_v3 = vpop.f32.mrb[54].mxu1 }
 0x198   : > { %v7355_v19 = vpop.f32.mrb[55].mxu1 }
 0x199   : > { %12545 = vst [vmem:[#allocation17_spill] sm:$0xff] %v9896_v60  ;;  %12546 = vst [vmem:[#allocation18_spill] sm:$0xff] %v9898_v55  ;;  %v9900_v7 = vadd.f32 %v7355_v19, %v7354_v3 }
 0x19b   : > { %12547 = vst [vmem:[#allocation19_spill] sm:$0xff] %v9900_v7  ;;  %v7221_v39 = vpop.f32.mrb[56].mxu0 }
 0x19c   : > { %v7222_v9 = vpop.f32.mrb[57].mxu0 }
 0x19d   : > { %v9902_v51 = vadd.f32 %v7222_v9, %v7221_v39  ;;  %v7224_v44 = vpop.f32.mrb[58].mxu0  ;;  %v7357_v33 = vpop.f32.mrb[56].mxu1 }
 0x19e   : > { %v7225_v8 = vpop.f32.mrb[59].mxu0  ;;  %v7358_v10 = vpop.f32.mrb[57].mxu1 }
 0x19f   : > { %12548 = vst [vmem:[#allocation20_spill] sm:$0xff] %v9902_v51  ;;  %v9904_v22 = vadd.f32 %v7225_v8, %v7224_v44  ;;  %v9906_v35 = vadd.f32 %v7358_v10, %v7357_v33  ;;  %v7360_v6 = vpop.f32.mrb[58].mxu1 }
 0x1a0   : > { %v7361_v30 = vpop.f32.mrb[59].mxu1 }
 0x1a1   : > { %12549 = vst [vmem:[#allocation21_spill] sm:$0xff] %v9904_v22  ;;  %v9908_v40 = vadd.f32 %v7361_v30, %v7360_v6 }
 0x1a3   : > { %12550 = vst [vmem:[#allocation22_spill] sm:$0xff] %v9908_v40  ;;  %v7227_v46 = vpop.f32.mrb[60].mxu0 }
 0x1a4   : > { %v7228_v60 = vpop.f32.mrb[61].mxu0 }
 0x1a5   : > { %v9910_v3 = vadd.f32 %v7228_v60, %v7227_v46  ;;  %v7230_v19 = vpop.f32.mrb[62].mxu0  ;;  %v7363_v7 = vpop.f32.mrb[60].mxu1 }
 0x1a6   : > { %v7231_v39 = vpop.f32.mrb[63].mxu0  ;;  %v7364_v9 = vpop.f32.mrb[61].mxu1 }
 0x1a7   : > { %v9912_v51 = vadd.f32 %v7231_v39, %v7230_v19  ;;  %v9914_v55 = vadd.f32 %v7364_v9, %v7363_v7  ;;  %v7366_v44 = vpop.f32.mrb[62].mxu1 }
 0x1a8   : > { %v7367_v8 = vpop.f32.mrb[63].mxu1 }
 0x1a9   : > { %v9916_v33 = vadd.f32 %v7367_v8, %v7366_v44 }
 0x1ab   : > { %v7955_v10 = vpop.f32.mrb[64].mxu0 }
 0x1ac   : > { %v1664_v6 = vadd.f32 %v7955_v10, %v9744_v5  ;;  %v1655_v30 = vpop.f32.mrb[65].mxu0 }
 0x1ad   : > { %v1656_v40 = vadd.f32 %v9732_v59, %v1655_v30  ;;  %v7956_v60 = vpop.f32.mrb[66].mxu0 }
 0x1ae   : > { %v9921_v46 = vadd.f32 %v9746_v1, %v1664_v6  ;;  %v1667_v22 = vadd.f32 %v7956_v60, %v9748_v43  ;;  %v1658_v19 = vpop.f32.mrb[67].mxu0 }
 0x1af   : > { %v9925_v7 = vadd.f32 %v9736_v38, %v1656_v40  ;;  %v1659_v39 = vadd.f32 %v9734_v36, %v1658_v19 }
 0x1b0   : > { %v9929_v9 = vadd.f32 %v9752_v11, %v1667_v22 }
 0x1b1   : > { %v9932_v5 = vadd.f32 %v9740_v16, %v1659_v39 }
 0x1b3   : > { %v7959_v44 = vpop.f32.mrb[68].mxu0 }
 0x1b4   : > { %v1680_v59 = vadd.f32 %v7959_v44, %v9778_v2  ;;  %v1671_v8 = vpop.f32.mrb[69].mxu0 }
 0x1b5   : > { %v1672_v1 = vadd.f32 %v9756_v29, %v1671_v8  ;;  %v7960_v10 = vpop.f32.mrb[70].mxu0 }
 0x1b6   : > { %v9937_v43 = vadd.f32 %v9782_v42, %v1680_v59  ;;  %v1683_v38 = vadd.f32 %v7960_v10, %v9784_v18  ;;  %v1674_v40 = vpop.f32.mrb[71].mxu0 }
 0x1b7   : > { %v9941_v36 = vadd.f32 %v9758_v50, %v1672_v1  ;;  %v1675_v11 = vadd.f32 %v9760_v26, %v1674_v40 }
 0x1b8   : > { %v9945_v16 = vadd.f32 %v9788_v53, %v1683_v38 }
 0x1b9   : > { %v9948_v2 = vadd.f32 %v9767_v63, %v1675_v11  ;;  %v12552_v11 = vld [vmem:[#allocation11_spill] sm:$0xff] }
 0x1bb   : > { %v7963_v22 = vpop.f32.mrb[72].mxu0 }
 0x1bc   : > { %v1696_v29 = vadd.f32 %v7963_v22, %v9806_v4  ;;  %v1687_v6 = vpop.f32.mrb[73].mxu0 }
 0x1bd   : > { %v1688_v42 = vadd.f32 %v9796_v57, %v1687_v6  ;;  %v7964_v30 = vpop.f32.mrb[74].mxu0 }
 0x1be   : > { %v9953_v18 = vadd.f32 %v9808_v27, %v1696_v29  ;;  %v1699_v50 = vadd.f32 %v7964_v30, %v9810_v34  ;;  %v1690_v60 = vpop.f32.mrb[75].mxu0 }
 0x1bf   : > { %v9957_v26 = vadd.f32 %v9798_v49, %v1688_v42  ;;  %v1691_v53 = vadd.f32 %v9800_v12, %v1690_v60  ;;  %v12553_v60 = vld [vmem:[#allocation12_spill] sm:$0xff] }
 0x1c0   : > { %v9961_v63 = vadd.f32 %v9814_v58, %v1699_v50 }
 0x1c1   : > { %v9964_v4 = vadd.f32 %v9804_v21, %v1691_v53 }
 0x1c3   : > { %v7967_v19 = vpop.f32.mrb[76].mxu0 }
 0x1c4   : > { %v1712_v57 = vadd.f32 %v7967_v19, %v9826_v14  ;;  %v1703_v39 = vpop.f32.mrb[77].mxu0 }
 0x1c5   : > { %v1704_v27 = vadd.f32 %v9816_v31, %v1703_v39  ;;  %v7968_v44 = vpop.f32.mrb[78].mxu0 }
 0x1c6   : > { %v9969_v34 = vadd.f32 %v9828_v61, %v1712_v57  ;;  %v1715_v49 = vadd.f32 %v7968_v44, %v9830_v45  ;;  %v1706_v59 = vpop.f32.mrb[79].mxu0 }
 0x1c7   : > { %v9973_v12 = vadd.f32 %v9818_v23, %v1704_v27  ;;  %v1707_v58 = vadd.f32 %v9820_v37, %v1706_v59 }
 0x1c8   : > { %v9977_v21 = vadd.f32 %v9834_v25, %v1715_v49  ;;  %v12551_v25 = vld [vmem:[#allocation10_spill] sm:$0xff] }
 0x1c9   : > { %v9980_v14 = vadd.f32 %v9824_v47, %v1707_v58 }
 0x1cb   : > { %v7971_v8 = vpop.f32.mrb[80].mxu0 }
 0x1cc   : > { %v1728_v31 = vadd.f32 %v7971_v8, %v9850_v52  ;;  %v1719_v1 = vpop.f32.mrb[81].mxu0  ;;  %v12559_v8 = vld [vmem:[#allocation19_spill] sm:$0xff] }
 0x1cd   : > { %v1720_v61 = vadd.f32 %v9836_v28, %v1719_v1  ;;  %v7972_v10 = vpop.f32.mrb[82].mxu0  ;;  %v12560_v1 = vld [vmem:[#allocation16_spill] sm:$0xff] }
 0x1ce   : > { %v9985_v45 = vadd.f32 %v9854_v13, %v1728_v31  ;;  %v1731_v23 = vadd.f32 %v7972_v10, %v9852_v48  ;;  %v1722_v38 = vpop.f32.mrb[83].mxu0 }
 0x1cf   : > { %v9989_v37 = vadd.f32 %v9840_v41, %v1720_v61  ;;  %v1723_v40 = vadd.f32 %v12551_v25, %v1722_v38  ;;  %v12561_v38 = vld [vmem:[#allocation20_spill] sm:$0xff] }
 0x1d0   : > { %v9993_v47 = vadd.f32 %v9858_v54, %v1731_v23 }
 0x1d1   : > { %v9996_v52 = vadd.f32 %v12552_v11, %v1723_v40 }
 0x1d3   : > { %v7975_v22 = vpop.f32.mrb[84].mxu0 }
 0x1d4   : > { %v1744_v28 = vadd.f32 %v7975_v22, %v9875_v0  ;;  %v1735_v29 = vpop.f32.mrb[85].mxu0 }
 0x1d5   : > { %v1736_v13 = vadd.f32 %v9861_v32, %v1735_v29  ;;  %v7976_v6 = vpop.f32.mrb[86].mxu0 }
 0x1d6   : > { %v10001_v48 = vadd.f32 %v9879_v15, %v1744_v28  ;;  %v1747_v41 = vadd.f32 %v7976_v6, %v9877_v62  ;;  %v1738_v42 = vpop.f32.mrb[87].mxu0  ;;  %v12554_v15 = vld [vmem:[#allocation13_spill] sm:$0xff]  ;;  %v12555_v62 = vld [vmem:[#allocation18_spill] sm:$0xff] }
 0x1d7   : > { %v10005_v30 = vadd.f32 %v9865_v20, %v1736_v13  ;;  %v1739_v54 = vadd.f32 %v9863_v56, %v1738_v42  ;;  %v12556_v20 = vld [vmem:[#allocation17_spill] sm:$0xff]  ;;  %v12557_v56 = vld [vmem:[#allocation15_spill] sm:$0xff]  ;;  %v12563_v42 = vld [vmem:[#allocation22_spill] sm:$0xff] }
 0x1d8   : > { %v10009_v50 = vadd.f32 %v9882_v24, %v1747_v41  ;;  %v12558_v24 = vld [vmem:[#allocation14_spill] sm:$0xff]  ;;  %v12562_v13 = vld [vmem:[#allocation21_spill] sm:$0xff] }
 0x1d9   : > { %v10012_v0 = vadd.f32 %v12553_v60, %v1739_v54 }
 0x1db   : > { %v7979_v53 = vpop.f32.mrb[88].mxu0 }
 0x1dc   : > { %v1760_v32 = vadd.f32 %v7979_v53, %v9894_v17  ;;  %v1751_v19 = vpop.f32.mrb[89].mxu0 }
 0x1dd   : > { %v1752_v57 = vadd.f32 %v12554_v15, %v1751_v19  ;;  %v7980_v39 = vpop.f32.mrb[90].mxu0 }
 0x1de   : > { %v10017_v27 = vadd.f32 %v12555_v62, %v1760_v32  ;;  %v1763_v44 = vadd.f32 %v7980_v39, %v12556_v20  ;;  %v1754_v49 = vpop.f32.mrb[91].mxu0 }
 0x1df   : > { %v10021_v59 = vadd.f32 %v12557_v56, %v1752_v57  ;;  %v1755_v58 = vadd.f32 %v12558_v24, %v1754_v49 }
 0x1e0   : > { %v10025_v31 = vadd.f32 %v12559_v8, %v1763_v44 }
 0x1e1   : > { %v10028_v17 = vadd.f32 %v12560_v1, %v1755_v58 }
 0x1e3   : > { %v7983_v61 = vpop.f32.mrb[92].mxu0 }
 0x1e4   : > { %v1776_v10 = vadd.f32 %v7983_v61, %v9910_v3  ;;  %v1767_v23 = vpop.f32.mrb[93].mxu0 }
 0x1e5   : > { %v1768_v25 = vadd.f32 %v12561_v38, %v1767_v23  ;;  %v7984_v40 = vpop.f32.mrb[94].mxu0 }
 0x1e6   : > { %v10033_v11 = vadd.f32 %v9914_v55, %v1776_v10  ;;  %v1779_v22 = vadd.f32 %v7984_v40, %v9912_v51  ;;  %v1770_v28 = vpop.f32.mrb[95].mxu0 }
 0x1e7   : > { %v10037_v29 = vadd.f32 %v9906_v35, %v1768_v25  ;;  %v1771_v6 = vadd.f32 %v12562_v13, %v1770_v28 }
 0x1e8   : > { %v10041_v41 = vadd.f32 %v9916_v33, %v1779_v22 }
 0x1e9   : > { %v10044_v3 = vadd.f32 %v12563_v42, %v1771_v6 }
 0x1eb   : > { %v7409_v54 = vpop.f32.mrb[96].mxu0 }
 0x1ec   : > { %v7410_v60 = vpop.f32.mrb[97].mxu0 }
 0x1ed   : > { %v8051_v53 = vpop.f32.mrb[64].mxu1  ;;  %v7411_v32 = vadd.f32 %v7410_v60, %v7409_v54  ;;  %v7412_v55 = vpop.f32.mrb[98].mxu0 }
 0x1ee   : > { %v2633_v19 = vpop.f32.mrb[65].mxu1  ;;  %v7413_v15 = vpop.f32.mrb[99].mxu0 }
 0x1ef   : > { %v8231_v51 = vadd.f32 %v7411_v32, %v9925_v7  ;;  %v8052_v57 = vpop.f32.mrb[66].mxu1  ;;  %v7414_v35 = vadd.f32 %v7413_v15, %v7412_v55 }
 0x1f0   : > { %v2636_v39 = vpop.f32.mrb[67].mxu1 }
 0x1f1   : > { %v10047_v62 = vadd.f32 %v8231_v51, %v2633_v19  ;;  %v8239_v33 = vadd.f32 %v7414_v35, %v9932_v5 }
 0x1f3   : > { %v10050_v20 = vadd.f32 %v8239_v33, %v2636_v39  ;;  %v7415_v44 = vpop.f32.mrb[100].mxu0 }
 0x1f4   : > { %v7416_v49 = vpop.f32.mrb[101].mxu0 }
 0x1f5   : > { %v8055_v56 = vpop.f32.mrb[68].mxu1  ;;  %v7417_v24 = vadd.f32 %v7416_v49, %v7415_v44  ;;  %v7418_v58 = vpop.f32.mrb[102].mxu0 }
 0x1f6   : > { %v2649_v8 = vpop.f32.mrb[69].mxu1  ;;  %v7419_v1 = vpop.f32.mrb[103].mxu0 }
 0x1f7   : > { %v8227_v61 = vadd.f32 %v7417_v24, %v9921_v46  ;;  %v8056_v10 = vpop.f32.mrb[70].mxu1  ;;  %v7420_v7 = vadd.f32 %v7419_v1, %v7418_v58 }
 0x1f8   : > { %v2652_v23 = vpop.f32.mrb[71].mxu1 }
 0x1f9   : > { %v10053_v38 = vadd.f32 %v8227_v61, %v8051_v53  ;;  %v8235_v25 = vadd.f32 %v7420_v7, %v9929_v9 }
 0x1fb   : > { %v10056_v40 = vadd.f32 %v8235_v25, %v8052_v57  ;;  %v7421_v5 = vpop.f32.mrb[104].mxu0 }
 0x1fc   : > { %v7422_v22 = vpop.f32.mrb[105].mxu0 }
 0x1fd   : > { %v10058_v28 = vpop.f32.mrb[72].mxu1  ;;  %v7423_v13 = vadd.f32 %v7422_v22, %v7421_v5  ;;  %v7424_v6 = vpop.f32.mrb[106].mxu0 }
 0x1fe   : > { %v2665_v42 = vpop.f32.mrb[73].mxu1  ;;  %v7425_v54 = vpop.f32.mrb[107].mxu0 }
 0x1ff   : > { %v8247_v60 = vadd.f32 %v7423_v13, %v9941_v36  ;;  %v8060_v46 = vpop.f32.mrb[74].mxu1  ;;  %v7426_v32 = vadd.f32 %v7425_v54, %v7424_v6  ;;  %v2832_v13 = vmul.f32 %v10050_v20, %v10050_v20 }
 0x200   : > { %v2668_v55 = vpop.f32.mrb[75].mxu1 }
 0x201   : > { %v10061_v19 = vadd.f32 %v8247_v60, %v2649_v8  ;;  %v8255_v53 = vadd.f32 %v7426_v32, %v9948_v2  ;;  %v2792_v60 = vadd.f32 %v10050_v20, %v10047_v62  ;;  %v2833_v32 = vmul.f32 %v10053_v38, %v10053_v38 }
 0x203   : > { %v10064_v9 = vadd.f32 %v8255_v53, %v2652_v23  ;;  %v7427_v15 = vpop.f32.mrb[108].mxu0 }
 0x204   : > { %v7428_v51 = vpop.f32.mrb[109].mxu0 }
 0x205   : > { %v10066_v57 = vpop.f32.mrb[76].mxu1  ;;  %v7429_v35 = vadd.f32 %v7428_v51, %v7427_v15  ;;  %v7430_v39 = vpop.f32.mrb[110].mxu0 }
 0x206   : > { %v10068_v33 = vpop.f32.mrb[77].mxu1  ;;  %v7431_v44 = vpop.f32.mrb[111].mxu0 }
 0x207   : > { %v8243_v36 = vadd.f32 %v7429_v35, %v9937_v43  ;;  %v10071_v49 = vpop.f32.mrb[78].mxu1  ;;  %v7432_v24 = vadd.f32 %v7431_v44, %v7430_v39 }
 0x208   : > { %v10073_v58 = vpop.f32.mrb[79].mxu1 }
 0x209   : > { %v10075_v8 = vadd.f32 %v8243_v36, %v8055_v56  ;;  %v8251_v2 = vadd.f32 %v7432_v24, %v9945_v16  ;;  %v2831_v16 = vmul.f32 %v10047_v62, %v10047_v62  ;;  %v2834_v24 = vmul.f32 %v10056_v40, %v10056_v40 }
 0x20b   : > { %v10078_v1 = vadd.f32 %v8251_v2, %v8056_v10  ;;  %v7433_v61 = vpop.f32.mrb[112].mxu0  ;;  %v2863_v51 = vadd.f32 %v2832_v13, %v2831_v16 }
 0x20c   : > { %v7434_v7 = vpop.f32.mrb[113].mxu0 }
 0x20d   : > { %12564 = vst [vmem:[#allocation23_spill] sm:$0xff] %v10078_v1  ;;  %v10080_v23 = vpop.f32.mrb[80].mxu1  ;;  %v7435_v25 = vadd.f32 %v7434_v7, %v7433_v61  ;;  %v7436_v5 = vpop.f32.mrb[114].mxu0  ;;  %v2864_v36 = vadd.f32 %v2863_v51, %v2833_v32  ;;  %v2836_v51 = vmul.f32 %v10064_v9, %v10064_v9 }
 0x20e   : > { %v10082_v22 = vpop.f32.mrb[81].mxu1  ;;  %v7437_v43 = vpop.f32.mrb[115].mxu0 }
 0x20f   : > { %v8263_v6 = vadd.f32 %v7435_v25, %v9957_v26  ;;  %v10087_v56 = vpop.f32.mrb[82].mxu1  ;;  %v7438_v54 = vadd.f32 %v7437_v43, %v7436_v5  ;;  %v2793_v26 = vadd.f32 %v10053_v38, %v2792_v60  ;;  %v2835_v5 = vmul.f32 %v10061_v19, %v10061_v19 }
 0x210   : > { %v10091_v10 = vpop.f32.mrb[83].mxu1 }
 0x211   : > { %v10097_v53 = vadd.f32 %v8263_v6, %v2665_v42  ;;  %v8271_v15 = vadd.f32 %v7438_v54, %v9964_v4  ;;  %v2794_v4 = vadd.f32 %v10056_v40, %v2793_v26  ;;  %v2865_v54 = vadd.f32 %v2864_v36, %v2834_v24 }
 0x212   : > { %v2837_v36 = vmul.f32 %v10075_v8, %v10075_v8 }
 0x213   : > { %12565 = vst [vmem:[#allocation24_spill] sm:$0xff] %v10097_v53  ;;  %v10101_v35 = vadd.f32 %v8271_v15, %v2668_v55  ;;  %v7439_v39 = vpop.f32.mrb[116].mxu0  ;;  %v2795_v16 = vadd.f32 %v10061_v19, %v2794_v4  ;;  %v2866_v15 = vadd.f32 %v2865_v54, %v2835_v5 }
 0x214   : > { %v7440_v44 = vpop.f32.mrb[117].mxu0 }
 0x215   : > { %12566 = vst [vmem:[#allocation25_spill] sm:$0xff] %v10101_v35  ;;  %v10105_v2 = vpop.f32.mrb[84].mxu1  ;;  %v7441_v61 = vadd.f32 %v7440_v44, %v7439_v39  ;;  %v7442_v7 = vpop.f32.mrb[118].mxu0  ;;  %v2796_v44 = vadd.f32 %v10064_v9, %v2795_v16  ;;  %v2838_v16 = vmul.f32 %v10078_v1, %v10078_v1 }
 0x216   : > { %v10107_v25 = vpop.f32.mrb[85].mxu1  ;;  %v7443_v42 = vpop.f32.mrb[119].mxu0 }
 0x217   : > { %v8259_v55 = vadd.f32 %v7441_v61, %v9953_v18  ;;  %v10113_v43 = vpop.f32.mrb[86].mxu1  ;;  %v7444_v13 = vadd.f32 %v7443_v42, %v7442_v7  ;;  %v2867_v42 = vadd.f32 %v2866_v15, %v2836_v51  ;;  %v2797_v4 = vadd.f32 %v10075_v8, %v2796_v44 }
 0x218   : > { %v10115_v6 = vpop.f32.mrb[87].mxu1  ;;  %v2839_v51 = vmul.f32 %v10097_v53, %v10097_v53 }
 0x219   : > { %v10119_v60 = vadd.f32 %v8259_v55, %v10058_v28  ;;  %v8267_v32 = vadd.f32 %v7444_v13, %v9961_v63  ;;  %v2868_v54 = vadd.f32 %v2867_v42, %v2837_v36  ;;  %v2798_v15 = vadd.f32 %v10078_v1, %v2797_v4 }
 0x21a   : > { %v2840_v4 = vmul.f32 %v10101_v35, %v10101_v35 }
 0x21b   : > { %v10124_v26 = vadd.f32 %v8267_v32, %v8060_v46  ;;  %v7445_v18 = vpop.f32.mrb[120].mxu0  ;;  %v2799_v36 = vadd.f32 %v10097_v53, %v2798_v15 }
 0x21c   : > { %v7446_v39 = vpop.f32.mrb[121].mxu0 }
 0x21d   : > { %v10129_v24 = vpop.f32.mrb[88].mxu1  ;;  %v7447_v61 = vadd.f32 %v7446_v39, %v7445_v18  ;;  %v7448_v28 = vpop.f32.mrb[122].mxu0 }
 0x21e   : > { %v10131_v7 = vpop.f32.mrb[89].mxu1  ;;  %v7449_v63 = vpop.f32.mrb[123].mxu0 }
 0x21f   : > { %v8279_v46 = vadd.f32 %v7447_v61, %v9973_v12  ;;  %v10135_v5 = vpop.f32.mrb[90].mxu1  ;;  %v7450_v55 = vadd.f32 %v7449_v63, %v7448_v28  ;;  %v2869_v61 = vadd.f32 %v2868_v54, %v2838_v16  ;;  %v2800_v54 = vadd.f32 %v10101_v35, %v2799_v36 }
 0x220   : > { %v10137_v13 = vpop.f32.mrb[91].mxu1  ;;  %v2841_v16 = vmul.f32 %v10119_v60, %v10119_v60  ;;  %v2842_v36 = vmul.f32 %v10124_v26, %v10124_v26 }
 0x221   : > { %v10142_v32 = vadd.f32 %v8279_v46, %v10068_v33  ;;  %v8287_v18 = vadd.f32 %v7450_v55, %v9980_v14  ;;  %v2870_v46 = vadd.f32 %v2869_v61, %v2839_v51 }
 0x223   : > { %v10149_v12 = vadd.f32 %v8287_v18, %v10073_v58  ;;  %v7451_v39 = vpop.f32.mrb[124].mxu0 }
 0x224   : > { %v7452_v44 = vpop.f32.mrb[125].mxu0 }
 0x225   : > { %v10152_v28 = vpop.f32.mrb[92].mxu1  ;;  %v7453_v63 = vadd.f32 %v7452_v44, %v7451_v39  ;;  %v7454_v33 = vpop.f32.mrb[126].mxu0  ;;  %v2871_v39 = vadd.f32 %v2870_v46, %v2840_v4  ;;  %v2801_v44 = vadd.f32 %v10119_v60, %v2800_v54 }
 0x226   : > { %v10154_v42 = vpop.f32.mrb[93].mxu1  ;;  %v7455_v14 = vpop.f32.mrb[127].mxu0 }
 0x227   : > { %v8275_v55 = vadd.f32 %v7453_v63, %v9969_v34  ;;  %v10159_v58 = vpop.f32.mrb[94].mxu1  ;;  %v7456_v18 = vadd.f32 %v7455_v14, %v7454_v33  ;;  %v2872_v33 = vadd.f32 %v2871_v39, %v2841_v16 }
 0x228   : > { %v10161_v1 = vpop.f32.mrb[95].mxu1 }
 0x229   : > { %v10167_v15 = vadd.f32 %v8275_v55, %v10066_v57  ;;  %v8283_v51 = vadd.f32 %v7456_v18, %v9977_v21  ;;  %v2802_v57 = vadd.f32 %v10124_v26, %v2801_v44  ;;  %v2843_v21 = vmul.f32 %v10142_v32, %v10142_v32 }
 0x22a   : > { %v2873_v55 = vadd.f32 %v2872_v33, %v2842_v36 }
 0x22b   : > { %v10172_v34 = vadd.f32 %v8283_v51, %v10071_v49  ;;  %v7457_v61 = vpop.f32.mrb[128].mxu0  ;;  %v2803_v49 = vadd.f32 %v10142_v32, %v2802_v57  ;;  %v2844_v51 = vmul.f32 %v10149_v12, %v10149_v12 }
 0x22c   : > { %v7458_v63 = vpop.f32.mrb[129].mxu0  ;;  %v2874_v16 = vadd.f32 %v2873_v55, %v2843_v21 }
 0x22d   : > { %v7459_v14 = vadd.f32 %v7458_v63, %v7457_v61  ;;  %v7460_v35 = vpop.f32.mrb[130].mxu0 }
 0x22e   : > { %v7461_v53 = vpop.f32.mrb[131].mxu0  ;;  %v2875_v33 = vadd.f32 %v2874_v16, %v2844_v51 }
 0x22f   : > { %v8295_v46 = vadd.f32 %v7459_v14, %v9989_v37  ;;  %v7462_v4 = vadd.f32 %v7461_v53, %v7460_v35  ;;  %v2804_v37 = vadd.f32 %v10149_v12, %v2803_v49  ;;  %v2845_v53 = vmul.f32 %v10167_v15, %v10167_v15 }
 0x231   : > { %v10182_v18 = vadd.f32 %v8295_v46, %v10082_v22  ;;  %v8303_v54 = vadd.f32 %v7462_v4, %v9996_v52  ;;  %v2805_v52 = vadd.f32 %v10167_v15, %v2804_v37  ;;  %v2876_v57 = vadd.f32 %v2875_v33, %v2845_v53 }
 0x233   : > { %v10188_v39 = vadd.f32 %v8303_v54, %v10091_v10  ;;  %v7463_v44 = vpop.f32.mrb[132].mxu0  ;;  %v2846_v10 = vmul.f32 %v10172_v34, %v10172_v34  ;;  %v2806_v4 = vadd.f32 %v10172_v34, %v2805_v52  ;;  %v2847_v55 = vmul.f32 %v10182_v18, %v10182_v18 }
 0x234   : > { %v7464_v61 = vpop.f32.mrb[133].mxu0 }
 0x235   : > { %v7465_v35 = vadd.f32 %v7464_v61, %v7463_v44  ;;  %v7466_v63 = vpop.f32.mrb[134].mxu0  ;;  %v2877_v16 = vadd.f32 %v2876_v57, %v2846_v10  ;;  %v2807_v51 = vadd.f32 %v10182_v18, %v2806_v4 }
 0x236   : > { %v7467_v22 = vpop.f32.mrb[135].mxu0 }
 0x237   : > { %v8291_v36 = vadd.f32 %v7465_v35, %v9985_v45  ;;  %v7468_v14 = vadd.f32 %v7467_v22, %v7466_v63  ;;  %v2808_v63 = vadd.f32 %v10188_v39, %v2807_v51 }
 0x239   : > { %v10198_v21 = vadd.f32 %v8291_v36, %v10080_v23  ;;  %v8299_v46 = vadd.f32 %v7468_v14, %v9993_v47  ;;  %v2878_v23 = vadd.f32 %v2877_v16, %v2847_v55  ;;  %v2848_v47 = vmul.f32 %v10188_v39, %v10188_v39 }
 0x23b   : > { %v10205_v49 = vadd.f32 %v8299_v46, %v10087_v56  ;;  %v7469_v54 = vpop.f32.mrb[136].mxu0  ;;  %v2849_v56 = vmul.f32 %v10198_v21, %v10198_v21  ;;  %v2879_v52 = vadd.f32 %v2878_v23, %v2848_v47  ;;  %v2809_v36 = vadd.f32 %v10198_v21, %v2808_v63 }
 0x23c   : > { %v7470_v45 = vpop.f32.mrb[137].mxu0 }
 0x23d   : > { %v7471_v44 = vadd.f32 %v7470_v45, %v7469_v54  ;;  %v7472_v61 = vpop.f32.mrb[138].mxu0  ;;  %v2850_v46 = vmul.f32 %v10205_v49, %v10205_v49 }
 0x23e   : > { %v7473_v37 = vpop.f32.mrb[139].mxu0 }
 0x23f   : > { %v8311_v53 = vadd.f32 %v7471_v44, %v10005_v30  ;;  %v7474_v35 = vadd.f32 %v7473_v37, %v7472_v61  ;;  %v2880_v30 = vadd.f32 %v2879_v52, %v2849_v56 }
 0x241   : > { %v10215_v22 = vadd.f32 %v8311_v53, %v10107_v25  ;;  %v8319_v33 = vadd.f32 %v7474_v35, %v10012_v0  ;;  %v2810_v25 = vadd.f32 %v10205_v49, %v2809_v36  ;;  %v2881_v51 = vadd.f32 %v2880_v30, %v2850_v46 }
 0x243   : > { %v10220_v14 = vadd.f32 %v8319_v33, %v10115_v6  ;;  %v7475_v57 = vpop.f32.mrb[140].mxu0  ;;  %v2851_v0 = vmul.f32 %v10215_v22, %v10215_v22  ;;  %v2811_v6 = vadd.f32 %v10215_v22, %v2810_v25 }
 0x244   : > { %v7476_v10 = vpop.f32.mrb[141].mxu0 }
 0x245   : > { %v7477_v4 = vadd.f32 %v7476_v10, %v7475_v57  ;;  %v7478_v55 = vpop.f32.mrb[142].mxu0  ;;  %v2882_v37 = vadd.f32 %v2881_v51, %v2851_v0  ;;  %v2852_v23 = vmul.f32 %v10220_v14, %v10220_v14 }
 0x246   : > { %v7479_v54 = vpop.f32.mrb[143].mxu0 }
 0x247   : > { %v8307_v45 = vadd.f32 %v7477_v4, %v10001_v48  ;;  %v7480_v16 = vadd.f32 %v7479_v54, %v7478_v55  ;;  %v2812_v48 = vadd.f32 %v10220_v14, %v2811_v6  ;;  %v2883_v52 = vadd.f32 %v2882_v37, %v2852_v23 }
 0x249   : > { %v10230_v44 = vadd.f32 %v8307_v45, %v10105_v2  ;;  %v8315_v61 = vadd.f32 %v7480_v16, %v10009_v50 }
 0x24b   : > { %v10236_v47 = vadd.f32 %v8315_v61, %v10113_v43  ;;  %v7481_v53 = vpop.f32.mrb[144].mxu0  ;;  %v2853_v63 = vmul.f32 %v10230_v44, %v10230_v44  ;;  %v2813_v50 = vadd.f32 %v10230_v44, %v2812_v48 }
 0x24c   : > { %v7482_v35 = vpop.f32.mrb[145].mxu0 }
 0x24d   : > { %v7483_v56 = vadd.f32 %v7482_v35, %v7481_v53  ;;  %v7484_v33 = vpop.f32.mrb[146].mxu0  ;;  %v2884_v10 = vadd.f32 %v2883_v52, %v2853_v63  ;;  %v2854_v43 = vmul.f32 %v10236_v47, %v10236_v47  ;;  %v2814_v4 = vadd.f32 %v10236_v47, %v2813_v50 }
 0x24e   : > { %v7485_v2 = vpop.f32.mrb[147].mxu0 }
 0x24f   : > { %v8327_v36 = vadd.f32 %v7483_v56, %v10021_v59  ;;  %v7486_v57 = vadd.f32 %v7485_v2, %v7484_v33  ;;  %v2885_v0 = vadd.f32 %v2884_v10, %v2854_v43 }
 0x251   : > { %v10246_v30 = vadd.f32 %v8327_v36, %v10131_v7  ;;  %v8335_v46 = vadd.f32 %v7486_v57, %v10028_v17 }
 0x253   : > { %v2855_v55 = vmul.f32 %v10246_v30, %v10246_v30  ;;  %v10253_v54 = vadd.f32 %v8335_v46, %v10137_v13  ;;  %v7487_v25 = vpop.f32.mrb[148].mxu0  ;;  %v2815_v45 = vadd.f32 %v10246_v30, %v2814_v4 }
 0x254   : > { %v7488_v59 = vpop.f32.mrb[149].mxu0 }
 0x255   : > { %v7489_v16 = vadd.f32 %v7488_v59, %v7487_v25  ;;  %v7490_v51 = vpop.f32.mrb[150].mxu0  ;;  %v2886_v7 = vadd.f32 %v2885_v0, %v2855_v55  ;;  %v2856_v17 = vmul.f32 %v10253_v54, %v10253_v54  ;;  %v2816_v23 = vadd.f32 %v10253_v54, %v2815_v45 }
 0x256   : > { %v7491_v6 = vpop.f32.mrb[151].mxu0 }
 0x257   : > { %v8323_v61 = vadd.f32 %v7489_v16, %v10017_v27  ;;  %v7492_v37 = vadd.f32 %v7491_v6, %v7490_v51  ;;  %v2887_v35 = vadd.f32 %v2886_v7, %v2856_v17 }
 0x259   : > { %v10261_v13 = vadd.f32 %v8323_v61, %v10129_v24  ;;  %v8331_v53 = vadd.f32 %v7492_v37, %v10025_v31 }
 0x25b   : > { %v2817_v48 = vadd.f32 %v10261_v13, %v2816_v23  ;;  %v2857_v63 = vmul.f32 %v10261_v13, %v10261_v13  ;;  %v10268_v56 = vadd.f32 %v8331_v53, %v10135_v5  ;;  %v7493_v33 = vpop.f32.mrb[152].mxu0 }
 0x25c   : > { %v7494_v2 = vpop.f32.mrb[153].mxu0 }
 0x25d   : > { %v2888_v27 = vadd.f32 %v2887_v35, %v2857_v63  ;;  %v2818_v52 = vadd.f32 %v10268_v56, %v2817_v48  ;;  %v2858_v24 = vmul.f32 %v10268_v56, %v10268_v56  ;;  %v7495_v50 = vadd.f32 %v7494_v2, %v7493_v33  ;;  %v7496_v36 = vpop.f32.mrb[154].mxu0  ;;  %v8692_v63 = vld [vmem:[#allocation3 + $0x380] sm:$0xff]  }
 0x25e   : > { %v7497_v31 = vpop.f32.mrb[155].mxu0  ;;  %8081 = vmatprep.subr.bf16.mxu1 %v8692_v63 }
 0x25f   : > { %v2889_v57 = vadd.f32 %v2888_v27, %v2858_v24  ;;  %v8343_v10 = vadd.f32 %v7495_v50, %v10037_v29  ;;  %v7498_v43 = vadd.f32 %v7497_v31, %v7496_v36  ;;  %8082 = vmatpush3.bf16.msra.mxu1 %v8692_v63  ;;  %v8693_v27 = vld [vmem:[#allocation3 + $0x388] sm:$0xff]   ;;  %v8690_v50 = vld [vmem:[#allocation3 + $0x340] sm:$0xff]   ;;  %v2906_v63 = vlaneseq }
 0x260   : > { %8083 = vmatprep.subr.bf16.mxu1 %v8693_v27  ;;  %v8691_v31 = vld [vmem:[#allocation3 + $0x300] sm:$0xff]   ;;  %7529 = vmatprep.subr.bf16.mxu0 %v8690_v50  ;;  %v8711_v50 = vld [vmem:[#allocation3 + $0x330] sm:$0xff]  }
 0x261   : > { %v10275_v46 = vadd.f32 %v8343_v10, %v10154_v42  ;;  %v8351_v5 = vadd.f32 %v7498_v43, %v10044_v3  ;;  %7530 = vmatpush3.bf16.msra.mxu0 %v8691_v31 }
 0x263   : > { %v2819_v4 = vadd.f32 %v10275_v46, %v2818_v52  ;;  %v2859_v55 = vmul.f32 %v10275_v46, %v10275_v46  ;;  %v10282_v25 = vadd.f32 %v8351_v5, %v10161_v1  ;;  %v7499_v59 = vpop.f32.mrb[156].mxu0  ;;  %8084 = vmatpush3.bf16.msra.mxu1 %v8693_v27  ;;  %v8694_v5 = vld [vmem:[#allocation3 + $0x348] sm:$0xff]   ;;  %v8710_v27 = vld [vmem:[#allocation3 + $0x370] sm:$0xff]  }
 0x264   : > { %v7500_v0 = vpop.f32.mrb[157].mxu0  ;;  %7531 = vmatprep.subr.bf16.mxu0 %v8694_v5 }
 0x265   : > { %v2890_v45 = vadd.f32 %v2889_v57, %v2859_v55  ;;  %v2820_v16 = vadd.f32 %v10282_v25, %v2819_v4  ;;  %v2860_v29 = vmul.f32 %v10282_v25, %v10282_v25  ;;  %v7501_v42 = vadd.f32 %v7500_v0, %v7499_v59  ;;  %v7502_v51 = vpop.f32.mrb[158].mxu0  ;;  %v8696_v57 = vld [vmem:[#allocation3 + $0x390] sm:$0xff]   ;;  %v8695_v59 = vld [vmem:[#allocation3 + $0x308] sm:$0xff]   ;;  %v8697_v0 = vld [vmem:[#allocation3 + $0x398] sm:$0xff]  }
 0x266   : > { %v7503_v6 = vpop.f32.mrb[159].mxu0  ;;  %8085 = vmatprep.subr.bf16.mxu1 %v8696_v57  ;;  %7532 = vmatpush3.bf16.msra.mxu0 %v8695_v59 }
 0x267   : > { %v2891_v3 = vadd.f32 %v2890_v45, %v2860_v29  ;;  %v8339_v7 = vadd.f32 %v7501_v42, %v10033_v11  ;;  %v7504_v17 = vadd.f32 %v7503_v6, %v7502_v51  ;;  %8086 = vmatpush3.bf16.msra.mxu1 %v8696_v57  ;;  %v8698_v29 = vld [vmem:[#allocation3 + $0x350] sm:$0xff]  }
 0x268   : > { %8087 = vmatprep.subr.bf16.mxu1 %v8697_v0  ;;  %v8699_v6 = vld [vmem:[#allocation3 + $0x310] sm:$0xff]   ;;  %7533 = vmatprep.subr.bf16.mxu0 %v8698_v29 }
 0x269   : > { %v10289_v61 = vadd.f32 %v8339_v7, %v10152_v28  ;;  %v8347_v1 = vadd.f32 %v7504_v17, %v10041_v41  ;;  %v8701_v17 = vld [vmem:[#allocation3 + $0x3a8] sm:$0xff]  }
 0x26a   : > { %7534 = vmatpush3.bf16.msra.mxu0 %v8699_v6 }
 0x26b   : > { %v2821_v37 = vadd.f32 %v10289_v61, %v2820_v16  ;;  %v2861_v23 = vmul.f32 %v10289_v61, %v10289_v61  ;;  %v10296_v53 = vadd.f32 %v8347_v1, %v10159_v58  ;;  %8088 = vmatpush3.bf16.msra.mxu1 %v8697_v0  ;;  %v8702_v1 = vld [vmem:[#allocation3 + $0x358] sm:$0xff]  }
 0x26c   : > { %7535 = vmatprep.subr.bf16.mxu0 %v8702_v1  ;;  %v12570_v1 = vld [vmem:[#allocation25_spill] sm:$0xff] }
 0x26d   : > { %v2892_v35 = vadd.f32 %v2891_v3, %v2861_v23  ;;  %v2822_v48 = vadd.f32 %v10296_v53, %v2821_v37  ;;  %v2862_v11 = vmul.f32 %v10296_v53, %v10296_v53  ;;  %v8700_v3 = vld [vmem:[#allocation3 + $0x3a0] sm:$0xff]   ;;  %v8703_v37 = vld [vmem:[#allocation3 + $0x318] sm:$0xff]  }
 0x26e   : > { %8089 = vmatprep.subr.bf16.mxu1 %v8700_v3  ;;  %7536 = vmatpush3.bf16.msra.mxu0 %v8703_v37 }
 0x26f   : > { %v2823_v33 = vrot.slane %v2822_v48, 4  ;;  %v2893_v28 = vadd.f32 %v2892_v35, %v2862_v11  ;;  %8090 = vmatpush3.bf16.msra.mxu1 %v8700_v3  ;;  %v8705_v35 = vld [vmem:[#allocation3 + $0x360] sm:$0xff]  }
 0x270   : > { %8091 = vmatprep.subr.bf16.mxu1 %v8701_v17  ;;  %v8706_v11 = vld [vmem:[#allocation3 + $0x320] sm:$0xff]   ;;  %7537 = vmatprep.subr.bf16.mxu0 %v8705_v35 }
 0x271   : > { %v2824_v2 = vadd.f32 %v2823_v33, %v2822_v48  ;;  %v2894_v41 = vrot.slane %v2893_v28, 4  ;;  %v8704_v48 = vld [vmem:[#allocation3 + $0x3b0] sm:$0xff]   ;;  %v8708_v33 = vld [vmem:[#allocation3 + $0x368] sm:$0xff]  }
 0x272   : > { %7538 = vmatpush3.bf16.msra.mxu0 %v8706_v11 }
 0x273   : > { %v2825_v52 = vrot.slane %v2824_v2, 2  ;;  %v2895_v24 = vadd.f32 %v2894_v41, %v2893_v28  ;;  %8092 = vmatpush3.bf16.msra.mxu1 %v8701_v17  ;;  %v8707_v28 = vld [vmem:[#allocation3 + $0x3b8] sm:$0xff]   ;;  %v10301_v41 = vshrl.u32 %v2906_v63, 7  ;;  %7539 = vmatprep.subr.bf16.mxu0 %v8708_v33 }
 0x274   : > { %8093 = vmatprep.subr.bf16.mxu1 %v8704_v48 }
 0x275   : > { %v2826_v58 = vadd.f32 %v2825_v52, %v2824_v2  ;;  %v2896_v36 = vrot.slane %v2895_v24, 2  ;;  %v8709_v2 = vld [vmem:[#allocation3 + $0x328] sm:$0xff]   ;;  %12567 = vst [vmem:[#allocation26_spill] sm:$0xff] %v10301_v41  ;;  %v8712_v52 = vld [vmem:[#allocation3 + $0x2c0] sm:$0xff]  }
 0x276   : > { %7540 = vmatpush3.bf16.msra.mxu0 %v8709_v2 }
 0x277   : > { %v2827_v10 = vrot.slane %v2826_v58, 1  ;;  %v2897_v43 = vadd.f32 %v2896_v36, %v2895_v24  ;;  %8094 = vmatpush3.bf16.msra.mxu1 %v8704_v48  ;;  %v185_v24 = vld [vmem:[%s12402_s2] sm:$0xf]  ;;  %7541 = vmatprep.subr.bf16.mxu0 %v8710_v27 }
 0x278   : > { %8095 = vmatprep.subr.bf16.mxu1 %v8707_v28  ;;  %v8713_v36 = vld [vmem:[#allocation3 + $0x378] sm:$0xff]  }
 0x279   : > { %v2828_v4 = vadd.f32 %v2827_v10, %v2826_v58  ;;  %v2898_v55 = vrot.slane %v2897_v43, 1  ;;  %v2908_v58 = vsub.s32 0, %v10301_v41  ;;  %v8714_v10 = vld [vmem:[#allocation3 + $0x338] sm:$0xff]  }
 0x27a   : > { %7542 = vmatpush3.bf16.msra.mxu0 %v8711_v50 }
 0x27b   : > { %v2830_v45 = vmul.f32 0.00390625, %v2828_v4  ;;  %v2899_v16 = vadd.f32 %v2898_v55, %v2897_v43  ;;  %8096 = vmatpush3.bf16.msra.mxu1 %v8707_v28  ;;  %7543 = vmatprep.subr.bf16.mxu0 %v8713_v36  ;;  %v2949_v4 = vsub.s32 1, %v10301_v41 }
 0x27c   : > { %8129 = vmatprep.subr.bf16.mxu1 %v8712_v52 }
 0x27d   : > { %v2900_v42 = vmul.f32 0.00390625, %v2899_v16  ;;  %v2901_v51 = vmul.f32 %v2830_v45, %v2830_v45 }
 0x27e   : > { %7544 = vmatpush3.bf16.msra.mxu0 %v8714_v10  ;;  %v10757_v10 = vld [vmem:[#allocation2] sm:$0xf] }
 0x27f   : > { %v2902_v7 = vsub.f32 %v2900_v42, %v2901_v51 }
 0x281   : > { %v2903_v23 = vadd.f32 1e-05, %v2902_v7 }
 0x283   : > { %8780 = vrsqrt.f32 %v2903_v23 }
 0x28d   : > { %v8781_v31 = vpop.eup %8780 }
 0x28e   : > { %v2905_v57 = vmul.f32 %v8781_v31, %v185_v24 }
 0x290   : > { %v2909_v43 = vrot.slane %v2905_v57, %v2908_v58  ;;  %v2942_v5 = vmul.f32 %v2905_v57, %v2830_v45 }
 0x292   : > { %v2940_v55 = vmul.f32 %v10289_v61, %v2909_v43  ;;  %v2941_v59 = vmul.f32 %v10296_v53, %v2909_v43  ;;  %v2944_v0 = vrot.slane %v2942_v5, 7  ;;  %v2910_v16 = vmul.f32 %v10047_v62, %v2909_v43  ;;  %v12568_v61 = vld [vmem:[#allocation23_spill] sm:$0xff]  ;;  %v12569_v53 = vld [vmem:[#allocation24_spill] sm:$0xff] }
 0x293   : > { %v2911_v29 = vmul.f32 %v10050_v20, %v2909_v43  ;;  %v2912_v42 = vmul.f32 %v10053_v38, %v2909_v43  ;;  %v2913_v51 = vmul.f32 %v10056_v40, %v2909_v43  ;;  %v2914_v6 = vmul.f32 %v10061_v19, %v2909_v43 }
 0x294   : > { %v2946_v45 = vsub.f32 %v185_v24, %v2944_v0  ;;  %v2915_v3 = vmul.f32 %v10064_v9, %v2909_v43  ;;  %v2916_v7 = vmul.f32 %v10075_v8, %v2909_v43  ;;  %v2917_v17 = vmul.f32 %v12568_v61, %v2909_v43  ;;  %v3549_v0 = vld [vmem:[#allocation2 + $0xc8] sm:$0x1] }
 0x295   : > { %v2918_v62 = vmul.f32 %v12569_v53, %v2909_v43  ;;  %v2919_v20 = vmul.f32 %v12570_v1, %v2909_v43  ;;  %v2920_v38 = vmul.f32 %v10119_v60, %v2909_v43  ;;  %v2921_v40 = vmul.f32 %v10124_v26, %v2909_v43 }
 0x296   : > { %v10322_v19 = vrot.slane %v2946_v45, %v2949_v4  ;;  %v2922_v37 = vmul.f32 %v10142_v32, %v2909_v43  ;;  %v2923_v9 = vmul.f32 %v10149_v12, %v2909_v43  ;;  %v2924_v8 = vmul.f32 %v10167_v15, %v2909_v43 }
 0x297   : > { %v2925_v23 = vmul.f32 %v10172_v34, %v2909_v43  ;;  %v2926_v35 = vmul.f32 %v10182_v18, %v2909_v43  ;;  %v2927_v48 = vmul.f32 %v10188_v39, %v2909_v43  ;;  %v2928_v11 = vmul.f32 %v10198_v21, %v2909_v43 }
 0x298   : > { %v2981_v60 = vadd.f32 %v10322_v19, %v2940_v55  ;;  %v2982_v26 = vadd.f32 %v10322_v19, %v2941_v59  ;;  %v2929_v63 = vmul.f32 %v10205_v49, %v2909_v43  ;;  %v2930_v32 = vmul.f32 %v10215_v22, %v2909_v43 }
 0x299   : > { %v2931_v12 = vmul.f32 %v10220_v14, %v2909_v43  ;;  %v2932_v15 = vmul.f32 %v10230_v44, %v2909_v43  ;;  %v2933_v34 = vmul.f32 %v10236_v47, %v2909_v43  ;;  %v2934_v18 = vmul.f32 %v10246_v30, %v2909_v43 }
 0x29a   : > { %v3013_v33 = vmax.f32 %v2981_v60, 0.0  ;;  %v3014_v39 = vmax.f32 %v2982_v26, 0.0  ;;  %v2935_v21 = vmul.f32 %v10253_v54, %v2909_v43  ;;  %v2936_v28 = vmul.f32 %v10261_v13, %v2909_v43 }
 0x29b   : > { %v2937_v2 = vmul.f32 %v10268_v56, %v2909_v43  ;;  %v2938_v49 = vmul.f32 %v10275_v46, %v2909_v43  ;;  %v2939_v22 = vmul.f32 %v10282_v25, %v2909_v43  ;;  %v10345_v14 = vadd.f32 %v10322_v19, %v2910_v16 }
 0x29c   : > { %v10347_v44 = vpack.c.bf16 %v3013_v33, %v3013_v33  ;;  %v7119_v47 = vpack.c.bf16 %v3014_v39, %v3014_v39  ;;  %v10350_v30 = vadd.f32 %v10322_v19, %v2911_v29  ;;  %v10353_v27 = vadd.f32 %v10322_v19, %v2912_v42 }
 0x29d   : > { %v10356_v54 = vadd.f32 %v10322_v19, %v2913_v51  ;;  %v10359_v13 = vadd.f32 %v10322_v19, %v2914_v6  ;;  %v10362_v56 = vadd.f32 %v10322_v19, %v2915_v3  ;;  %v10365_v46 = vadd.f32 %v10322_v19, %v2916_v7 }
 0x29e   : > { %v3370_v25 = vshrl.u32 %v10347_v44, 16  ;;  %v3378_v52 = vshrl.u32 %v7119_v47, 16  ;;  %v3381_v24 = vshll.u32 %v7119_v47, 16  ;;  %v10370_v58 = vadd.f32 %v10322_v19, %v2917_v17 }
 0x29f   : > { %v10373_v36 = vadd.f32 %v10322_v19, %v2918_v62  ;;  %v10376_v31 = vadd.f32 %v10322_v19, %v2919_v20  ;;  %v10379_v57 = vadd.f32 %v10322_v19, %v2920_v38  ;;  %v10390_v4 = vadd.f32 %v10322_v19, %v2921_v40 }
 0x2a0   : > { %v10387_v43 = vrot.slane %v3370_v25, 7  ;;  %v3380_v5 = vrot.slane %v3378_v52, 7  ;;  %v10393_v55 = vadd.f32 %v10322_v19, %v2922_v37  ;;  %v10402_v16 = vadd.f32 %v10322_v19, %v2923_v9 }
 0x2a1   : > { %v10405_v29 = vadd.f32 %v10322_v19, %v2924_v8  ;;  %v10408_v42 = vadd.f32 %v10322_v19, %v2925_v23  ;;  %v10411_v51 = vadd.f32 %v10322_v19, %v2926_v35  ;;  %v10415_v7 = vadd.f32 %v10322_v19, %v2927_v48 }
 0x2a2   : > { %v3376_v6 = vrot.slane %v10387_v43, 4  ;;  %v3383_v45 = vor.u32 %v3381_v24, %v3380_v5  ;;  %v3385_v3 = vrot.slane %v3380_v5, 4  ;;  %v10418_v61 = vadd.f32 %v10322_v19, %v2928_v11 }
 0x2a3   : > { %v10421_v17 = vadd.f32 %v10322_v19, %v2929_v63  ;;  %v10424_v53 = vadd.f32 %v10322_v19, %v2930_v32  ;;  %v10427_v62 = vadd.f32 %v10322_v19, %v2931_v12  ;;  %v10434_v38 = vadd.f32 %v10322_v19, %v2932_v15 }
 0x2a4   : > { %v3384_v1 = vsel %vm10383_vm9, %v3376_v6, %v3383_v45  ;;  %v3550_v20 = vsel %vm10397_vm10, %v3385_v3, %v3549_v0  ;;  %v10437_v40 = vadd.f32 %v10322_v19, %v2933_v34  ;;  %v10440_v37 = vadd.f32 %v10322_v19, %v2934_v18 }
 0x2a5   : > { %3548 = vst [vmem:[#allocation2 + $0xc4] sm:$0xf] %v3384_v1  ;;  %3551 = vst [vmem:[#allocation2 + $0xc8] sm:$0x1] %v3550_v20  ;;  %v10443_v9 = vadd.f32 %v10322_v19, %v2935_v21  ;;  %v10446_v8 = vadd.f32 %v10322_v19, %v2936_v28  ;;  %v10449_v23 = vadd.f32 %v10322_v19, %v2937_v2  ;;  %v2983_v11 = vmax.f32 %v10345_v14, 0.0 }
 0x2a6   : > { %v10452_v35 = vadd.f32 %v10322_v19, %v2938_v49  ;;  %v10455_v48 = vadd.f32 %v10322_v19, %v2939_v22  ;;  %v2984_v60 = vmax.f32 %v10350_v30, 0.0  ;;  %v2985_v26 = vmax.f32 %v10353_v27, 0.0 }
 0x2a7   : > { %v2986_v63 = vmax.f32 %v10356_v54, 0.0  ;;  %v2987_v32 = vmax.f32 %v10359_v13, 0.0  ;;  %v2988_v12 = vmax.f32 %v10362_v56, 0.0  ;;  %v2989_v15 = vmax.f32 %v10365_v46, 0.0 }
 0x2a8   : > { %v2990_v34 = vmax.f32 %v10370_v58, 0.0  ;;  %v2991_v18 = vmax.f32 %v10373_v36, 0.0  ;;  %v2992_v19 = vmax.f32 %v10376_v31, 0.0  ;;  %v2993_v33 = vmax.f32 %v10379_v57, 0.0 }
 0x2a9   : > { %v2994_v39 = vmax.f32 %v10390_v4, 0.0  ;;  %v2995_v21 = vmax.f32 %v10393_v55, 0.0  ;;  %v2996_v28 = vmax.f32 %v10402_v16, 0.0  ;;  %v2997_v2 = vmax.f32 %v10405_v29, 0.0 }
 0x2aa   : > { %v2998_v49 = vmax.f32 %v10408_v42, 0.0  ;;  %v2999_v22 = vmax.f32 %v10411_v51, 0.0  ;;  %v3000_v14 = vmax.f32 %v10415_v7, 0.0  ;;  %v3001_v47 = vmax.f32 %v10418_v61, 0.0 }
 0x2ab   : > { %v3002_v30 = vmax.f32 %v10421_v17, 0.0  ;;  %v3003_v27 = vmax.f32 %v10424_v53, 0.0  ;;  %v3004_v54 = vmax.f32 %v10427_v62, 0.0  ;;  %v3005_v46 = vmax.f32 %v10434_v38, 0.0 }
 0x2ac   : > { %v3727_v56 = vld [vmem:[#allocation2 + $0xc4] sm:$0x8]  ;;  %v3006_v25 = vmax.f32 %v10437_v40, 0.0  ;;  %v7088_v52 = vpack.c.bf16 %v2983_v11, %v2983_v11  ;;  %v7089_v24 = vpack.c.bf16 %v2984_v60, %v2984_v60  ;;  %v3007_v36 = vmax.f32 %v10440_v37, 0.0  ;;  %v3850_v5 = vld [vmem:[#allocation2 + $0xc8] sm:$0x1] }
 0x2ad   : > { %v6937_v58 = vrot.slane %v3727_v56, 11  ;;  %v3008_v31 = vmax.f32 %v10443_v9, 0.0  ;;  %v3009_v57 = vmax.f32 %v10446_v8, 0.0  ;;  %v3010_v4 = vmax.f32 %v10449_v23, 0.0 }
 0x2ae   : > { %v3011_v55 = vmax.f32 %v10452_v35, 0.0  ;;  %v3012_v0 = vmax.f32 %v10455_v48, 0.0  ;;  %v7090_v16 = vpack.c.bf16 %v2985_v26, %v2985_v26  ;;  %v7091_v42 = vpack.c.bf16 %v2986_v63, %v2986_v63 }
 0x2af   : > { %v3851_v29 = vsel %vm10481_vm12, %v6937_v58, %v3850_v5  ;;  %v7092_v51 = vpack.c.bf16 %v2987_v32, %v2987_v32  ;;  %v7093_v6 = vpack.c.bf16 %v2988_v12, %v2988_v12  ;;  %v10495_v45 = vpack.c.bf16 %v2989_v15, %v2989_v15 }
 0x2b0   : > { %3852 = vst [vmem:[#allocation2 + $0xc8] sm:$0x1] %v3851_v29  ;;  %v10497_v3 = vpack.c.bf16 %v2990_v34, %v2990_v34  ;;  %v10499_v7 = vpack.c.bf16 %v2991_v18, %v2991_v18  ;;  %v10501_v61 = vpack.c.bf16 %v2992_v19, %v2992_v19  ;;  %v10503_v17 = vpack.c.bf16 %v2993_v33, %v2993_v33 }
 0x2b1   : > { %v10505_v53 = vpack.c.bf16 %v2994_v39, %v2994_v39  ;;  %v10507_v62 = vpack.c.bf16 %v2995_v21, %v2995_v21  ;;  %v10509_v1 = vpack.c.bf16 %v2996_v28, %v2996_v28  ;;  %v10511_v20 = vpack.c.bf16 %v2997_v2, %v2997_v2 }
 0x2b2   : > { %v10513_v38 = vpack.c.bf16 %v2998_v49, %v2998_v49  ;;  %v10515_v40 = vpack.c.bf16 %v2999_v22, %v2999_v22  ;;  %v10517_v37 = vpack.c.bf16 %v3000_v14, %v3000_v14  ;;  %v10519_v9 = vpack.c.bf16 %v3001_v47, %v3001_v47 }
 0x2b3   : > { %v10521_v8 = vpack.c.bf16 %v3002_v30, %v3002_v30  ;;  %v10523_v23 = vpack.c.bf16 %v3003_v27, %v3003_v27  ;;  %v10525_v35 = vpack.c.bf16 %v3004_v54, %v3004_v54  ;;  %v10527_v48 = vpack.c.bf16 %v3005_v46, %v3005_v46 }
 0x2b4   : > { %v10529_v11 = vpack.c.bf16 %v3006_v25, %v3006_v25  ;;  %v10531_v60 = vpack.c.bf16 %v3007_v36, %v3007_v36  ;;  %v10533_v26 = vpack.c.bf16 %v3008_v31, %v3008_v31  ;;  %v10535_v63 = vpack.c.bf16 %v3009_v57, %v3009_v57  ;;  %v3482_v57 = vld [vmem:[#allocation2 + $0x54] sm:$0xf] }
 0x2b5   : > { %v10537_v32 = vpack.c.bf16 %v3010_v4, %v3010_v4  ;;  %v10539_v12 = vpack.c.bf16 %v3011_v55, %v3011_v55  ;;  %v10541_v15 = vpack.c.bf16 %v3012_v0, %v3012_v0  ;;  %v3115_v34 = vshrl.u32 %v7088_v52, 16 }
 0x2b6   : > { %v3118_v18 = vshll.u32 %v7088_v52, 16  ;;  %v3123_v19 = vshrl.u32 %v7089_v24, 16  ;;  %v3126_v33 = vshll.u32 %v7089_v24, 16  ;;  %v3132_v39 = vshrl.u32 %v7090_v16, 16 }
 0x2b7   : > { %v3135_v21 = vshll.u32 %v7090_v16, 16  ;;  %v3140_v28 = vshrl.u32 %v7091_v42, 16  ;;  %v3143_v2 = vshll.u32 %v7091_v42, 16  ;;  %v3117_v49 = vrot.slane %v3115_v34, 7 }
 0x2b8   : > { %v10543_v22 = vrot.slane %v3123_v19, 7  ;;  %v3149_v14 = vshrl.u32 %v7092_v51, 16  ;;  %v3152_v47 = vshll.u32 %v7092_v51, 16  ;;  %v3134_v30 = vrot.slane %v3132_v39, 7  ;;  %v3479_v19 = vld [vmem:[#allocation2 + $0x50] sm:$0x1] }
 0x2b9   : > { %v10545_v27 = vrot.slane %v3140_v28, 7  ;;  %v3157_v54 = vshrl.u32 %v7093_v6, 16  ;;  %v3160_v56 = vshll.u32 %v7093_v6, 16  ;;  %v10547_v46 = vor.u32 %v3118_v18, %v3117_v49 }
 0x2ba   : > { %v3121_v25 = vrot.slane %v3117_v49, 4  ;;  %v3128_v52 = vor.u32 %v3126_v33, %v10543_v22  ;;  %v10551_v58 = vor.u32 %v3135_v21, %v3134_v30  ;;  %v3138_v36 = vrot.slane %v3134_v30, 4 }
 0x2bb   : > { %v3145_v31 = vor.u32 %v3143_v2, %v10545_v27  ;;  %v3151_v4 = vrot.slane %v3149_v14, 7  ;;  %v10557_v55 = vrot.slane %v3157_v54, 7  ;;  %v3166_v0 = vshrl.u32 %v10495_v45, 16  ;;  %v3475_v54 = vld [vmem:[#allocation2 + $0x48] sm:$0xf] }
 0x2bc   : > { %v3129_v5 = vsel %vm10383_vm9, %v3121_v25, %v3128_v52  ;;  %v3169_v29 = vshll.u32 %v10495_v45, 16  ;;  %v3174_v42 = vshrl.u32 %v10497_v3, 16  ;;  %v3177_v51 = vshll.u32 %v10497_v3, 16 }
 0x2bd   : > { %v3146_v16 = vsel %vm10383_vm9, %v3138_v36, %v3145_v31  ;;  %3441 = vst [vmem:[#allocation2 + $0x10] sm:$0xf] %v3129_v5  ;;  %v10565_v6 = vor.u32 %v3152_v47, %v3151_v4  ;;  %v3155_v34 = vrot.slane %v3151_v4, 4  ;;  %v3162_v18 = vor.u32 %v3160_v56, %v10557_v55 }
 0x2be   : > { %3450 = vst [vmem:[#allocation2 + $0x1c] sm:$0xf] %v3146_v16  ;;  %3555 = vst [vmem:[#allocation2 + $0x4] sm:$0xf] %v3146_v16  ;;  %v3168_v33 = vrot.slane %v3166_v0, 7  ;;  %v10569_v39 = vrot.slane %v3174_v42, 7 }
 0x2bf   : > { %v3183_v21 = vshrl.u32 %v10499_v7, 16  ;;  %v3186_v45 = vshll.u32 %v10499_v7, 16  ;;  %v3163_v3 = vsel %vm10383_vm9, %v3155_v34, %v3162_v18  ;;  %v3191_v28 = vshrl.u32 %v10501_v61, 16 }
 0x2c0   : > { %v3194_v2 = vshll.u32 %v10501_v61, 16  ;;  %v3200_v49 = vshrl.u32 %v10503_v17, 16  ;;  %v10578_v14 = vor.u32 %v3169_v29, %v3168_v33  ;;  %v3172_v47 = vrot.slane %v3168_v33, 4  ;;  %3457 = vst [vmem:[#allocation2 + $0x28] sm:$0xf] %v3163_v3 }
 0x2c1   : > { %v3179_v30 = vor.u32 %v3177_v51, %v10569_v39  ;;  %v3185_v56 = vrot.slane %v3183_v21, 7  ;;  %v10582_v25 = vrot.slane %v3191_v28, 7  ;;  %v3203_v52 = vshll.u32 %v10503_v17, 16 }
 0x2c2   : > { %v3202_v7 = vrot.slane %v3200_v49, 7  ;;  %v3208_v61 = vshrl.u32 %v10505_v53, 16  ;;  %v3211_v31 = vshll.u32 %v10505_v53, 16  ;;  %v3217_v5 = vshrl.u32 %v10507_v62, 16 }
 0x2c3   : > { %v3180_v36 = vsel %vm10383_vm9, %v3172_v47, %v3179_v30  ;;  %v10590_v4 = vor.u32 %v3186_v45, %v3185_v56  ;;  %v3189_v0 = vrot.slane %v3185_v56, 4  ;;  %v3196_v16 = vor.u32 %v3194_v2, %v10582_v25 }
 0x2c4   : > { %3464 = vst [vmem:[#allocation2 + $0x34] sm:$0xf] %v3180_v36  ;;  %v10594_v42 = vor.u32 %v3203_v52, %v3202_v7  ;;  %v3206_v17 = vrot.slane %v3202_v7, 4  ;;  %v10596_v51 = vrot.slane %v3208_v61, 7  ;;  %v3219_v34 = vrot.slane %v3217_v5, 7  ;;  %v8730_v36 = vld [vmem:[#allocation3 + $0x280] sm:$0xff]  }
 0x2c5   : > { %v3197_v18 = vsel %vm10383_vm9, %v3189_v0, %v3196_v16  ;;  %v3220_v53 = vshll.u32 %v10507_v62, 16  ;;  %v3225_v33 = vshrl.u32 %v10509_v1, 16  ;;  %v3228_v21 = vshll.u32 %v10509_v1, 16  ;;  %7665 = vmatprep.subr.bf16.mxu0 %v8730_v36 }
 0x2c6   : > { %v3213_v45 = vor.u32 %v3211_v31, %v10596_v51  ;;  %v3223_v28 = vrot.slane %v3219_v34, 4  ;;  %v3234_v2 = vshrl.u32 %v10511_v20, 16  ;;  %3471 = vst [vmem:[#allocation2 + $0x40] sm:$0xf] %v3197_v18  ;;  %v3237_v30 = vshll.u32 %v10511_v20, 16 }
 0x2c7   : > { %v10606_v49 = vor.u32 %v3220_v53, %v3219_v34  ;;  %v10608_v47 = vrot.slane %v3225_v33, 7  ;;  %v3242_v62 = vshrl.u32 %v10513_v38, 16  ;;  %v3245_v7 = vshll.u32 %v10513_v38, 16 }
 0x2c8   : > { %v3214_v56 = vsel %vm10383_vm9, %v3206_v17, %v3213_v45  ;;  %v3236_v1 = vrot.slane %v3234_v2, 7  ;;  %v3251_v52 = vshrl.u32 %v10515_v40, 16  ;;  %v3254_v0 = vshll.u32 %v10515_v40, 16 }
 0x2c9   : > { %v3230_v61 = vor.u32 %v3228_v21, %v10608_v47  ;;  %v10618_v5 = vrot.slane %v3242_v62, 7  ;;  %3478 = vst [vmem:[#allocation2 + $0x4c] sm:$0xf] %v3214_v56  ;;  %v3259_v17 = vshrl.u32 %v10517_v37, 16  ;;  %v3262_v33 = vshll.u32 %v10517_v37, 16 }
 0x2ca   : > { %v10621_v20 = vor.u32 %v3237_v30, %v3236_v1  ;;  %v3240_v16 = vrot.slane %v3236_v1, 4  ;;  %v3253_v34 = vrot.slane %v3251_v52, 7  ;;  %v3268_v2 = vshrl.u32 %v10519_v9, 16  ;;  %v3472_v37 = vld [vmem:[#allocation2 + $0x44] sm:$0x1] }
 0x2cb   : > { %v3231_v38 = vsel %vm10383_vm9, %v3223_v28, %v3230_v61  ;;  %v3247_v18 = vor.u32 %v3245_v7, %v10618_v5  ;;  %v10631_v45 = vrot.slane %v3259_v17, 7  ;;  %v3271_v62 = vshll.u32 %v10519_v9, 16 }
 0x2cc   : > { %v10629_v21 = vor.u32 %v3254_v0, %v3253_v34  ;;  %v3257_v40 = vrot.slane %v3253_v34, 4  ;;  %3485 = vst [vmem:[#allocation2 + $0x58] sm:$0xf] %v3231_v38  ;;  %v3276_v28 = vshrl.u32 %v10521_v8, 16  ;;  %v3279_v56 = vshll.u32 %v10521_v8, 16 }
 0x2cd   : > { %v3248_v30 = vsel %vm10383_vm9, %v3240_v16, %v3247_v18  ;;  %v3264_v1 = vor.u32 %v3262_v33, %v10631_v45  ;;  %v3270_v7 = vrot.slane %v3268_v2, 7  ;;  %v3285_v52 = vshrl.u32 %v10523_v23, 16 }
 0x2ce   : > { %3492 = vst [vmem:[#allocation2 + $0x64] sm:$0xf] %v3248_v30  ;;  %v10642_v36 = vrot.slane %v3276_v28, 7  ;;  %v3288_v61 = vshll.u32 %v10523_v23, 16  ;;  %v3293_v0 = vshrl.u32 %v10525_v35, 16  ;;  %v3296_v9 = vshll.u32 %v10525_v35, 16 }
 0x2cf   : > { %v3265_v8 = vsel %vm10383_vm9, %v3257_v40, %v3264_v1  ;;  %v10649_v16 = vor.u32 %v3271_v62, %v3270_v7  ;;  %v3274_v34 = vrot.slane %v3270_v7, 4  ;;  %v3287_v17 = vrot.slane %v3285_v52, 7 }
 0x2d0   : > { %v3281_v38 = vor.u32 %v3279_v56, %v10642_v36  ;;  %v10653_v33 = vrot.slane %v3293_v0, 7  ;;  %v3302_v2 = vshrl.u32 %v10527_v48, 16  ;;  %3499 = vst [vmem:[#allocation2 + $0x70] sm:$0xf] %v3265_v8  ;;  %v3305_v35 = vshll.u32 %v10527_v48, 16 }
 0x2d1   : > { %v10656_v23 = vor.u32 %v3288_v61, %v3287_v17  ;;  %v3291_v30 = vrot.slane %v3287_v17, 4  ;;  %v3310_v40 = vshrl.u32 %v10529_v11, 16  ;;  %v3313_v52 = vshll.u32 %v10529_v11, 16 }
 0x2d2   : > { %v3282_v62 = vsel %vm10383_vm9, %v3274_v34, %v3281_v38  ;;  %v3298_v28 = vor.u32 %v3296_v9, %v10653_v33  ;;  %v3304_v1 = vrot.slane %v3302_v2, 7  ;;  %v3319_v61 = vshrl.u32 %v10531_v60, 16 }
 0x2d3   : > { %v10664_v7 = vrot.slane %v3310_v40, 7  ;;  %v3322_v0 = vshll.u32 %v10531_v60, 16  ;;  %3506 = vst [vmem:[#allocation2 + $0x7c] sm:$0xf] %v3282_v62  ;;  %v3327_v9 = vshrl.u32 %v10533_v26, 16  ;;  %v3330_v11 = vshll.u32 %v10533_v26, 16 }
 0x2d4   : > { %v3299_v48 = vsel %vm10383_vm9, %v3291_v30, %v3298_v28  ;;  %v10671_v8 = vor.u32 %v3305_v35, %v3304_v1  ;;  %v3308_v34 = vrot.slane %v3304_v1, 4  ;;  %v3321_v2 = vrot.slane %v3319_v61, 7  ;;  %v3438_v35 = vld [vmem:[#allocation2 + $0xc] sm:$0xf]  ;;  %v3444_v28 = vld [vmem:[#allocation2 + $0x14] sm:$0x1] }
 0x2d5   : > { %v3315_v17 = vor.u32 %v3313_v52, %v10664_v7  ;;  %3513 = vst [vmem:[#allocation2 + $0x88] sm:$0xf] %v3299_v48  ;;  %v10677_v40 = vrot.slane %v3327_v9, 7  ;;  %v3336_v60 = vshrl.u32 %v10535_v63, 16  ;;  %v3339_v62 = vshll.u32 %v10535_v63, 16 }
 0x2d6   : > { %v3344_v30 = vshrl.u32 %v10537_v32, 16  ;;  %v10684_v52 = vor.u32 %v3322_v0, %v3321_v2  ;;  %v3325_v38 = vrot.slane %v3321_v2, 4  ;;  %v3347_v61 = vshll.u32 %v10537_v32, 16  ;;  %v3447_v26 = vld [vmem:[#allocation2 + $0x18] sm:$0xf] }
 0x2d7   : > { %v3316_v1 = vsel %vm10383_vm9, %v3308_v34, %v3315_v17  ;;  %v3332_v48 = vor.u32 %v3330_v11, %v10677_v40  ;;  %v3338_v56 = vrot.slane %v3336_v60, 7  ;;  %v3451_v0 = vld [vmem:[#allocation2 + $0x20] sm:$0x1]  ;;  %v3454_v34 = vld [vmem:[#allocation2 + $0x24] sm:$0xf]  ;;  %v3353_v32 = vshrl.u32 %v10539_v12, 16 }
 0x2d8   : > { %v10689_v18 = vrot.slane %v3344_v30, 7  ;;  %3520 = vst [vmem:[#allocation2 + $0x94] sm:$0xf] %v3316_v1  ;;  %v3458_v17 = vld [vmem:[#allocation2 + $0x2c] sm:$0x1]  ;;  %v3356_v11 = vshll.u32 %v10539_v12, 16 }
 0x2d9   : > { %v3461_v2 = vld [vmem:[#allocation2 + $0x30] sm:$0xf]  ;;  %v3361_v9 = vshrl.u32 %v10541_v15, 16  ;;  %v3364_v60 = vshll.u32 %v10541_v15, 16  ;;  %v3465_v30 = vld [vmem:[#allocation2 + $0x38] sm:$0x1]  ;;  %v3333_v53 = vsel %vm10383_vm9, %v3325_v38, %v3332_v48  ;;  %v10703_v31 = vor.u32 %v3339_v62, %v3338_v56 }
 0x2da   : > { %v3468_v1 = vld [vmem:[#allocation2 + $0x3c] sm:$0xf]  ;;  %v3342_v3 = vrot.slane %v3338_v56, 4  ;;  %v3349_v29 = vor.u32 %v3347_v61, %v10689_v18  ;;  %v3355_v24 = vrot.slane %v3353_v32, 7  ;;  %v12579_v15 = vshll.u32 %v10347_v44, 16 }
 0x2db   : > { %v10707_v50 = vrot.slane %v3361_v9, 7  ;;  %3527 = vst [vmem:[#allocation2 + $0xa0] sm:$0xf] %v3333_v53  ;;  %v3486_v38 = vld [vmem:[#allocation2 + $0x5c] sm:$0x1]  ;;  %v3439_v61 = vsel %vm10693_vm14, %v10547_v46, %v3438_v35  ;;  %v12580_v32 = vrot.slane %v10543_v22, 4  ;;  %v3448_v44 = vsel %vm10693_vm14, %v10551_v58, %v3447_v26 }
 0x2dc   : > { %v10712_v41 = vor.u32 %v12579_v15, %v10387_v43  ;;  %v3489_v62 = vld [vmem:[#allocation2 + $0x60] sm:$0xf]  ;;  %v3493_v48 = vld [vmem:[#allocation2 + $0x68] sm:$0x1]  ;;  %v3350_v56 = vsel %vm10383_vm9, %v3342_v3, %v3349_v29  ;;  %v3496_v43 = vld [vmem:[#allocation2 + $0x6c] sm:$0xf]  ;;  %v10726_v15 = vor.u32 %v3356_v11, %v3355_v24 }
 0x2dd   : > { %v3445_v9 = vsel %vm10397_vm10, %v12580_v32, %v3444_v28  ;;  %v3500_v53 = vld [vmem:[#allocation2 + $0x74] sm:$0x1]  ;;  %v3359_v12 = vrot.slane %v3355_v24, 4  ;;  %v3366_v29 = vor.u32 %v3364_v60, %v10707_v50  ;;  %v3368_v3 = vrot.slane %v10707_v50, 4  ;;  %3440 = vst [vmem:[#allocation2 + $0xc] sm:$0xf] %v3439_v61 }
 0x2de   : > { %3446 = vst [vmem:[#allocation2 + $0x14] sm:$0x1] %v3445_v9  ;;  %3449 = vst [vmem:[#allocation2 + $0x18] sm:$0xf] %v3448_v44  ;;  %v3503_v22 = vld [vmem:[#allocation2 + $0x78] sm:$0xf]  ;;  %v3455_v24 = vsel %vm10693_vm14, %v10565_v6, %v3454_v34 }
 0x2df   : > { %3534 = vst [vmem:[#allocation2 + $0xac] sm:$0xf] %v3350_v56  ;;  %v3507_v46 = vld [vmem:[#allocation2 + $0x80] sm:$0x1]  ;;  %v3510_v35 = vld [vmem:[#allocation2 + $0x84] sm:$0xf]  ;;  %v3462_v56 = vsel %vm10693_vm14, %v10578_v14, %v3461_v2  ;;  %v3367_v44 = vsel %vm10383_vm9, %v3359_v12, %v3366_v29 }
 0x2e0   : > { %v12581_v28 = vrot.slane %v10545_v27, 4  ;;  %v12582_v11 = vrot.slane %v10557_v55, 4  ;;  %v3514_v61 = vld [vmem:[#allocation2 + $0x8c] sm:$0x1]  ;;  %v3517_v32 = vld [vmem:[#allocation2 + $0x90] sm:$0xf] }
 0x2e1   : > { %v3521_v9 = vld [vmem:[#allocation2 + $0x98] sm:$0x1]  ;;  %3456 = vst [vmem:[#allocation2 + $0x24] sm:$0xf] %v3455_v24  ;;  %3463 = vst [vmem:[#allocation2 + $0x30] sm:$0xf] %v3462_v56 }
 0x2e2   : > { %v3452_v26 = vsel %vm10397_vm10, %v12581_v28, %v3451_v0  ;;  %v3459_v60 = vsel %vm10397_vm10, %v12582_v11, %v3458_v17  ;;  %v12583_v6 = vrot.slane %v10569_v39, 4  ;;  %v3469_v0 = vsel %vm10693_vm14, %v10590_v4, %v3468_v1  ;;  %v3524_v17 = vld [vmem:[#allocation2 + $0x9c] sm:$0xf]  ;;  %v3528_v2 = vld [vmem:[#allocation2 + $0xa4] sm:$0x1] }
 0x2e3   : > { %3453 = vst [vmem:[#allocation2 + $0x20] sm:$0x1] %v3452_v26  ;;  %3460 = vst [vmem:[#allocation2 + $0x2c] sm:$0x1] %v3459_v60  ;;  %v12584_v14 = vrot.slane %v10582_v25, 4  ;;  %v3476_v39 = vsel %vm10693_vm14, %v10594_v42, %v3475_v54  ;;  %v3483_v4 = vsel %vm10693_vm14, %v10606_v49, %v3482_v57  ;;  %v12587_v57 = vrot.slane %v10618_v5, 4 }
 0x2e4   : > { %v3466_v55 = vsel %vm10397_vm10, %v12583_v6, %v3465_v30  ;;  %v3531_v12 = vld [vmem:[#allocation2 + $0xa8] sm:$0xf]  ;;  %3470 = vst [vmem:[#allocation2 + $0x3c] sm:$0xf] %v3469_v0  ;;  %v12585_v30 = vrot.slane %v10596_v51, 4  ;;  %v3497_v42 = vsel %vm10693_vm14, %v10629_v21, %v3496_v43  ;;  %v12588_v51 = vrot.slane %v10631_v45, 4 }
 0x2e5   : > { %v3473_v34 = vsel %vm10397_vm10, %v12584_v14, %v3472_v37  ;;  %3467 = vst [vmem:[#allocation2 + $0x38] sm:$0x1] %v3466_v55  ;;  %v12586_v37 = vrot.slane %v10608_v47, 4  ;;  %3541 = vst [vmem:[#allocation2 + $0xb8] sm:$0xf] %v3367_v44  ;;  %v3494_v54 = vsel %vm10397_vm10, %v12587_v57, %v3493_v48  ;;  %v3504_v5 = vsel %vm10693_vm14, %v10649_v16, %v3503_v22 }
 0x2e6   : > { %3474 = vst [vmem:[#allocation2 + $0x44] sm:$0x1] %v3473_v34  ;;  %v3480_v25 = vsel %vm10397_vm10, %v12585_v30, %v3479_v19  ;;  %3563 = vst [vmem:[#allocation2 + $0xd0] sm:$0xf] %v3367_v44  ;;  %v3535_v29 = vld [vmem:[#allocation2 + $0xb0] sm:$0x1]  ;;  %v3490_v19 = vsel %vm10693_vm14, %v10621_v20, %v3489_v62  ;;  %v3501_v49 = vsel %vm10397_vm10, %v12588_v51, %v3500_v53 }
 0x2e7   : > { %v3487_v1 = vsel %vm10397_vm10, %v12586_v37, %v3486_v38  ;;  %v3538_v28 = vld [vmem:[#allocation2 + $0xb4] sm:$0xf]  ;;  %v3542_v26 = vld [vmem:[#allocation2 + $0xbc] sm:$0x1]  ;;  %3477 = vst [vmem:[#allocation2 + $0x48] sm:$0xf] %v3476_v39  ;;  %v3511_v45 = vsel %vm10693_vm14, %v10656_v23, %v3510_v35 }
 0x2e8   : > { %3481 = vst [vmem:[#allocation2 + $0x50] sm:$0x1] %v3480_v25  ;;  %3484 = vst [vmem:[#allocation2 + $0x54] sm:$0xf] %v3483_v4  ;;  %v3556_v47 = vld [vmem:[#allocation2 + $0x8] sm:$0x1] }
 0x2e9   : > { %3488 = vst [vmem:[#allocation2 + $0x5c] sm:$0x1] %v3487_v1  ;;  %v3560_v38 = vld [vmem:[#allocation2 + $0xcc] sm:$0xf]  ;;  %v3545_v24 = vld [vmem:[#allocation2 + $0xc0] sm:$0xf] }
 0x2ea   : > { %3491 = vst [vmem:[#allocation2 + $0x60] sm:$0xf] %v3490_v19  ;;  %3495 = vst [vmem:[#allocation2 + $0x68] sm:$0x1] %v3494_v54  ;;  %v12589_v20 = vrot.slane %v10642_v36, 4  ;;  %v12590_v62 = vrot.slane %v10653_v33, 4  ;;  %v3518_v36 = vsel %vm10693_vm14, %v10671_v8, %v3517_v32  ;;  %v3525_v33 = vsel %vm10693_vm14, %v10684_v52, %v3524_v17 }
 0x2eb   : > { %3498 = vst [vmem:[#allocation2 + $0x6c] sm:$0xf] %v3497_v42  ;;  %3502 = vst [vmem:[#allocation2 + $0x74] sm:$0x1] %v3501_v49  ;;  %v3564_v43 = vld [vmem:[#allocation2 + $0xd4] sm:$0x1]  ;;  %v3543_v52 = vsel %vm10397_vm10, %v3368_v3, %v3542_v26 }
 0x2ec   : > { %v3508_v21 = vsel %vm10397_vm10, %v12589_v20, %v3507_v46  ;;  %v3515_v48 = vsel %vm10397_vm10, %v12590_v62, %v3514_v61  ;;  %3505 = vst [vmem:[#allocation2 + $0x78] sm:$0xf] %v3504_v5  ;;  %3512 = vst [vmem:[#allocation2 + $0x84] sm:$0xf] %v3511_v45  ;;  %v12591_v16 = vrot.slane %v10664_v7, 4  ;;  %v12592_v23 = vrot.slane %v10677_v40, 4 }
 0x2ed   : > { %3509 = vst [vmem:[#allocation2 + $0x80] sm:$0x1] %v3508_v21  ;;  %3516 = vst [vmem:[#allocation2 + $0x8c] sm:$0x1] %v3515_v48  ;;  %v3532_v7 = vsel %vm10693_vm14, %v10703_v31, %v3531_v12  ;;  %v12593_v8 = vrot.slane %v10689_v18, 4  ;;  %v3539_v40 = vsel %vm10693_vm14, %v10726_v15, %v3538_v28  ;;  %v3546_v31 = vsel %vm10693_vm14, %v10712_v41, %v3545_v24 }
 0x2ee   : > { %v3522_v53 = vsel %vm10397_vm10, %v12591_v16, %v3521_v9  ;;  %v3529_v22 = vsel %vm10397_vm10, %v12592_v23, %v3528_v2  ;;  %3519 = vst [vmem:[#allocation2 + $0x90] sm:$0xf] %v3518_v36  ;;  %3526 = vst [vmem:[#allocation2 + $0x9c] sm:$0xf] %v3525_v33  ;;  %v3568_v35 = vld [vmem:[#allocation2 + $0xc] sm:$0x2]  ;;  %v3553_v18 = vsel %vm10693_vm14, %v10551_v58, %v10757_v10 }
 0x2ef   : > { %3523 = vst [vmem:[#allocation2 + $0x98] sm:$0x1] %v3522_v53  ;;  %3530 = vst [vmem:[#allocation2 + $0xa4] sm:$0x1] %v3529_v22  ;;  %v3536_v46 = vsel %vm10397_vm10, %v12593_v8, %v3535_v29  ;;  %v3569_v11 = vld [vmem:[#allocation2 + $0x18] sm:$0x2]  ;;  %v3561_v61 = vsel %vm10693_vm14, %v10726_v15, %v3560_v38  ;;  %v3565_v41 = vsel %vm10397_vm10, %v3368_v3, %v3564_v43 }
 0x2f0   : > { %3533 = vst [vmem:[#allocation2 + $0xa8] sm:$0xf] %v3532_v7  ;;  %3537 = vst [vmem:[#allocation2 + $0xb0] sm:$0x1] %v3536_v46  ;;  %v12594_v60 = vrot.slane %v10545_v27, 4  ;;  %v6904_v6 = vrot.slane %v3568_v35, 9 }
 0x2f1   : > { %3540 = vst [vmem:[#allocation2 + $0xb4] sm:$0xf] %v3539_v40  ;;  %3544 = vst [vmem:[#allocation2 + $0xbc] sm:$0x1] %v3543_v52  ;;  %v3660_v32 = vld [vmem:[#allocation2 + $0xc] sm:$0x1] }
 0x2f2   : > { %v3557_v56 = vsel %vm10397_vm10, %v12594_v60, %v3556_v47  ;;  %v3663_v9 = vld [vmem:[#allocation2 + $0x18] sm:$0x1]  ;;  %v10843_v44 = vld [vmem:[#allocation2 + $0x4] sm:$0x8]  ;;  %3547 = vst [vmem:[#allocation2 + $0xc0] sm:$0xf] %v3546_v31  ;;  %v3661_v2 = vsel %vm10397_vm10, %v6904_v6, %v3660_v32 }
 0x2f3   : > { %3554 = vst [vmem:[#allocation2] sm:$0xf] %v3553_v18  ;;  %3558 = vst [vmem:[#allocation2 + $0x8] sm:$0x1] %v3557_v56  ;;  %v3570_v27 = vld [vmem:[#allocation2 + $0x24] sm:$0x2] }
 0x2f4   : > { %3562 = vst [vmem:[#allocation2 + $0xcc] sm:$0xf] %v3561_v61  ;;  %v3571_v58 = vld [vmem:[#allocation2 + $0x30] sm:$0x2]  ;;  %v6905_v55 = vrot.slane %v3569_v11, 9  ;;  %v6906_v15 = vrot.slane %v3570_v27, 9 }
 0x2f5   : > { %3566 = vst [vmem:[#allocation2 + $0xd4] sm:$0x1] %v3565_v41  ;;  %v3572_v63 = vld [vmem:[#allocation2 + $0x3c] sm:$0x2]  ;;  %v6907_v0 = vrot.slane %v3571_v58, 9  ;;  %v6921_v3 = vrot.slane %v10843_v44, 11 }
 0x2f6   : > { %v3666_v14 = vld [vmem:[#allocation2 + $0x24] sm:$0x1]  ;;  %v3573_v34 = vld [vmem:[#allocation2 + $0x48] sm:$0x2]  ;;  %v3574_v10 = vld [vmem:[#allocation2 + $0x54] sm:$0x2]  ;;  %v3664_v50 = vsel %vm10397_vm10, %v6905_v55, %v3663_v9 }
 0x2f7   : > { %v6908_v17 = vrot.slane %v3572_v63, 9  ;;  %v3575_v12 = vld [vmem:[#allocation2 + $0x60] sm:$0x2]  ;;  %v10854_v39 = vld [vmem:[#allocation2 + $0x6c] sm:$0x2]  ;;  %v6909_v30 = vrot.slane %v3573_v34, 9  ;;  %v3667_v4 = vsel %vm10397_vm10, %v6906_v15, %v3666_v14 }
 0x2f8   : > { %v6910_v25 = vrot.slane %v3574_v10, 9  ;;  %3662 = vst [vmem:[#allocation2 + $0xc] sm:$0x1] %v3661_v2  ;;  %3665 = vst [vmem:[#allocation2 + $0x18] sm:$0x1] %v3664_v50  ;;  %v6911_v29 = vrot.slane %v3575_v12, 9 }
 0x2f9   : > { %v3577_v37 = vld [vmem:[#allocation2 + $0x78] sm:$0x2]  ;;  %v3578_v1 = vld [vmem:[#allocation2 + $0x84] sm:$0x2]  ;;  %v6912_v28 = vrot.slane %v10854_v39, 9 }
 0x2fa   : > { %3668 = vst [vmem:[#allocation2 + $0x24] sm:$0x1] %v3667_v4  ;;  %v3712_v26 = vld [vmem:[#allocation2 + $0x10] sm:$0x8]  ;;  %v10859_v19 = vld [vmem:[#allocation2 + $0x90] sm:$0x2] }
 0x2fb   : > { %v10861_v57 = vld [vmem:[#allocation2 + $0x9c] sm:$0x2]  ;;  %v6913_v54 = vrot.slane %v3577_v37, 9  ;;  %v6914_v42 = vrot.slane %v3578_v1, 9  ;;  %v10863_v51 = vld [vmem:[#allocation2 + $0xa8] sm:$0x2] }
 0x2fc   : > { %v10865_v49 = vld [vmem:[#allocation2 + $0xb4] sm:$0x2]  ;;  %v6915_v47 = vrot.slane %v10859_v19, 9  ;;  %v6916_v38 = vrot.slane %v10861_v57, 9  ;;  %v3567_v24 = vld [vmem:[#allocation2] sm:$0x2] }
 0x2fd   : > { %v10869_v5 = vld [vmem:[#allocation2 + $0xc0] sm:$0x2]  ;;  %v10871_v20 = vld [vmem:[#allocation2 + $0xcc] sm:$0x2]  ;;  %v6903_v21 = vrot.slane %v3567_v24, 9  ;;  %v6917_v45 = vrot.slane %v10863_v51, 9 }
 0x2fe   : > { %v6918_v62 = vrot.slane %v10865_v49, 9  ;;  %v6919_v48 = vrot.slane %v10869_v5, 9  ;;  %v3657_v43 = vld [vmem:[#allocation2] sm:$0x1]  ;;  %v3805_v36 = vld [vmem:[#allocation2 + $0x14] sm:$0x1] }
 0x2ff   : > { %v6920_v16 = vrot.slane %v10871_v20, 9  ;;  %v3669_v53 = vld [vmem:[#allocation2 + $0x30] sm:$0x1]  ;;  %v3672_v33 = vld [vmem:[#allocation2 + $0x3c] sm:$0x1]  ;;  %v6922_v22 = vrot.slane %v3712_v26, 11  ;;  %v3658_v7 = vsel %vm10397_vm10, %v6903_v21, %v3657_v43 }
 0x300   : > { %v10877_v23 = vld [vmem:[#allocation2 + $0x1c] sm:$0x8]  ;;  %v3670_v8 = vsel %vm10397_vm10, %v6907_v0, %v3669_v53  ;;  %v3673_v46 = vsel %vm10397_vm10, %v6908_v17, %v3672_v33  ;;  %v3675_v40 = vld [vmem:[#allocation2 + $0x48] sm:$0x1]  ;;  %v3678_v52 = vld [vmem:[#allocation2 + $0x54] sm:$0x1] }
 0x301   : > { %v3681_v35 = vld [vmem:[#allocation2 + $0x60] sm:$0x1]  ;;  %v10885_v11 = vld [vmem:[#allocation2 + $0x28] sm:$0x8]  ;;  %v10887_v31 = vld [vmem:[#allocation2 + $0x34] sm:$0x8]  ;;  %v3676_v56 = vsel %vm10397_vm10, %v6909_v30, %v3675_v40  ;;  %v3679_v61 = vsel %vm10397_vm10, %v6910_v25, %v3678_v52  ;;  %v3806_v15 = vsel %vm10481_vm12, %v6922_v22, %v3805_v36 }
 0x302   : > { %v10889_v18 = vld [vmem:[#allocation2 + $0x40] sm:$0x8]  ;;  %v10891_v60 = vld [vmem:[#allocation2 + $0x4c] sm:$0x8]  ;;  %3659 = vst [vmem:[#allocation2] sm:$0x1] %v3658_v7  ;;  %v3682_v32 = vsel %vm10397_vm10, %v6911_v29, %v3681_v35 }
 0x303   : > { %3671 = vst [vmem:[#allocation2 + $0x30] sm:$0x1] %v3670_v8  ;;  %3674 = vst [vmem:[#allocation2 + $0x3c] sm:$0x1] %v3673_v46  ;;  %v3684_v9 = vld [vmem:[#allocation2 + $0x6c] sm:$0x1] }
 0x304   : > { %v3687_v41 = vld [vmem:[#allocation2 + $0x78] sm:$0x1]  ;;  %v3690_v27 = vld [vmem:[#allocation2 + $0x84] sm:$0x1]  ;;  %v10899_v58 = vld [vmem:[#allocation2 + $0x58] sm:$0x8]  ;;  %v3685_v0 = vsel %vm10397_vm10, %v6912_v28, %v3684_v9 }
 0x305   : > { %v10901_v6 = vld [vmem:[#allocation2 + $0x64] sm:$0x8]  ;;  %v10903_v55 = vld [vmem:[#allocation2 + $0x70] sm:$0x8]  ;;  %v10905_v63 = vld [vmem:[#allocation2 + $0x7c] sm:$0x8]  ;;  %v3688_v14 = vsel %vm10397_vm10, %v6913_v54, %v3687_v41  ;;  %v3691_v34 = vsel %vm10397_vm10, %v6914_v42, %v3690_v27 }
 0x306   : > { %3677 = vst [vmem:[#allocation2 + $0x48] sm:$0x1] %v3676_v56  ;;  %3680 = vst [vmem:[#allocation2 + $0x54] sm:$0x1] %v3679_v61  ;;  %v3693_v10 = vld [vmem:[#allocation2 + $0x90] sm:$0x1] }
 0x307   : > { %3683 = vst [vmem:[#allocation2 + $0x60] sm:$0x1] %v3682_v32  ;;  %v3696_v17 = vld [vmem:[#allocation2 + $0x9c] sm:$0x1]  ;;  %v3699_v2 = vld [vmem:[#allocation2 + $0xa8] sm:$0x1]  ;;  %v3694_v25 = vsel %vm10397_vm10, %v6915_v47, %v3693_v10 }
 0x308   : > { %v10915_v50 = vld [vmem:[#allocation2 + $0x88] sm:$0x8]  ;;  %v10917_v12 = vld [vmem:[#allocation2 + $0x94] sm:$0x8]  ;;  %v10919_v39 = vld [vmem:[#allocation2 + $0xa0] sm:$0x8]  ;;  %v3697_v4 = vsel %vm10397_vm10, %v6916_v38, %v3696_v17  ;;  %v3700_v37 = vsel %vm10397_vm10, %v6917_v45, %v3699_v2 }
 0x309   : > { %v10921_v30 = vld [vmem:[#allocation2 + $0xac] sm:$0x8]  ;;  %3807 = vst [vmem:[#allocation2 + $0x14] sm:$0x1] %v3806_v15  ;;  %3686 = vst [vmem:[#allocation2 + $0x6c] sm:$0x1] %v3685_v0 }
 0x30a   : > { %3689 = vst [vmem:[#allocation2 + $0x78] sm:$0x1] %v3688_v14  ;;  %3692 = vst [vmem:[#allocation2 + $0x84] sm:$0x1] %v3691_v34  ;;  %v3702_v1 = vld [vmem:[#allocation2 + $0xb4] sm:$0x1] }
 0x30b   : > { %v3705_v29 = vld [vmem:[#allocation2 + $0xc0] sm:$0x1]  ;;  %v3708_v28 = vld [vmem:[#allocation2 + $0xcc] sm:$0x1]  ;;  %3695 = vst [vmem:[#allocation2 + $0x90] sm:$0x1] %v3694_v25  ;;  %v3703_v26 = vsel %vm10397_vm10, %v6918_v62, %v3702_v1 }
 0x30c   : > { %3698 = vst [vmem:[#allocation2 + $0x9c] sm:$0x1] %v3697_v4  ;;  %3701 = vst [vmem:[#allocation2 + $0xa8] sm:$0x1] %v3700_v37  ;;  %v3706_v19 = vsel %vm10397_vm10, %v6919_v48, %v3705_v29  ;;  %v3709_v57 = vsel %vm10397_vm10, %v6920_v16, %v3708_v28  ;;  %v10935_v54 = vld [vmem:[#allocation2 + $0xb8] sm:$0x8] }
 0x30d   : > { %v10937_v42 = vld [vmem:[#allocation2 + $0xd0] sm:$0x8]  ;;  %v6923_v51 = vrot.slane %v10877_v23, 11  ;;  %3704 = vst [vmem:[#allocation2 + $0xb4] sm:$0x1] %v3703_v26  ;;  %v6924_v49 = vrot.slane %v10885_v11, 11 }
 0x30e   : > { %3707 = vst [vmem:[#allocation2 + $0xc0] sm:$0x1] %v3706_v19  ;;  %3710 = vst [vmem:[#allocation2 + $0xcc] sm:$0x1] %v3709_v57  ;;  %v6925_v47 = vrot.slane %v10887_v31, 11  ;;  %v6926_v38 = vrot.slane %v10889_v18, 11 }
 0x30f   : > { %v6927_v24 = vrot.slane %v10891_v60, 11  ;;  %v3802_v5 = vld [vmem:[#allocation2 + $0x8] sm:$0x1]  ;;  %v6928_v59 = vrot.slane %v10899_v58, 11  ;;  %v6929_v20 = vrot.slane %v10901_v6, 11  ;;  %v6930_v21 = vrot.slane %v10903_v55, 11 }
 0x310   : > { %v6931_v45 = vrot.slane %v10905_v63, 11  ;;  %v3808_v62 = vld [vmem:[#allocation2 + $0x20] sm:$0x1]  ;;  %v6932_v48 = vrot.slane %v10915_v50, 11  ;;  %v6933_v43 = vrot.slane %v10917_v12, 11  ;;  %v6934_v36 = vrot.slane %v10919_v39, 11 }
 0x311   : > { %v6935_v16 = vrot.slane %v10921_v30, 11  ;;  %v3811_v53 = vld [vmem:[#allocation2 + $0x2c] sm:$0x1]  ;;  %v6936_v33 = vrot.slane %v10935_v54, 11  ;;  %v6938_v23 = vrot.slane %v10937_v42, 11  ;;  %v3803_v22 = vsel %vm10481_vm12, %v6921_v3, %v3802_v5 }
 0x312   : > { %v3809_v7 = vsel %vm10481_vm12, %v6923_v51, %v3808_v62  ;;  %v3814_v8 = vld [vmem:[#allocation2 + $0x38] sm:$0x1]  ;;  %v3817_v46 = vld [vmem:[#allocation2 + $0x44] sm:$0x1]  ;;  %v10960_v40 = vld [vmem:[#allocation2 + $0x10] sm:$0xf]  ;;  %v3812_v52 = vsel %vm10481_vm12, %v6924_v49, %v3811_v53 }
 0x313   : > { %3804 = vst [vmem:[#allocation2 + $0x8] sm:$0x1] %v3803_v22  ;;  %3810 = vst [vmem:[#allocation2 + $0x20] sm:$0x1] %v3809_v7  ;;  %v3815_v35 = vsel %vm10481_vm12, %v6925_v47, %v3814_v8  ;;  %v3818_v44 = vsel %vm10481_vm12, %v6926_v38, %v3817_v46  ;;  %v3820_v11 = vld [vmem:[#allocation2 + $0x50] sm:$0x1] }
 0x314   : > { %v3823_v3 = vld [vmem:[#allocation2 + $0x5c] sm:$0x1]  ;;  %v3826_v31 = vld [vmem:[#allocation2 + $0x68] sm:$0x1]  ;;  %3813 = vst [vmem:[#allocation2 + $0x2c] sm:$0x1] %v3812_v52  ;;  %v3821_v56 = vsel %vm10481_vm12, %v6927_v24, %v3820_v11 }
 0x315   : > { %v10968_v18 = vld [vmem:[#allocation2 + $0x1c] sm:$0xf]  ;;  %v10970_v60 = vld [vmem:[#allocation2 + $0x28] sm:$0xf]  ;;  %3816 = vst [vmem:[#allocation2 + $0x38] sm:$0x1] %v3815_v35  ;;  %v3824_v61 = vsel %vm10481_vm12, %v6928_v59, %v3823_v3  ;;  %v3827_v32 = vsel %vm10481_vm12, %v6929_v20, %v3826_v31 }
 0x316   : > { %3819 = vst [vmem:[#allocation2 + $0x44] sm:$0x1] %v3818_v44  ;;  %v3829_v9 = vld [vmem:[#allocation2 + $0x74] sm:$0x1]  ;;  %v3832_v41 = vld [vmem:[#allocation2 + $0x80] sm:$0x1] }
 0x317   : > { %v3835_v27 = vld [vmem:[#allocation2 + $0x8c] sm:$0x1]  ;;  %3822 = vst [vmem:[#allocation2 + $0x50] sm:$0x1] %v3821_v56  ;;  %3825 = vst [vmem:[#allocation2 + $0x5c] sm:$0x1] %v3824_v61  ;;  %v3830_v58 = vsel %vm10481_vm12, %v6930_v21, %v3829_v9  ;;  %v3833_v6 = vsel %vm10481_vm12, %v6931_v45, %v3832_v41 }
 0x318   : > { %3828 = vst [vmem:[#allocation2 + $0x68] sm:$0x1] %v3827_v32  ;;  %v3836_v55 = vsel %vm10481_vm12, %v6932_v48, %v3835_v27  ;;  %v3838_v63 = vld [vmem:[#allocation2 + $0x98] sm:$0x1]  ;;  %v3841_v15 = vld [vmem:[#allocation2 + $0xa4] sm:$0x1] }
 0x319   : > { %v3844_v0 = vld [vmem:[#allocation2 + $0xb0] sm:$0x1]  ;;  %3831 = vst [vmem:[#allocation2 + $0x74] sm:$0x1] %v3830_v58  ;;  %3834 = vst [vmem:[#allocation2 + $0x80] sm:$0x1] %v3833_v6  ;;  %v3839_v14 = vsel %vm10481_vm12, %v6933_v43, %v3838_v63  ;;  %v3842_v34 = vsel %vm10481_vm12, %v6934_v36, %v3841_v15 }
 0x31a   : > { %3837 = vst [vmem:[#allocation2 + $0x8c] sm:$0x1] %v3836_v55  ;;  %v3845_v10 = vsel %vm10481_vm12, %v6935_v16, %v3844_v0  ;;  %v3847_v17 = vld [vmem:[#allocation2 + $0xbc] sm:$0x1]  ;;  %v3853_v2 = vld [vmem:[#allocation2 + $0xd4] sm:$0x1] }
 0x31b   : > { %v10990_v50 = vld [vmem:[#allocation2 + $0xc] sm:$0xf]  ;;  %3840 = vst [vmem:[#allocation2 + $0x98] sm:$0x1] %v3839_v14  ;;  %3843 = vst [vmem:[#allocation2 + $0xa4] sm:$0x1] %v3842_v34  ;;  %v3848_v12 = vsel %vm10481_vm12, %v6936_v33, %v3847_v17  ;;  %v3854_v39 = vsel %vm10481_vm12, %v6938_v23, %v3853_v2 }
 0x31c   : > { %3846 = vst [vmem:[#allocation2 + $0xb0] sm:$0x1] %v3845_v10  ;;  %v3861_v30 = vld [vmem:[#allocation2 + $0x14] sm:$0x1]  ;;  %v6940_v25 = vrot.slane %v10990_v50, 9  ;;  %v4351_v4 = vrot.slane %v10960_v40, 5 }
 0x31d   : > { %v10998_v37 = vld [vmem:[#allocation2 + $0x18] sm:$0xf]  ;;  %3849 = vst [vmem:[#allocation2 + $0xbc] sm:$0x1] %v3848_v12  ;;  %3855 = vst [vmem:[#allocation2 + $0xd4] sm:$0x1] %v3854_v39 }
 0x31e   : > { %v4354_v1 = vrot.slane %v3861_v30, 5  ;;  %v6941_v29 = vrot.slane %v10998_v37, 9  ;;  %v4358_v28 = vrot.slane %v10968_v18, 5  ;;  %v11002_v26 = vld [vmem:[#allocation2 + $0x24] sm:$0xf]  ;;  %v4365_v19 = vrot.slane %v10970_v60, 5 }
 0x31f   : > { %v4352_v57 = vsel %vm9511_vm5, %v6940_v25, %v4351_v4  ;;  %v4353_v54 = vrot.slane %v4351_v4, 4  ;;  %v6942_v42 = vrot.slane %v11002_v26, 9  ;;  %v3935_v51 = vshrl.u32 %v10990_v50, 16  ;;  %v3864_v49 = vld [vmem:[#allocation2 + $0x20] sm:$0x1]  ;;  %v8812_v6 = vld [vmem:[#allocation3 + $0x2c0] sm:$0xff]  }
 0x320   : > { %v4359_v47 = vsel %vm9511_vm5, %v6941_v29, %v4358_v28  ;;  %v4360_v38 = vrot.slane %v4358_v28, 4  ;;  %v4367_v24 = vrot.slane %v4365_v19, 4  ;;  %v3938_v5 = vshll.u32 %v10990_v50, 16  ;;  %v11014_v21 = vld [vmem:[#allocation2 + $0x2c] sm:$0x1]  ;;  %v8716_v44 = vld [vmem:[#allocation3 + $0x2c8] sm:$0xff]  }
 0x321   : > { %v4355_v59 = vsel %vm9511_vm5, %v4353_v54, %v4354_v1  ;;  %v4361_v20 = vrot.slane %v3864_v49, 5  ;;  %v4366_v45 = vsel %vm9511_vm5, %v6942_v42, %v4365_v19  ;;  %v3937_v62 = vrot.slane %v3935_v51, 4  ;;  %v11030_v52 = vld [vmem:[#allocation2 + $0x30] sm:$0xf]  ;;  %v11032_v35 = vld [vmem:[#allocation2 + $0x34] sm:$0xf] }
 0x322   : > { %v11018_v48 = vcombine.low %v4352_v57, %v4355_v59  ;;  %v4368_v43 = vrot.slane %v11014_v21, 5  ;;  %v3940_v36 = vrot.slane %v3938_v5, 5  ;;  %v3944_v16 = vshll.u32 %v10960_v40, 16  ;;  %v11037_v61 = vld [vmem:[#allocation2 + $0x40] sm:$0xf] }
 0x323   : > { %v4362_v53 = vsel %vm9511_vm5, %v4360_v38, %v4361_v20  ;;  %v3948_v33 = vshrl.u32 %v10960_v40, 16  ;;  %v3954_v23 = vshll.u32 %v3861_v30, 16  ;;  %v3959_v56 = vshrl.u32 %v10998_v37, 16  ;;  %v11043_v58 = vld [vmem:[#allocation2 + $0x38] sm:$0x1]  ;;  %v8718_v30 = vld [vmem:[#allocation3 + $0x2d0] sm:$0xff]  }
 0x324   : > { %8097 = vmatprep.mubr.bf16.mxu1 %v11018_v48  ;;  %v11026_v22 = vcombine.low %v4359_v47, %v4362_v53  ;;  %v4369_v7 = vsel %vm9511_vm5, %v4367_v24, %v4368_v43  ;;  %v3941_v8 = vor.u32 %v3940_v36, %v3937_v62  ;;  %v3946_v46 = vrot.slane %v3944_v16, 5  ;;  %v11047_v14 = vld [vmem:[#allocation2 + $0x3c] sm:$0xf]  ;;  %v11051_v39 = vld [vmem:[#allocation2 + $0x44] sm:$0x1]  ;;  %v8720_v20 = vld [vmem:[#allocation3 + $0x2d8] sm:$0xff]  }
 0x325   : > { %v11034_v11 = vcombine.low %v4366_v45, %v4369_v7  ;;  %v3950_v3 = vrot.slane %v3948_v33, 4  ;;  %v3956_v31 = vrot.slane %v3954_v23, 5  ;;  %v3962_v9 = vshll.u32 %v10998_v37, 16  ;;  %v11073_v16 = vld [vmem:[#allocation2 + $0x4c] sm:$0xf]  ;;  %v8731_v53 = vld [vmem:[#allocation3 + $0x240] sm:$0xff]  }
 0x326   : > { %8098 = vmatmul.mubr.bf16.vlgmr.msra.gmra.mrb[96].mxu1 %v11026_v22  ;;  %v3942_v32 = vrot.slane %v3941_v8, 4  ;;  %v3968_v41 = vshll.u32 %v10968_v18, 16  ;;  %v3972_v27 = vshrl.u32 %v10968_v18, 16  ;;  %v3961_v63 = vrot.slane %v3959_v56, 4  ;;  %v11083_v7 = vld [vmem:[#allocation2 + $0x48] sm:$0xf] }
 0x327   : > { %8101 = vmatprep.mubr.bf16.mxu1 %v11034_v11  ;;  %8130 = vmatpush3.bf16.msra.mxu1 %v8812_v6  ;;  %v3951_v55 = vor.u32 %v3950_v3, %v3946_v46  ;;  %v3978_v15 = vshll.u32 %v3864_v49, 16  ;;  %v6943_v0 = vrot.slane %v11030_v52, 9  ;;  %v3964_v17 = vrot.slane %v3962_v9, 5  ;;  %v11085_v8 = vld [vmem:[#allocation2 + $0x50] sm:$0x1] }
 0x328   : > { %v3947_v10 = vsel %vm9091_vm2, %v3942_v32, %v3946_v46  ;;  %v3970_v2 = vrot.slane %v3968_v41, 5  ;;  %v3974_v12 = vrot.slane %v3972_v27, 4  ;;  %8131 = vmatprep.subr.bf16.mxu1 %v8716_v44  ;;  %v4372_v1 = vrot.slane %v11032_v35, 5  ;;  %v8738_v46 = vld [vmem:[#allocation3 + $0x288] sm:$0xff]   ;;  %v11093_v32 = vld [vmem:[#allocation2 + $0x54] sm:$0xf] }
 0x329   : > { %v3952_v25 = vrot.slane %v3951_v55, 4  ;;  %v3980_v4 = vrot.slane %v3978_v15, 5  ;;  %v4375_v29 = vrot.slane %v11043_v58, 5  ;;  %v3965_v28 = vor.u32 %v3964_v17, %v3961_v63  ;;  %v11095_v9 = vld [vmem:[#allocation2 + $0x58] sm:$0xf] }
 0x32a   : > { %v3975_v19 = vor.u32 %v3974_v12, %v3970_v2  ;;  %v6944_v57 = vrot.slane %v11047_v14, 9  ;;  %v4379_v54 = vrot.slane %v11037_v61, 5  ;;  %v4373_v51 = vsel %vm9511_vm5, %v6943_v0, %v4372_v1  ;;  %v11102_v63 = vld [vmem:[#allocation2 + $0x5c] sm:$0x1]  ;;  %v8739_v12 = vld [vmem:[#allocation3 + $0x248] sm:$0xff]  }
 0x32b   : > { %v3957_v42 = vsel %vm9091_vm2, %v3952_v25, %v3956_v31  ;;  %v4374_v49 = vrot.slane %v4372_v1, 4  ;;  %v4382_v47 = vrot.slane %v11051_v39, 5  ;;  %8132 = vmatpush3.bf16.msra.mxu1 %v8716_v44  ;;  %v11066_v24 = vcombine.low %v10990_v50, %v10960_v40  ;;  %v8722_v15 = vld [vmem:[#allocation3 + $0x2e0] sm:$0xff]   ;;  %v8746_v1 = vld [vmem:[#allocation3 + $0x290] sm:$0xff]  }
 0x32c   : > { %v11062_v38 = vcombine.low %v3947_v10, %v3957_v42  ;;  %v3966_v5 = vrot.slane %v3965_v28, 4  ;;  %v3976_v59 = vrot.slane %v3975_v19, 4  ;;  %8133 = vmatprep.subr.bf16.mxu1 %v8718_v30  ;;  %v4380_v62 = vsel %vm9511_vm5, %v6944_v57, %v4379_v54 }
 0x32d   : > { %12598 = vst [vmem:[#allocation29_spill] sm:$0xff] %v11066_v24  ;;  %v4376_v45 = vsel %vm9511_vm5, %v4374_v49, %v4375_v29  ;;  %v4381_v43 = vrot.slane %v4379_v54, 4  ;;  %v3983_v36 = vshrl.u32 %v11002_v26, 16  ;;  %v3986_v23 = vshll.u32 %v11002_v26, 16 }
 0x32e   : > { %12597 = vst [vmem:[#allocation27_spill] sm:$0xff] %v11062_v38  ;;  %4868 = vmatprep.mubr.bf16.mxu0 %v11062_v38  ;;  %v3971_v40 = vsel %vm9091_vm2, %v3966_v5, %v3970_v2  ;;  %v3981_v50 = vsel %vm9091_vm2, %v3976_v59, %v3980_v4  ;;  %v11080_v33 = vcombine.low %v4373_v51, %v4376_v45  ;;  %v3992_v56 = vshll.u32 %v10970_v60, 16  ;;  %v11124_v45 = vld [vmem:[#allocation2 + $0x60] sm:$0xf] }
 0x32f   : > { %4869 = vmatmul.mubr.bf16.vlgmr.msra.gmra.mrb[160].mxu0 %v11066_v24  ;;  %v11088_v44 = vcombine.low %v3971_v40, %v3981_v50  ;;  %v4383_v3 = vsel %vm9511_vm5, %v4381_v43, %v4382_v47  ;;  %v3985_v31 = vrot.slane %v3983_v36, 4  ;;  %8134 = vmatpush3.bf16.msra.mxu1 %v8718_v30  ;;  %v3988_v27 = vrot.slane %v3986_v23, 5  ;;  %v11132_v50 = vld [vmem:[#allocation2 + $0x68] sm:$0x1]  ;;  %v8754_v23 = vld [vmem:[#allocation3 + $0x298] sm:$0xff]  }
 0x330   : > { %8102 = vmatmul.mubr.bf16.gmra.mrb[100].mxu1 %v11080_v33  ;;  %v11098_v41 = vcombine.low %v4380_v62, %v4383_v3  ;;  %v3996_v6 = vshrl.u32 %v10970_v60, 16  ;;  %v4002_v55 = vshll.u32 %v11014_v21, 16  ;;  %8135 = vmatprep.subr.bf16.mxu1 %v8720_v20  ;;  %v3994_v0 = vrot.slane %v3992_v56, 5  ;;  %v11126_v62 = vld [vmem:[#allocation2 + $0x64] sm:$0xf] }
 0x331   : > { %12599 = vst [vmem:[#allocation10_spill] sm:$0xff] %v11088_v44  ;;  %4876 = vmatprep.mubr.bf16.mxu0 %v11088_v44  ;;  %v6945_v10 = vrot.slane %v11083_v7, 9  ;;  %v4386_v17 = vrot.slane %v11073_v16, 5  ;;  %v4389_v2 = vrot.slane %v11085_v8, 5  ;;  %7666 = vmatpush3.bf16.msra.mxu0 %v8731_v53  ;;  %v11111_v21 = vcombine.low %v10998_v37, %v10968_v18  ;;  %v8724_v37 = vld [vmem:[#allocation3 + $0x2e8] sm:$0xff]  }
 0x332   : > { %8105 = vmatprep.mubr.bf16.mxu1 %v11098_v41  ;;  %v3989_v30 = vor.u32 %v3988_v27, %v3985_v31  ;;  %v3998_v25 = vrot.slane %v3996_v6, 4  ;;  %v6946_v4 = vrot.slane %v11093_v32, 9  ;;  %7667 = vmatprep.subr.bf16.mxu0 %v8738_v46  ;;  %v4393_v19 = vrot.slane %v11095_v9, 5  ;;  %v11139_v27 = vld [vmem:[#allocation2 + $0x6c] sm:$0xf] }
 0x333   : > { %12600 = vst [vmem:[#allocation11_spill] sm:$0xff] %v11111_v21  ;;  %v4387_v29 = vsel %vm9511_vm5, %v6945_v10, %v4386_v17  ;;  %v4388_v28 = vrot.slane %v4386_v17, 4  ;;  %v4396_v57 = vrot.slane %v11102_v63, 5  ;;  %8136 = vmatpush3.bf16.msra.mxu1 %v8720_v20  ;;  %v4004_v51 = vrot.slane %v4002_v55, 5  ;;  %v8747_v20 = vld [vmem:[#allocation3 + $0x250] sm:$0xff]  }
 0x334   : > { %v3990_v54 = vrot.slane %v3989_v30, 4  ;;  %v3999_v42 = vor.u32 %v3998_v25, %v3994_v0  ;;  %v4007_v18 = vshrl.u32 %v11030_v52, 16  ;;  %8137 = vmatprep.subr.bf16.mxu1 %v8722_v15  ;;  %v4394_v47 = vsel %vm9511_vm5, %v6946_v4, %v4393_v19  ;;  %v8726_v6 = vld [vmem:[#allocation3 + $0x2f0] sm:$0xff]   ;;  %v11327_v44 = vld [vmem:[#allocation2 + $0xc0] sm:$0xf] }
 0x335   : > { %v4390_v49 = vsel %vm9511_vm5, %v4388_v28, %v4389_v2  ;;  %v4395_v5 = vrot.slane %v4393_v19, 4  ;;  %v4010_v59 = vshll.u32 %v11030_v52, 16  ;;  %7668 = vmatpush3.bf16.msra.mxu0 %v8739_v12  ;;  %v4016_v31 = vshll.u32 %v11032_v35, 16  ;;  %v11148_v2 = vld [vmem:[#allocation2 + $0x70] sm:$0xf] }
 0x336   : > { %v3995_v43 = vsel %vm9091_vm2, %v3990_v54, %v3994_v0  ;;  %v4000_v36 = vrot.slane %v3999_v42, 4  ;;  %v11130_v53 = vcombine.low %v4387_v29, %v4390_v49  ;;  %v4009_v40 = vrot.slane %v4007_v18, 4  ;;  %7669 = vmatprep.subr.bf16.mxu0 %v8746_v1  ;;  %v11150_v12 = vld [vmem:[#allocation2 + $0x74] sm:$0x1] }
 0x337   : > { %4877 = vmatmul.mubr.bf16.gmra.mrb[164].mxu0 %v11111_v21  ;;  %v4397_v46 = vsel %vm9511_vm5, %v4395_v5, %v4396_v57  ;;  %v4012_v3 = vrot.slane %v4010_v59, 5  ;;  %v4020_v56 = vshrl.u32 %v11032_v35, 16  ;;  %8138 = vmatpush3.bf16.msra.mxu1 %v8722_v15  ;;  %v4026_v10 = vshll.u32 %v11043_v58, 16  ;;  %v8755_v1 = vld [vmem:[#allocation3 + $0x258] sm:$0xff]   ;;  %v8759_v57 = vld [vmem:[#allocation3 + $0x2a0] sm:$0xff]  }
 0x338   : > { %v4005_v55 = vsel %vm9091_vm2, %v4000_v36, %v4004_v51  ;;  %8106 = vmatmul.mubr.bf16.gmra.mrb[104].mxu1 %v11130_v53  ;;  %v11144_v0 = vcombine.low %v4394_v47, %v4397_v46  ;;  %v6947_v17 = vrot.slane %v11124_v45, 9  ;;  %8139 = vmatprep.subr.bf16.mxu1 %v8724_v37  ;;  %v4018_v25 = vrot.slane %v4016_v31, 5  ;;  %v11321_v21 = vld [vmem:[#allocation2 + $0xc8] sm:$0x1] }
 0x339   : > { %v11152_v30 = vcombine.low %v3995_v43, %v4005_v55  ;;  %v4013_v15 = vor.u32 %v4012_v3, %v4009_v40  ;;  %v4022_v4 = vrot.slane %v4020_v56, 4  ;;  %7670 = vmatpush3.bf16.msra.mxu0 %v8747_v20  ;;  %v4028_v29 = vrot.slane %v4026_v10, 5  ;;  %v11168_v20 = vld [vmem:[#allocation2 + $0x7c] sm:$0xf]  ;;  %v8728_v43 = vld [vmem:[#allocation3 + $0x2f8] sm:$0xff]  }
 0x33a   : > { %8109 = vmatprep.mubr.bf16.mxu1 %v11144_v0  ;;  %v4400_v28 = vrot.slane %v11126_v62, 5  ;;  %v4403_v58 = vrot.slane %v11132_v50, 5  ;;  %v6948_v19 = vrot.slane %v11139_v27, 9  ;;  %7671 = vmatprep.subr.bf16.mxu0 %v8754_v23  ;;  %v4407_v51 = vrot.slane %v11148_v2, 5  ;;  %v11180_v55 = vld [vmem:[#allocation2 + $0x78] sm:$0xf] }
 0x33b   : > { %12601 = vst [vmem:[#allocation12_spill] sm:$0xff] %v11152_v30  ;;  %4884 = vmatprep.mubr.bf16.mxu0 %v11152_v30  ;;  %v4014_v54 = vrot.slane %v4013_v15, 4  ;;  %v4023_v42 = vor.u32 %v4022_v4, %v4018_v25  ;;  %v4410_v18 = vrot.slane %v11150_v12, 5  ;;  %8140 = vmatpush3.bf16.msra.mxu1 %v8724_v37  ;;  %v11163_v49 = vcombine.low %v11002_v26, %v10970_v60  ;;  %v11174_v60 = vld [vmem:[#allocation2 + $0x88] sm:$0xf]  ;;  %v8760_v26 = vld [vmem:[#allocation3 + $0x260] sm:$0xff]  }
 0x33c   : > { %v4401_v47 = vsel %vm9511_vm5, %v6947_v17, %v4400_v28  ;;  %v4402_v5 = vrot.slane %v4400_v28, 4  ;;  %v4031_v59 = vshrl.u32 %v11047_v14, 16  ;;  %8141 = vmatprep.subr.bf16.mxu1 %v8726_v6  ;;  %v4408_v37 = vsel %vm9511_vm5, %v6948_v19, %v4407_v51  ;;  %v11190_v4 = vld [vmem:[#allocation2 + $0x80] sm:$0x1]  ;;  %v11319_v30 = vld [vmem:[#allocation2 + $0xc4] sm:$0xf] }
 0x33d   : > { %12602 = vst [vmem:[#allocation13_spill] sm:$0xff] %v11163_v49  ;;  %v4019_v36 = vsel %vm9091_vm2, %v4014_v54, %v4018_v25  ;;  %v4024_v40 = vrot.slane %v4023_v42, 4  ;;  %v4409_v23 = vrot.slane %v4407_v51, 4  ;;  %7672 = vmatpush3.bf16.msra.mxu0 %v8755_v1  ;;  %v4034_v31 = vshll.u32 %v11047_v14, 16  ;;  %v11192_v1 = vld [vmem:[#allocation2 + $0x84] sm:$0xf] }
 0x33e   : > { %v4404_v46 = vsel %vm9511_vm5, %v4402_v5, %v4403_v58  ;;  %v4033_v3 = vrot.slane %v4031_v59, 4  ;;  %v4040_v56 = vshll.u32 %v11037_v61, 16  ;;  %7673 = vmatprep.subr.bf16.mxu0 %v8759_v57  ;;  %v4044_v25 = vshrl.u32 %v11037_v61, 16  ;;  %v8763_v28 = vld [vmem:[#allocation3 + $0x2a8] sm:$0xff]   ;;  %v8732_v42 = vld [vmem:[#allocation3 + $0x400] sm:$0xff]  }
 0x33f   : > { %4885 = vmatmul.mubr.bf16.gmra.mrb[168].mxu0 %v11163_v49  ;;  %v4029_v10 = vsel %vm9091_vm2, %v4024_v40, %v4028_v29  ;;  %v11185_v17 = vcombine.low %v4401_v47, %v4404_v46  ;;  %v4411_v15 = vsel %vm9511_vm5, %v4409_v23, %v4410_v18  ;;  %8142 = vmatpush3.bf16.msra.mxu1 %v8726_v6  ;;  %v4036_v57 = vrot.slane %v4034_v31, 5  ;;  %v11198_v29 = vld [vmem:[#allocation2 + $0x8c] sm:$0x1]  ;;  %v8764_v5 = vld [vmem:[#allocation3 + $0x268] sm:$0xff]  }
 0x340   : > { %v11194_v58 = vcombine.low %v4019_v36, %v4029_v10  ;;  %v11196_v19 = vcombine.low %v4408_v37, %v4411_v15  ;;  %v4042_v54 = vrot.slane %v4040_v56, 5  ;;  %8143 = vmatprep.subr.bf16.mxu1 %v8728_v43  ;;  %v4046_v51 = vrot.slane %v4044_v25, 4  ;;  %v8766_v23 = vld [vmem:[#allocation3 + $0x2b0] sm:$0xff]  }
 0x341   : > { %8110 = vmatmul.mubr.bf16.gmra.mrb[108].mxu1 %v11185_v17  ;;  %v4050_v18 = vshll.u32 %v11051_v39, 16  ;;  %v6949_v47 = vrot.slane %v11180_v55, 9  ;;  %v4414_v6 = vrot.slane %v11168_v20, 5  ;;  %7674 = vmatpush3.bf16.msra.mxu0 %v8760_v26  ;;  %v4037_v59 = vor.u32 %v4036_v57, %v4033_v3 }
 0x342   : > { %12603 = vst [vmem:[#allocation18_spill] sm:$0xff] %v11194_v58  ;;  %4892 = vmatprep.mubr.bf16.mxu0 %v11194_v58  ;;  %8113 = vmatprep.mubr.bf16.mxu1 %v11196_v19  ;;  %v4417_v36 = vrot.slane %v11190_v4, 5  ;;  %v6950_v40 = vrot.slane %v11192_v1, 9  ;;  %v4421_v37 = vrot.slane %v11174_v60, 5  ;;  %v4047_v46 = vor.u32 %v4046_v51, %v4042_v54 }
 0x343   : > { %v4052_v39 = vrot.slane %v4050_v18, 5  ;;  %v4415_v31 = vsel %vm9511_vm5, %v6949_v47, %v4414_v6  ;;  %v4416_v56 = vrot.slane %v4414_v6, 4  ;;  %8144 = vmatpush3.bf16.msra.mxu1 %v8728_v43  ;;  %7675 = vmatprep.subr.bf16.mxu0 %v8763_v28  ;;  %v4038_v26 = vrot.slane %v4037_v59, 4  ;;  %v11221_v43 = vld [vmem:[#allocation2 + $0x94] sm:$0xf]  ;;  %v8767_v28 = vld [vmem:[#allocation3 + $0x270] sm:$0xff]  }
 0x344   : > { %v4422_v10 = vsel %vm9511_vm5, %v6950_v40, %v4421_v37  ;;  %v4423_v3 = vrot.slane %v4421_v37, 4  ;;  %v4424_v15 = vrot.slane %v11198_v29, 5  ;;  %7801 = vmatprep.subr.bf16.mxu1 %v8732_v42  ;;  %v11216_v25 = vcombine.low %v11030_v52, %v11032_v35  ;;  %v11230_v35 = vld [vmem:[#allocation2 + $0x90] sm:$0xf]  ;;  %v11232_v59 = vld [vmem:[#allocation2 + $0x98] sm:$0x1] }
 0x345   : > { %v4048_v57 = vrot.slane %v4047_v46, 4  ;;  %v4418_v51 = vsel %vm9511_vm5, %v4416_v56, %v4417_v36  ;;  %v4055_v18 = vshrl.u32 %v11083_v7, 16  ;;  %7676 = vmatpush3.bf16.msra.mxu0 %v8764_v5  ;;  %v4043_v47 = vsel %vm9091_vm2, %v4038_v26, %v4042_v54  ;;  %v11234_v36 = vld [vmem:[#allocation2 + $0xa0] sm:$0xf]  ;;  %v11242_v46 = vld [vmem:[#allocation2 + $0x9c] sm:$0xf] }
 0x346   : > { %12604 = vst [vmem:[#allocation17_spill] sm:$0xff] %v11216_v25  ;;  %v11225_v6 = vcombine.low %v4415_v31, %v4418_v51  ;;  %v4425_v42 = vsel %vm9511_vm5, %v4423_v3, %v4424_v15  ;;  %v4058_v52 = vshll.u32 %v11083_v7, 16  ;;  %7677 = vmatprep.subr.bf16.mxu0 %v8766_v23  ;;  %v4064_v37 = vshll.u32 %v11073_v16, 16  ;;  %v8769_v31 = vld [vmem:[#allocation3 + $0x2b8] sm:$0xff]   ;;  %v11248_v15 = vld [vmem:[#allocation2 + $0xa4] sm:$0x1] }
 0x347   : > { %4893 = vmatmul.mubr.bf16.gmra.mrb[172].mxu0 %v11216_v25  ;;  %v4053_v5 = vsel %vm9091_vm2, %v4048_v57, %v4052_v39  ;;  %v11239_v54 = vcombine.low %v4422_v10, %v4425_v42  ;;  %v4057_v40 = vrot.slane %v4055_v18, 4  ;;  %v4068_v3 = vshrl.u32 %v11073_v16, 16  ;;  %v8770_v18 = vld [vmem:[#allocation3 + $0x278] sm:$0xff]  }
 0x348   : > { %v11244_v56 = vcombine.low %v4043_v47, %v4053_v5  ;;  %v4060_v26 = vrot.slane %v4058_v52, 5  ;;  %v4074_v23 = vshll.u32 %v11085_v8, 16  ;;  %v4066_v39 = vrot.slane %v4064_v37, 5 }
 0x349   : > { %8114 = vmatmul.mubr.bf16.gmra.mrb[112].mxu1 %v11225_v6  ;;  %v6951_v10 = vrot.slane %v11230_v35, 9  ;;  %v4428_v57 = vrot.slane %v11221_v43, 5  ;;  %v4431_v51 = vrot.slane %v11232_v59, 5  ;;  %7678 = vmatpush3.bf16.msra.mxu0 %v8767_v28  ;;  %v11258_v8 = vcombine.low %v11047_v14, %v11037_v61 }
 0x34a   : > { %12605 = vst [vmem:[#allocation15_spill] sm:$0xff] %v11244_v56  ;;  %4900 = vmatprep.mubr.bf16.mxu0 %v11244_v56  ;;  %8117 = vmatprep.mubr.bf16.mxu1 %v11239_v54  ;;  %v4061_v47 = vor.u32 %v4060_v26, %v4057_v40  ;;  %v4070_v42 = vrot.slane %v4068_v3, 4  ;;  %v6952_v52 = vrot.slane %v11242_v46, 9  ;;  %v4435_v25 = vrot.slane %v11234_v36, 5  ;;  %v11271_v3 = vld [vmem:[#allocation2 + $0xa8] sm:$0xf] }
 0x34b   : > { %12606 = vst [vmem:[#allocation14_spill] sm:$0xff] %v11258_v8  ;;  %v4429_v5 = vsel %vm9511_vm5, %v6951_v10, %v4428_v57  ;;  %v4430_v37 = vrot.slane %v4428_v57, 4  ;;  %v4438_v28 = vrot.slane %v11248_v15, 5  ;;  %7679 = vmatprep.subr.bf16.mxu0 %v8769_v31  ;;  %v4076_v58 = vrot.slane %v4074_v23, 5 }
 0x34c   : > { %v4062_v56 = vrot.slane %v4061_v47, 4  ;;  %v4071_v24 = vor.u32 %v4070_v42, %v4066_v39  ;;  %v4079_v49 = vshrl.u32 %v11093_v32, 16  ;;  %v4436_v14 = vsel %vm9511_vm5, %v6952_v52, %v4435_v25  ;;  %v11277_v47 = vld [vmem:[#allocation2 + $0xac] sm:$0xf]  ;;  %v11279_v42 = vld [vmem:[#allocation2 + $0xb0] sm:$0x1] }
 0x34d   : > { %v4432_v61 = vsel %vm9511_vm5, %v4430_v37, %v4431_v51  ;;  %v4437_v40 = vrot.slane %v4435_v25, 4  ;;  %v4082_v26 = vshll.u32 %v11093_v32, 16  ;;  %7680 = vmatpush3.bf16.msra.mxu0 %v8770_v18  ;;  %v4088_v52 = vshll.u32 %v11095_v9, 16  ;;  %v11286_v37 = vld [vmem:[#allocation2 + $0xb4] sm:$0xf] }
 0x34e   : > { %v4067_v31 = vsel %vm9091_vm2, %v4062_v56, %v4066_v39  ;;  %v4072_v10 = vrot.slane %v4071_v24, 4  ;;  %v11275_v57 = vcombine.low %v4429_v5, %v4432_v61  ;;  %v4081_v23 = vrot.slane %v4079_v49, 4  ;;  %v11294_v5 = vld [vmem:[#allocation2 + $0xb8] sm:$0xf]  ;;  %v11296_v61 = vld [vmem:[#allocation2 + $0xbc] sm:$0x1] }
 0x34f   : > { %4901 = vmatmul.mubr.bf16.gmra.mrb[176].mxu0 %v11258_v8  ;;  %v4439_v25 = vsel %vm9511_vm5, %v4437_v40, %v4438_v28  ;;  %v4084_v51 = vrot.slane %v4082_v26, 5  ;;  %v4092_v18 = vshrl.u32 %v11095_v9, 16  ;;  %v4098_v56 = vshll.u32 %v11102_v63, 16 }
 0x350   : > { %v4077_v24 = vsel %vm9091_vm2, %v4072_v10, %v4076_v58  ;;  %v11290_v49 = vcombine.low %v4436_v14, %v4439_v25  ;;  %v6953_v39 = vrot.slane %v11271_v3, 9  ;;  %v4090_v26 = vrot.slane %v4088_v52, 5 }
 0x351   : > { %v11298_v28 = vcombine.low %v4067_v31, %v4077_v24  ;;  %8118 = vmatmul.mubr.bf16.gmra.mrb[116].mxu1 %v11275_v57  ;;  %v4085_v40 = vor.u32 %v4084_v51, %v4081_v23  ;;  %v4094_v8 = vrot.slane %v4092_v18, 4  ;;  %v4100_v58 = vrot.slane %v4098_v56, 5 }
 0x352   : > { %12607 = vst [vmem:[#allocation19_spill] sm:$0xff] %v11290_v49  ;;  %8121 = vmatprep.mubr.bf16.mxu1 %v11290_v49  ;;  %v4442_v14 = vrot.slane %v11277_v47, 5  ;;  %v4445_v63 = vrot.slane %v11279_v42, 5  ;;  %v6954_v10 = vrot.slane %v11286_v37, 9  ;;  %v4449_v31 = vrot.slane %v11294_v5, 5 }
 0x353   : > { %12608 = vst [vmem:[#allocation16_spill] sm:$0xff] %v11298_v28  ;;  %4908 = vmatprep.mubr.bf16.mxu0 %v11298_v28  ;;  %v4086_v25 = vrot.slane %v4085_v40, 4  ;;  %v4095_v38 = vor.u32 %v4094_v8, %v4090_v26  ;;  %v4452_v24 = vrot.slane %v11296_v61, 5  ;;  %v11310_v23 = vcombine.low %v11083_v7, %v11073_v16 }
 0x354   : > { %v4443_v51 = vsel %vm9511_vm5, %v6953_v39, %v4442_v14  ;;  %v4444_v52 = vrot.slane %v4442_v14, 4  ;;  %v4103_v18 = vshrl.u32 %v11124_v45, 16  ;;  %v4450_v8 = vsel %vm9511_vm5, %v6954_v10, %v4449_v31 }
 0x355   : > { %12609 = vst [vmem:[#allocation20_spill] sm:$0xff] %v11310_v23  ;;  %v4091_v56 = vsel %vm9091_vm2, %v4086_v25, %v4090_v26  ;;  %v4096_v28 = vrot.slane %v4095_v38, 4  ;;  %v4451_v40 = vrot.slane %v4449_v31, 4  ;;  %v4106_v39 = vshll.u32 %v11124_v45, 16  ;;  %v11339_v31 = vld [vmem:[#allocation2 + $0x4] sm:$0xf] }
 0x356   : > { %v4446_v16 = vsel %vm9511_vm5, %v4444_v52, %v4445_v63  ;;  %v4105_v7 = vrot.slane %v4103_v18, 4  ;;  %v4112_v14 = vshll.u32 %v11126_v62, 16  ;;  %v4116_v25 = vshrl.u32 %v11126_v62, 16  ;;  %v11337_v63 = vld [vmem:[#allocation2] sm:$0xf] }
 0x357   : > { %4909 = vmatmul.mubr.bf16.gmra.mrb[180].mxu0 %v11310_v23  ;;  %v4101_v38 = vsel %vm9091_vm2, %v4096_v28, %v4100_v58  ;;  %v11332_v26 = vcombine.low %v4443_v51, %v4446_v16  ;;  %v4453_v10 = vsel %vm9511_vm5, %v4451_v40, %v4452_v24  ;;  %v4108_v49 = vrot.slane %v4106_v39, 5  ;;  %v11349_v40 = vld [vmem:[#allocation2 + $0x8] sm:$0x1] }
 0x358   : > { %v11341_v52 = vcombine.low %v4091_v56, %v4101_v38  ;;  %v11343_v18 = vcombine.low %v4450_v8, %v4453_v10  ;;  %v4114_v23 = vrot.slane %v4112_v14, 5  ;;  %v4118_v28 = vrot.slane %v4116_v25, 4 }
 0x359   : > { %12610 = vst [vmem:[#allocation21_spill] sm:$0xff] %v11332_v26  ;;  %8122 = vmatmul.mubr.bf16.gmra.mrb[120].mxu1 %v11332_v26  ;;  %v4122_v58 = vshll.u32 %v11132_v50, 16  ;;  %v7003_v51 = vrot.slane %v11327_v44, 9  ;;  %v4675_v24 = vrot.slane %v11319_v30, 5  ;;  %v4109_v56 = vor.u32 %v4108_v49, %v4105_v7 }
 0x35a   : > { %12611 = vst [vmem:[#allocation22_spill] sm:$0xff] %v11341_v52  ;;  %12612 = vst [vmem:[#allocation23_spill] sm:$0xff] %v11343_v18  ;;  %4916 = vmatprep.mubr.bf16.mxu0 %v11341_v52  ;;  %8125 = vmatprep.mubr.bf16.mxu1 %v11343_v18  ;;  %v4678_v8 = vrot.slane %v11321_v21, 5  ;;  %v6939_v16 = vrot.slane %v11337_v63, 9  ;;  %v4344_v39 = vrot.slane %v11339_v31, 5  ;;  %v4119_v14 = vor.u32 %v4118_v28, %v4114_v23 }
 0x35b   : > { %v4124_v38 = vrot.slane %v4122_v58, 5  ;;  %v4676_v50 = vsel %vm9511_vm5, %v7003_v51, %v4675_v24  ;;  %v4677_v10 = vrot.slane %v4675_v24, 4  ;;  %v4110_v25 = vrot.slane %v4109_v56, 4 }
 0x35c   : > { %v4345_v26 = vsel %vm9511_vm5, %v6939_v16, %v4344_v39  ;;  %v4346_v52 = vrot.slane %v4344_v39, 4  ;;  %v4347_v18 = vrot.slane %v11349_v40, 5  ;;  %v11363_v49 = vcombine.low %v11093_v32, %v11095_v9 }
 0x35d   : > { %v4120_v7 = vrot.slane %v4119_v14, 4  ;;  %v4679_v28 = vsel %vm9511_vm5, %v4677_v10, %v4678_v8  ;;  %v4127_v58 = vshrl.u32 %v11139_v27, 16  ;;  %v4115_v51 = vsel %vm9091_vm2, %v4110_v25, %v4114_v23 }
 0x35e   : > { %12613 = vst [vmem:[#allocation24_spill] sm:$0xff] %v11363_v49  ;;  %v11370_v24 = vcombine.low %v4676_v50, %v4679_v28  ;;  %v4348_v56 = vsel %vm9511_vm5, %v4346_v52, %v4347_v18  ;;  %v4130_v16 = vshll.u32 %v11139_v27, 16  ;;  %v4136_v8 = vshll.u32 %v11148_v2, 16 }
 0x35f   : > { %4917 = vmatmul.mubr.bf16.gmra.mrb[184].mxu0 %v11363_v49  ;;  %v4125_v32 = vsel %vm9091_vm2, %v4120_v7, %v4124_v38  ;;  %v6987_v9 = vcombine.low %v4345_v26, %v4348_v56  ;;  %v4129_v39 = vrot.slane %v4127_v58, 4  ;;  %v4140_v23 = vshrl.u32 %v11148_v2, 16 }
 0x360   : > { %12614 = vst [vmem:[#allocation25_spill] sm:$0xff] %v11370_v24  ;;  %v11379_v14 = vcombine.low %v4115_v51, %v4125_v32  ;;  %v4132_v10 = vrot.slane %v4130_v16, 5  ;;  %v4146_v50 = vshll.u32 %v11150_v12, 16  ;;  %v4138_v52 = vrot.slane %v4136_v8, 5 }
 0x361   : > { %8126 = vmatmul.mubr.bf16.gmra.mrb[124].mxu1 %v11370_v24  ;;  %v4151_v18 = vshrl.u32 %v11180_v55, 16  ;;  %v4154_v25 = vshll.u32 %v11180_v55, 16  ;;  %v4142_v38 = vrot.slane %v4140_v23, 4  ;;  %v4160_v7 = vshll.u32 %v11168_v20, 16 }
 0x362   : > { %4924 = vmatprep.mubr.bf16.mxu0 %v11379_v14  ;;  %8145 = vmatprep.mubr.bf16.mxu1 %v6987_v9  ;;  %v4133_v26 = vor.u32 %v4132_v10, %v4129_v39  ;;  %v11390_v28 = vcombine.low %v11124_v45, %v11126_v62  ;;  %v4164_v51 = vshrl.u32 %v11168_v20, 16  ;;  %v4148_v32 = vrot.slane %v4146_v50, 5  ;;  %v8733_v45 = vld [vmem:[#allocation3 + $0x3c0] sm:$0xff]  }
 0x363   : > { %v4153_v58 = vrot.slane %v4151_v18, 4  ;;  %v4156_v12 = vrot.slane %v4154_v25, 5  ;;  %v4143_v16 = vor.u32 %v4142_v38, %v4138_v52  ;;  %v4162_v8 = vrot.slane %v4160_v7, 5 }
 0x364   : > { %v4134_v56 = vrot.slane %v4133_v26, 4  ;;  %v4166_v49 = vrot.slane %v4164_v51, 4  ;;  %v4170_v9 = vshll.u32 %v11190_v4, 16  ;;  %v4175_v39 = vshrl.u32 %v11192_v1, 16  ;;  %v8735_v26 = vld [vmem:[#allocation3 + $0x408] sm:$0xff]  }
 0x365   : > { %v4157_v24 = vor.u32 %v4156_v12, %v4153_v58  ;;  %v4144_v23 = vrot.slane %v4143_v16, 4  ;;  %v4178_v62 = vshll.u32 %v11192_v1, 16  ;;  %v4184_v18 = vshll.u32 %v11174_v60, 16  ;;  %v8736_v51 = vld [vmem:[#allocation3 + $0x3c8] sm:$0xff]  }
 0x366   : > { %v4139_v10 = vsel %vm9091_vm2, %v4134_v56, %v4138_v52  ;;  %v4167_v50 = vor.u32 %v4166_v49, %v4162_v8  ;;  %v4177_v38 = vrot.slane %v4175_v39, 4  ;;  %v4188_v7 = vshrl.u32 %v11174_v60, 16 }
 0x367   : > { %4925 = vmatmul.mubr.bf16.gmra.mrb[188].mxu0 %v11390_v28  ;;  %v4158_v25 = vrot.slane %v4157_v24, 4  ;;  %v4149_v4 = vsel %vm9091_vm2, %v4144_v23, %v4148_v32  ;;  %v4180_v58 = vrot.slane %v4178_v62, 5  ;;  %v4172_v52 = vrot.slane %v4170_v9, 5  ;;  %v8740_v32 = vld [vmem:[#allocation3 + $0x410] sm:$0xff]  }
 0x368   : > { %v11403_v12 = vcombine.low %v4139_v10, %v4149_v4  ;;  %v4186_v24 = vrot.slane %v4184_v18, 5  ;;  %v4190_v49 = vrot.slane %v4188_v7, 4  ;;  %v4168_v39 = vrot.slane %v4167_v50, 4 }
 0x369   : > { %8146 = vmatmul.mubr.bf16.vlgmr.msra.gmra.mrb[96].mxu1 %v11018_v48  ;;  %v4181_v56 = vor.u32 %v4180_v58, %v4177_v38  ;;  %v4163_v16 = vsel %vm9091_vm2, %v4158_v25, %v4162_v8  ;;  %v4199_v10 = vshrl.u32 %v11230_v35, 16  ;;  %v4202_v48 = vshll.u32 %v11230_v35, 16  ;;  %v8741_v25 = vld [vmem:[#allocation3 + $0x3d0] sm:$0xff]  }
 0x36a   : > { %8149 = vmatprep.mubr.bf16.mxu1 %v11026_v22  ;;  %7802 = vmatpush3.bf16.msra.mxu1 %v8733_v45  ;;  %v11414_v9 = vcombine.low %v11139_v27, %v11148_v2  ;;  %v4173_v23 = vsel %vm9091_vm2, %v4168_v39, %v4172_v52  ;;  %v4194_v45 = vshll.u32 %v11198_v29, 16  ;;  %v4191_v18 = vor.u32 %v4190_v49, %v4186_v24  ;;  %v8743_v2 = vld [vmem:[#allocation3 + $0x418] sm:$0xff]  }
 0x36b   : > { %4932 = vmatprep.mubr.bf16.mxu0 %v11403_v12  ;;  %7803 = vmatprep.subr.bf16.mxu1 %v8735_v26  ;;  %v11419_v62 = vcombine.low %v4163_v16, %v4173_v23  ;;  %v4182_v8 = vrot.slane %v4181_v56, 4  ;;  %v4208_v50 = vshll.u32 %v11221_v43, 16  ;;  %v4201_v26 = vrot.slane %v4199_v10, 4  ;;  %v8744_v52 = vld [vmem:[#allocation3 + $0x3d8] sm:$0xff]  }
 0x36c   : > { %v4204_v38 = vrot.slane %v4202_v48, 5  ;;  %v4212_v27 = vshrl.u32 %v11221_v43, 16  ;;  %v4196_v29 = vrot.slane %v4194_v45, 5  ;;  %v4192_v4 = vrot.slane %v4191_v18, 4  ;;  %v8749_v18 = vld [vmem:[#allocation3 + $0x3e0] sm:$0xff]  }
 0x36d   : > { %v4187_v7 = vsel %vm9091_vm2, %v4182_v8, %v4186_v24  ;;  %v4210_v58 = vrot.slane %v4208_v50, 5  ;;  %v4223_v16 = vshrl.u32 %v11242_v46, 16  ;;  %v4226_v39 = vshll.u32 %v11242_v46, 16 }
 0x36e   : > { %7804 = vmatpush3.bf16.msra.mxu1 %v8736_v51  ;;  %v11431_v51 = vcombine.low %v11242_v46, %v11234_v36  ;;  %v4205_v56 = vor.u32 %v4204_v38, %v4201_v26  ;;  %v4214_v49 = vrot.slane %v4212_v27, 4  ;;  %v11437_v10 = vcombine.low %v11180_v55, %v11168_v20 }
 0x36f   : > { %4933 = vmatmul.mubr.bf16.gmra.mrb[192].mxu0 %v11414_v9  ;;  %7805 = vmatprep.subr.bf16.mxu1 %v8740_v32  ;;  %v8748_v32 = vld [vmem:[#allocation3 + $0x420] sm:$0xff]   ;;  %v4197_v24 = vsel %vm9091_vm2, %v4192_v4, %v4196_v29  ;;  %v4218_v48 = vshll.u32 %v11232_v59, 16  ;;  %v4232_v23 = vshll.u32 %v11234_v36, 16  ;;  %v4236_v45 = vshrl.u32 %v11234_v36, 16  ;;  %v8751_v59 = vld [vmem:[#allocation3 + $0x428] sm:$0xff]  }
 0x370   : > { %4940 = vmatprep.mubr.bf16.mxu0 %v11419_v62  ;;  %v11444_v8 = vcombine.low %v4187_v7, %v4197_v24  ;;  %v11448_v46 = vcombine.low %v11271_v3, %v11277_v47  ;;  %v4206_v20 = vrot.slane %v4205_v56, 4  ;;  %v4215_v55 = vor.u32 %v4214_v49, %v4210_v58  ;;  %v8752_v7 = vld [vmem:[#allocation3 + $0x3e8] sm:$0xff]   ;;  %v8756_v49 = vld [vmem:[#allocation3 + $0x430] sm:$0xff]  }
 0x371   : > { %8150 = vmatmul.mubr.bf16.gmra.mrb[100].mxu1 %v11034_v11  ;;  %v4228_v50 = vrot.slane %v4226_v39, 5  ;;  %v4220_v36 = vrot.slane %v4218_v48, 5  ;;  %v4234_v26 = vrot.slane %v4232_v23, 5  ;;  %v4238_v38 = vrot.slane %v4236_v45, 4  ;;  %v8757_v45 = vld [vmem:[#allocation3 + $0x3f0] sm:$0xff]  }
 0x372   : > { %8153 = vmatprep.mubr.bf16.mxu1 %v11080_v33  ;;  %7806 = vmatpush3.bf16.msra.mxu1 %v8741_v25  ;;  %v4225_v25 = vrot.slane %v4223_v16, 4  ;;  %v4242_v27 = vshll.u32 %v11248_v15, 16  ;;  %v4250_v29 = vshll.u32 %v11271_v3, 16  ;;  %v4211_v4 = vsel %vm9091_vm2, %v4206_v20, %v4210_v58  ;;  %v8761_v20 = vld [vmem:[#allocation3 + $0x438] sm:$0xff]  }
 0x373   : > { %7807 = vmatprep.subr.bf16.mxu1 %v8743_v2  ;;  %v4247_v2 = vshrl.u32 %v11271_v3, 16  ;;  %v11461_v16 = vcombine.low %v11286_v37, %v11294_v5  ;;  %v4256_v39 = vshll.u32 %v11277_v47, 16  ;;  %v11466_v15 = vcombine.low %v11192_v1, %v11174_v60 }
 0x374   : > { %v4229_v56 = vor.u32 %v4228_v50, %v4225_v25  ;;  %v4260_v58 = vshrl.u32 %v11277_v47, 16  ;;  %v4252_v23 = vrot.slane %v4250_v29, 5  ;;  %v4244_v1 = vrot.slane %v4242_v27, 5 }
 0x375   : > { %v4249_v48 = vrot.slane %v4247_v2, 4  ;;  %v4266_v47 = vshll.u32 %v11279_v42, 16  ;;  %v11484_v25 = vcombine.low %v11327_v44, %v11319_v30  ;;  %v3911_v50 = vshrl.u32 %v11337_v63, 16  ;;  %v8762_v42 = vld [vmem:[#allocation3 + $0x3f8] sm:$0xff]  }
 0x376   : > { %7808 = vmatpush3.bf16.msra.mxu1 %v8744_v52  ;;  %v4216_v52 = vrot.slane %v4215_v55, 4  ;;  %v4230_v60 = vrot.slane %v4229_v56, 4  ;;  %v11479_v55 = vrot.slane %v4256_v39, 5  ;;  %v4274_v27 = vshll.u32 %v11286_v37, 16 }
 0x377   : > { %4941 = vmatmul.mubr.bf16.gmra.mrb[196].mxu0 %v11437_v10  ;;  %7809 = vmatprep.subr.bf16.mxu1 %v8748_v32  ;;  %v4239_v32 = vor.u32 %v4238_v38, %v4234_v26  ;;  %v4253_v38 = vor.u32 %v4252_v23, %v4249_v48  ;;  %v3913_v2 = vrot.slane %v3911_v50, 4  ;;  %v3920_v29 = vshll.u32 %v11339_v31, 16 }
 0x378   : > { %4948 = vmatprep.mubr.bf16.mxu0 %v11444_v8  ;;  %v4221_v3 = vsel %vm9091_vm2, %v4216_v52, %v4220_v36  ;;  %v3914_v36 = vshll.u32 %v11337_v63, 16  ;;  %v3924_v52 = vshrl.u32 %v11339_v31, 16  ;;  %v3930_v56 = vshll.u32 %v11349_v40, 16 }
 0x379   : > { %8154 = vmatmul.mubr.bf16.gmra.mrb[104].mxu1 %v11098_v41  ;;  %v11471_v24 = vcombine.low %v4211_v4, %v4221_v3  ;;  %v3922_v3 = vrot.slane %v3920_v29, 5  ;;  %v4254_v40 = vrot.slane %v4253_v38, 4  ;;  %v11515_v29 = vld [vmem:[#allocation2 + $0xd4] sm:$0x1] }
 0x37a   : > { %8157 = vmatprep.mubr.bf16.mxu1 %v11130_v53  ;;  %7810 = vmatpush3.bf16.msra.mxu1 %v8749_v18  ;;  %v11476_v18 = vcombine.low %v11230_v35, %v11221_v43  ;;  %v4240_v43 = vrot.slane %v4239_v32, 4  ;;  %v4262_v35 = vrot.slane %v4260_v58, 4  ;;  %v3916_v4 = vrot.slane %v3914_v36, 5  ;;  %v11510_v36 = vld [vmem:[#allocation2 + $0xcc] sm:$0xf] }
 0x37b   : > { %7811 = vmatprep.subr.bf16.mxu1 %v8751_v59  ;;  %v4271_v59 = vshrl.u32 %v11286_v37, 16  ;;  %v4280_v37 = vshll.u32 %v11294_v5, 16  ;;  %v6955_v32 = vcombine.low %v11337_v63, %v11339_v31  ;;  %v3926_v23 = vrot.slane %v3924_v52, 4  ;;  %v12625_v63 = vld [vmem:[#allocation17_spill] sm:$0xff]  ;;  %v12626_v31 = vld [vmem:[#allocation15_spill] sm:$0xff] }
 0x37c   : > { %v4245_v39 = vsel %vm9091_vm2, %v4240_v43, %v4244_v1  ;;  %v4263_v58 = vor.u32 %v4262_v35, %v11479_v55  ;;  %v3917_v48 = vor.u32 %v3916_v4, %v3913_v2  ;;  %v3932_v43 = vrot.slane %v3930_v56, 5  ;;  %v11512_v35 = vld [vmem:[#allocation2 + $0xd0] sm:$0xf] }
 0x37d   : > { %v3927_v50 = vor.u32 %v3926_v23, %v3922_v3  ;;  %v4282_v2 = vrot.slane %v4280_v37, 5  ;;  %v5653_v52 = vrot.slane %v11512_v35, 5  ;;  %v4647_v56 = vshrl.u32 %v11327_v44, 16 }
 0x37e   : > { %7812 = vmatpush3.bf16.msra.mxu1 %v8752_v7  ;;  %v4235_v7 = vsel %vm9091_vm2, %v4230_v60, %v4234_v26  ;;  %v4284_v26 = vshrl.u32 %v11294_v5, 16  ;;  %v4273_v60 = vrot.slane %v4271_v59, 4  ;;  %v3918_v1 = vrot.slane %v3917_v48, 4 }
 0x37f   : > { %4949 = vmatmul.mubr.bf16.gmra.mrb[200].mxu0 %v11466_v15  ;;  %7813 = vmatprep.subr.bf16.mxu1 %v8756_v49  ;;  %v11497_v49 = vld [vmem:[#allocation3 + $0x440] sm:$0xff]   ;;  %v4268_v5 = vrot.slane %v4266_v47, 5  ;;  %v4264_v59 = vrot.slane %v4263_v58, 4  ;;  %v7055_v47 = vrot.slane %v11510_v36, 9  ;;  %v4290_v48 = vshll.u32 %v11296_v61, 16 }
 0x380   : > { %4956 = vmatprep.mubr.bf16.mxu0 %v11471_v24  ;;  %v4286_v38 = vrot.slane %v4284_v26, 4  ;;  %v5655_v23 = vrot.slane %v5653_v52, 4  ;;  %v7056_v34 = vcombine.low %v11510_v36, %v11512_v35 }
 0x381   : > { %8158 = vmatmul.mubr.bf16.gmra.mrb[108].mxu1 %v11144_v0  ;;  %v11533_v26 = vsel %vm9511_vm5, %v7055_v47, %v5653_v52 }
 0x382   : > { %8161 = vmatprep.mubr.bf16.mxu1 %v11185_v17  ;;  %7814 = vmatpush3.bf16.msra.mxu1 %v8757_v45  ;;  %v11506_v45 = vcombine.low %v4235_v7, %v4245_v39  ;;  %v4259_v7 = vsel %vm9091_vm2, %v4254_v40, %v11479_v55  ;;  %v4650_v39 = vshll.u32 %v11327_v44, 16  ;;  %v4269_v55 = vsel %vm9091_vm2, %v4264_v59, %v4268_v5 }
 0x383   : > { %7815 = vmatprep.subr.bf16.mxu1 %v8761_v20  ;;  %v4276_v20 = vrot.slane %v4274_v27, 5  ;;  %v3923_v27 = vsel %vm9091_vm2, %v3918_v1, %v3922_v3  ;;  %v5656_v3 = vrot.slane %v11515_v29, 5  ;;  %v11538_v40 = vcombine.low %v4259_v7, %v4269_v55 }
 0x384   : > { %v4287_v44 = vor.u32 %v4286_v38, %v4282_v2  ;;  %v4649_v1 = vrot.slane %v4647_v56, 4  ;;  %v4292_v5 = vrot.slane %v4290_v48, 5 }
 0x385   : > { %v4277_v4 = vor.u32 %v4276_v20, %v4273_v60  ;;  %v4656_v20 = vshll.u32 %v11319_v30, 16 }
 0x386   : > { %7816 = vmatpush3.bf16.msra.mxu1 %v8762_v42  ;;  %v3928_v42 = vrot.slane %v3927_v50, 4  ;;  %v4652_v50 = vrot.slane %v4650_v39, 5  ;;  %v4288_v59 = vrot.slane %v4287_v44, 4  ;;  %v12615_v39 = vld [vmem:[#allocation19_spill] sm:$0xff]  ;;  %v8772_v44 = vld [vmem:[#allocation3 + $0x448] sm:$0xff]  }
 0x387   : > { %4957 = vmatmul.mubr.bf16.gmra.mrb[204].mxu0 %v11476_v18  ;;  %8177 = vmatprep.subr.bf16.mxu1 %v11497_v49  ;;  %v4278_v60 = vrot.slane %v4277_v4, 4  ;;  %v4666_v4 = vshll.u32 %v11321_v21, 16 }
 0x388   : > { %4964 = vmatprep.mubr.bf16.mxu0 %v11506_v45  ;;  %v3933_v37 = vsel %vm9091_vm2, %v3928_v42, %v3932_v43  ;;  %v4660_v43 = vshrl.u32 %v11319_v30, 16  ;;  %v4653_v42 = vor.u32 %v4652_v50, %v4649_v1  ;;  %v4658_v30 = vrot.slane %v4656_v20, 5  ;;  %v12619_v20 = vld [vmem:[#allocation11_spill] sm:$0xff]  ;;  %v12620_v1 = vld [vmem:[#allocation12_spill] sm:$0xff] }
 0x389   : > { %8162 = vmatmul.mubr.bf16.gmra.mrb[112].mxu1 %v11196_v19  ;;  %v6971_v58 = vcombine.low %v3923_v27, %v3933_v37  ;;  %v11545_v27 = vsel %vm9511_vm5, %v5655_v23, %v5656_v3  ;;  %v4283_v38 = vsel %vm9091_vm2, %v4278_v60, %v4282_v2  ;;  %v4293_v13 = vsel %vm9091_vm2, %v4288_v59, %v4292_v5  ;;  %v12616_v2 = vld [vmem:[#allocation21_spill] sm:$0xff]  ;;  %v12617_v23 = vld [vmem:[#allocation23_spill] sm:$0xff]  ;;  %v12618_v60 = vld [vmem:[#allocation10_spill] sm:$0xff] }
 0x38a   : > { %8165 = vmatprep.mubr.bf16.mxu1 %v11225_v6  ;;  %v7058_v61 = vcombine.low %v11533_v26, %v11545_v27  ;;  %v4662_v7 = vrot.slane %v4660_v43, 4  ;;  %v11557_v47 = vcombine.low %v4283_v38, %v4293_v13  ;;  %v4654_v52 = vrot.slane %v4653_v42, 4  ;;  %v8773_v50 = vld [vmem:[#allocation3 + $0x450] sm:$0xff]   ;;  %v8774_v43 = vld [vmem:[#allocation3 + $0x458] sm:$0xff]   ;;  %v12622_v59 = vld [vmem:[#allocation13_spill] sm:$0xff] }
 0x38b   : > { %v4668_v37 = vrot.slane %v4666_v4, 5  ;;  %v12621_v5 = vld [vmem:[#allocation27_spill] sm:$0xff]  ;;  %v8775_v38 = vld [vmem:[#allocation3 + $0x460] sm:$0xff]   ;;  %v8776_v42 = vld [vmem:[#allocation3 + $0x468] sm:$0xff]  }
 0x38c   : > { %v4663_v56 = vor.u32 %v4662_v7, %v4658_v30  ;;  %v4659_v3 = vsel %vm9091_vm2, %v4654_v52, %v4658_v30  ;;  %v8778_v30 = vld [vmem:[#allocation3 + $0x478] sm:$0xff]   ;;  %v12627_v7 = vld [vmem:[#allocation14_spill] sm:$0xff] }
 0x38d   : > { %v12628_v13 = vld [vmem:[#allocation16_spill] sm:$0xff]  ;;  %v12630_v52 = vld [vmem:[#allocation22_spill] sm:$0xff] }
 0x38e   : > { %v4664_v55 = vrot.slane %v4663_v56, 4  ;;  %v12629_v4 = vld [vmem:[#allocation20_spill] sm:$0xff] }
 0x38f   : > { %4965 = vmatmul.mubr.bf16.gmra.mrb[208].mxu0 %v11431_v51  ;;  %v12631_v56 = vld [vmem:[#allocation24_spill] sm:$0xff] }
 0x390   : > { %4972 = vmatprep.mubr.bf16.mxu0 %v11538_v40  ;;  %v4669_v21 = vsel %vm9091_vm2, %v4664_v55, %v4668_v37 }
 0x391   : > { %8166 = vmatmul.mubr.bf16.gmra.mrb[116].mxu1 %v11239_v54  ;;  %v11567_v48 = vcombine.low %v4659_v3, %v4669_v21  ;;  %v5628_v3 = vshll.u32 %v11510_v36, 16  ;;  %v5634_v21 = vshll.u32 %v11512_v35, 16 }
 0x392   : > { %8169 = vmatprep.mubr.bf16.mxu1 %v11275_v57 }
 0x397   : > { %4973 = vmatmul.mubr.bf16.gmra.mrb[212].mxu0 %v11448_v46 }
 0x398   : > { %4980 = vmatprep.mubr.bf16.mxu0 %v11557_v47 }
 0x399   : > { %8170 = vmatmul.mubr.bf16.gmra.mrb[120].mxu1 %v12615_v39 }
 0x39a   : > { %8173 = vmatprep.mubr.bf16.mxu1 %v12616_v2 }
 0x39f   : > { %4981 = vmatmul.mubr.bf16.gmra.mrb[216].mxu0 %v11461_v16 }
 0x3a0   : > { %4988 = vmatprep.mubr.bf16.mxu0 %v11567_v48 }
 0x3a1   : > { %8174 = vmatmul.mubr.bf16.gmra.mrb[124].mxu1 %v12617_v23 }
 0x3a2   : > { %5846 = vmatprep.mubr.bf16.mxu1 %v12618_v60 }
 0x3a7   : > { %4989 = vmatmul.mubr.bf16.gmra.mrb[220].mxu0 %v11484_v25 }
 0x3a8   : > { %5334 = vmatprep.mubr.bf16.mxu0 %v6971_v58  ;;  %v12623_v58 = vld [vmem:[#allocation18_spill] sm:$0xff] }
 0x3a9   : > { %5847 = vmatmul.mubr.bf16.vlgmr.msra.gmra.mrb[128].mxu1 %v12619_v20 }
 0x3aa   : > { %5854 = vmatprep.mubr.bf16.mxu1 %v12620_v1  ;;  %8178 = vmatpush3.bf16.msra.mxu1 %v11497_v49  ;;  %v12624_v49 = vld [vmem:[#allocation29_spill] sm:$0xff] }
 0x3ab   : > { %8179 = vmatprep.subr.bf16.mxu1 %v8772_v44 }
 0x3ae   : > { %8180 = vmatpush3.bf16.msra.mxu1 %v8772_v44 }
 0x3af   : > { %5335 = vmatmul.mubr.bf16.vlgmr.msra.gmra.mrb[224].mxu0 %v6955_v32  ;;  %8181 = vmatprep.subr.bf16.mxu1 %v8773_v50  ;;  %v8777_v32 = vld [vmem:[#allocation3 + $0x470] sm:$0xff]  }
 0x3b0   : > { %5342 = vmatprep.mubr.bf16.mxu0 %v12621_v5 }
 0x3b1   : > { %5855 = vmatmul.mubr.bf16.gmra.mrb[132].mxu1 %v12622_v59 }
 0x3b2   : > { %5862 = vmatprep.mubr.bf16.mxu1 %v12623_v58  ;;  %8182 = vmatpush3.bf16.msra.mxu1 %v8773_v50 }
 0x3b3   : > { %8183 = vmatprep.subr.bf16.mxu1 %v8774_v43 }
 0x3b6   : > { %8184 = vmatpush3.bf16.msra.mxu1 %v8774_v43 }
 0x3b7   : > { %5343 = vmatmul.mubr.bf16.gmra.mrb[228].mxu0 %v12624_v49  ;;  %8185 = vmatprep.subr.bf16.mxu1 %v8775_v38 }
 0x3b8   : > { %5350 = vmatprep.mubr.bf16.mxu0 %v12618_v60  ;;  %v5638_v60 = vshrl.u32 %v11512_v35, 16 }
 0x3b9   : > { %5863 = vmatmul.mubr.bf16.gmra.mrb[136].mxu1 %v12625_v63 }
 0x3ba   : > { %5870 = vmatprep.mubr.bf16.mxu1 %v12626_v31  ;;  %8186 = vmatpush3.bf16.msra.mxu1 %v8775_v38 }
 0x3bb   : > { %8187 = vmatprep.subr.bf16.mxu1 %v8776_v42 }
 0x3be   : > { %8188 = vmatpush3.bf16.msra.mxu1 %v8776_v42 }
 0x3bf   : > { %5351 = vmatmul.mubr.bf16.gmra.mrb[232].mxu0 %v12619_v20  ;;  %8189 = vmatprep.subr.bf16.mxu1 %v8777_v32 }
 0x3c0   : > { %5358 = vmatprep.mubr.bf16.mxu0 %v12620_v1 }
 0x3c1   : > { %5871 = vmatmul.mubr.bf16.gmra.mrb[140].mxu1 %v12627_v7 }
 0x3c2   : > { %5878 = vmatprep.mubr.bf16.mxu1 %v12628_v13  ;;  %8190 = vmatpush3.bf16.msra.mxu1 %v8777_v32 }
 0x3c3   : > { %8191 = vmatprep.subr.bf16.mxu1 %v8778_v30 }
 0x3c6   : > { %8192 = vmatpush3.bf16.msra.mxu1 %v8778_v30 }
 0x3c7   : > { %5359 = vmatmul.mubr.bf16.gmra.mrb[236].mxu0 %v12622_v59  ;;  %v5640_v59 = vrot.slane %v5638_v60, 4 }
 0x3c8   : > { %5366 = vmatprep.mubr.bf16.mxu0 %v12623_v58  ;;  %v5644_v58 = vshll.u32 %v11515_v29, 16 }
 0x3c9   : > { %5879 = vmatmul.mubr.bf16.gmra.mrb[144].mxu1 %v12629_v4 }
 0x3ca   : > { %5886 = vmatprep.mubr.bf16.mxu1 %v12630_v52 }
 0x3cf   : > { %5367 = vmatmul.mubr.bf16.gmra.mrb[240].mxu0 %v12625_v63 }
 0x3d0   : > { %5374 = vmatprep.mubr.bf16.mxu0 %v12626_v31  ;;  %v5646_v31 = vrot.slane %v5644_v58, 5 }
 0x3d1   : > { %5887 = vmatmul.mubr.bf16.gmra.mrb[148].mxu1 %v12631_v56 }
 0x3d2   : > { %5894 = vmatprep.mubr.bf16.mxu1 %v11379_v14 }
 0x3d7   : > { %5375 = vmatmul.mubr.bf16.gmra.mrb[244].mxu0 %v12627_v7 }
 0x3d8   : > { %5382 = vmatprep.mubr.bf16.mxu0 %v12628_v13 }
 0x3d9   : > { %5895 = vmatmul.mubr.bf16.gmra.mrb[152].mxu1 %v11390_v28 }
 0x3da   : > { %5902 = vmatprep.mubr.bf16.mxu1 %v11403_v12 }
 0x3df   : > { %5383 = vmatmul.mubr.bf16.gmra.mrb[248].mxu0 %v12629_v4 }
 0x3e0   : > { %5390 = vmatprep.mubr.bf16.mxu0 %v12630_v52 }
 0x3e1   : > { %5903 = vmatmul.mubr.bf16.gmra.mrb[156].mxu1 %v11414_v9 }
 0x3e2   : > { %5910 = vmatprep.mubr.bf16.mxu1 %v11419_v62 }
 0x3e7   : > { %5391 = vmatmul.mubr.bf16.gmra.mrb[252].mxu0 %v12631_v56 }
 0x3e8   : > { %5398 = vmatprep.mubr.bf16.mxu0 %v11379_v14 }
 0x3e9   : > { %5911 = vmatmul.mubr.bf16.gmra.mrb[160].mxu1 %v11437_v10 }
 0x3ea   : > { %5918 = vmatprep.mubr.bf16.mxu1 %v11444_v8 }
 0x3ef   : > { %5399 = vmatmul.mubr.bf16.gmra.mrb[0].mxu0 %v11390_v28 }
 0x3f0   : > { %5406 = vmatprep.mubr.bf16.mxu0 %v11403_v12 }
 0x3f1   : > { %5919 = vmatmul.mubr.bf16.gmra.mrb[164].mxu1 %v11466_v15 }
 0x3f2   : > { %5926 = vmatprep.mubr.bf16.mxu1 %v11471_v24 }
 0x3f7   : > { %5407 = vmatmul.mubr.bf16.gmra.mrb[4].mxu0 %v11414_v9 }
 0x3f8   : > { %5414 = vmatprep.mubr.bf16.mxu0 %v11419_v62  ;;  %v5625_v62 = vshrl.u32 %v11510_v36, 16 }
 0x3f9   : > { %5927 = vmatmul.mubr.bf16.gmra.mrb[168].mxu1 %v11476_v18 }
 0x3fa   : > { %5934 = vmatprep.mubr.bf16.mxu1 %v11506_v45 }
 0x3ff   : > { %5415 = vmatmul.mubr.bf16.gmra.mrb[8].mxu0 %v11437_v10  ;;  %v5627_v10 = vrot.slane %v5625_v62, 4 }
 0x400   : > { %5422 = vmatprep.mubr.bf16.mxu0 %v11444_v8  ;;  %v5630_v8 = vrot.slane %v5628_v3, 5 }
 0x401   : > { %5935 = vmatmul.mubr.bf16.gmra.mrb[172].mxu1 %v11431_v51 }
 0x402   : > { %v7545_v14 = vpop.f32.mrb[160].mxu0  ;;  %5942 = vmatprep.mubr.bf16.mxu1 %v11538_v40  ;;  %v5631_v5 = vor.u32 %v5630_v8, %v5627_v10 }
 0x403   : > { %v7546_v28 = vpop.f32.mrb[161].mxu0 }
 0x404   : > { %v11623_v12 = vadd.f32 %v7546_v28, %v7545_v14  ;;  %v7548_v37 = vpop.f32.mrb[162].mxu0  ;;  %v5632_v38 = vrot.slane %v5631_v5, 4 }
 0x405   : > { %v7549_v9 = vpop.f32.mrb[163].mxu0 }
 0x406   : > { %v11627_v55 = vadd.f32 %v7549_v9, %v7548_v37 }
 0x407   : > { %5423 = vmatmul.mubr.bf16.gmra.mrb[12].mxu0 %v11466_v15  ;;  %v5636_v15 = vrot.slane %v5634_v21, 5 }
 0x408   : > { %5430 = vmatprep.mubr.bf16.mxu0 %v11471_v24 }
 0x409   : > { %5943 = vmatmul.mubr.bf16.gmra.mrb[176].mxu1 %v11448_v46  ;;  %v5641_v49 = vor.u32 %v5640_v59, %v5636_v15 }
 0x40a   : > { %v7551_v44 = vpop.f32.mrb[164].mxu0  ;;  %5950 = vmatprep.mubr.bf16.mxu1 %v11557_v47 }
 0x40b   : > { %v7552_v20 = vpop.f32.mrb[165].mxu0  ;;  %v5642_v13 = vrot.slane %v5641_v49, 4 }
 0x40c   : > { %v11635_v1 = vadd.f32 %v7552_v20, %v7551_v44  ;;  %v7554_v50 = vpop.f32.mrb[166].mxu0 }
 0x40d   : > { %v7555_v43 = vpop.f32.mrb[167].mxu0 }
 0x40e   : > { %v11637_v24 = vadd.f32 %v7555_v43, %v7554_v50 }
 0x40f   : > { %5431 = vmatmul.mubr.bf16.gmra.mrb[16].mxu0 %v11476_v18  ;;  %v5637_v18 = vsel %vm9091_vm2, %v5632_v38, %v5636_v15 }
 0x410   : > { %5438 = vmatprep.mubr.bf16.mxu0 %v11506_v45  ;;  %v5647_v45 = vsel %vm9091_vm2, %v5642_v13, %v5646_v31 }
 0x411   : > { %5951 = vmatmul.mubr.bf16.gmra.mrb[180].mxu1 %v11461_v16 }
 0x412   : > { %v7557_v42 = vpop.f32.mrb[168].mxu0  ;;  %5958 = vmatprep.mubr.bf16.mxu1 %v11567_v48  ;;  %v7057_v48 = vcombine.low %v5637_v18, %v5647_v45  ;;  %v12632_v45 = vld [vmem:[#allocation25_spill] sm:$0xff] }
 0x413   : > { %v7558_v63 = vpop.f32.mrb[169].mxu0 }
 0x414   : > { %v11644_v32 = vadd.f32 %v7558_v63, %v7557_v42  ;;  %v7560_v30 = vpop.f32.mrb[170].mxu0 }
 0x415   : > { %v7561_v7 = vpop.f32.mrb[171].mxu0 }
 0x416   : > { %v11648_v29 = vadd.f32 %v7561_v7, %v7560_v30 }
 0x417   : > { %5439 = vmatmul.mubr.bf16.gmra.mrb[20].mxu0 %v11431_v51 }
 0x418   : > { %5446 = vmatprep.mubr.bf16.mxu0 %v11538_v40 }
 0x419   : > { %5959 = vmatmul.mubr.bf16.gmra.mrb[184].mxu1 %v11484_v25 }
 0x41a   : > { %v7563_v4 = vpop.f32.mrb[172].mxu0  ;;  %5966 = vmatprep.mubr.bf16.mxu1 %v7057_v48 }
 0x41b   : > { %v7564_v52 = vpop.f32.mrb[173].mxu0 }
 0x41c   : > { %v11655_v56 = vadd.f32 %v7564_v52, %v7563_v4  ;;  %v7566_v14 = vpop.f32.mrb[174].mxu0 }
 0x41d   : > { %v7567_v28 = vpop.f32.mrb[175].mxu0 }
 0x41e   : > { %v11657_v37 = vadd.f32 %v7567_v28, %v7566_v14 }
 0x41f   : > { %5447 = vmatmul.mubr.bf16.gmra.mrb[24].mxu0 %v11448_v46 }
 0x420   : > { %5454 = vmatprep.mubr.bf16.mxu0 %v11557_v47 }
 0x421   : > { %5967 = vmatmul.mubr.bf16.gmra.mrb[188].mxu1 %v7056_v34 }
 0x422   : > { %v7569_v51 = vpop.f32.mrb[176].mxu0  ;;  %8193 = vmatprep.mubr.bf16.mxu1 %v11026_v22 }
 0x423   : > { %v7570_v25 = vpop.f32.mrb[177].mxu0 }
 0x424   : > { %v11664_v40 = vadd.f32 %v7570_v25, %v7569_v51  ;;  %v7572_v9 = vpop.f32.mrb[178].mxu0 }
 0x425   : > { %v7573_v62 = vpop.f32.mrb[179].mxu0 }
 0x426   : > { %v11666_v3 = vadd.f32 %v7573_v62, %v7572_v9 }
 0x427   : > { %5455 = vmatmul.mubr.bf16.gmra.mrb[28].mxu0 %v11461_v16 }
 0x429   : > { %8194 = vmatmul.mubr.bf16.vlgmr.msra.gmra.mrb[96].mxu1 %v11034_v11 }
 0x42a   : > { %v7575_v46 = vpop.f32.mrb[180].mxu0  ;;  %8197 = vmatprep.mubr.bf16.mxu1 %v11080_v33 }
 0x42b   : > { %v7576_v36 = vpop.f32.mrb[181].mxu0 }
 0x42c   : > { %v11671_v35 = vadd.f32 %v7576_v36, %v7575_v46  ;;  %v7578_v47 = vpop.f32.mrb[182].mxu0 }
 0x42d   : > { %v7579_v10 = vpop.f32.mrb[183].mxu0 }
 0x42e   : > { %v11673_v22 = vadd.f32 %v7579_v10, %v7578_v47 }
 0x431   : > { %8198 = vmatmul.mubr.bf16.gmra.mrb[100].mxu1 %v11098_v41 }
 0x432   : > { %v7581_v8 = vpop.f32.mrb[184].mxu0  ;;  %8201 = vmatprep.mubr.bf16.mxu1 %v11130_v53 }
 0x433   : > { %v7582_v21 = vpop.f32.mrb[185].mxu0 }
 0x434   : > { %v11677_v60 = vadd.f32 %v7582_v21, %v7581_v8  ;;  %v7584_v16 = vpop.f32.mrb[186].mxu0 }
 0x435   : > { %v7585_v11 = vpop.f32.mrb[187].mxu0 }
 0x436   : > { %v11679_v44 = vadd.f32 %v7585_v11, %v7584_v16 }
 0x439   : > { %8202 = vmatmul.mubr.bf16.gmra.mrb[104].mxu1 %v11144_v0 }
 0x43a   : > { %v7587_v33 = vpop.f32.mrb[188].mxu0  ;;  %8205 = vmatprep.mubr.bf16.mxu1 %v11185_v17 }
 0x43b   : > { %v7588_v20 = vpop.f32.mrb[189].mxu0 }
 0x43c   : > { %v11683_v50 = vadd.f32 %v7588_v20, %v7587_v33  ;;  %v7590_v43 = vpop.f32.mrb[190].mxu0 }
 0x43d   : > { %v7591_v41 = vpop.f32.mrb[191].mxu0 }
 0x43e   : > { %v11685_v5 = vadd.f32 %v7591_v41, %v7590_v43 }
 0x441   : > { %8206 = vmatmul.mubr.bf16.gmra.mrb[108].mxu1 %v11196_v19 }
 0x442   : > { %v7593_v53 = vpop.f32.mrb[192].mxu0  ;;  %8209 = vmatprep.mubr.bf16.mxu1 %v11225_v6 }
 0x443   : > { %v7594_v15 = vpop.f32.mrb[193].mxu0 }
 0x444   : > { %v11689_v59 = vadd.f32 %v7594_v15, %v7593_v53  ;;  %v7596_v58 = vpop.f32.mrb[194].mxu0 }
 0x445   : > { %v7597_v0 = vpop.f32.mrb[195].mxu0 }
 0x446   : > { %v11691_v38 = vadd.f32 %v7597_v0, %v7596_v58 }
 0x449   : > { %8210 = vmatmul.mubr.bf16.gmra.mrb[112].mxu1 %v11239_v54 }
 0x44a   : > { %v7599_v17 = vpop.f32.mrb[196].mxu0  ;;  %8213 = vmatprep.mubr.bf16.mxu1 %v11275_v57 }
 0x44b   : > { %v7600_v49 = vpop.f32.mrb[197].mxu0 }
 0x44c   : > { %v11695_v42 = vadd.f32 %v7600_v49, %v7599_v17  ;;  %v7602_v63 = vpop.f32.mrb[198].mxu0 }
 0x44d   : > { %v7603_v19 = vpop.f32.mrb[199].mxu0 }
 0x44e   : > { %v11697_v31 = vadd.f32 %v7603_v19, %v7602_v63 }
 0x451   : > { %8214 = vmatmul.mubr.bf16.gmra.mrb[116].mxu1 %v12615_v39 }
 0x452   : > { %v7605_v6 = vpop.f32.mrb[200].mxu0  ;;  %8217 = vmatprep.mubr.bf16.mxu1 %v12616_v2 }
 0x453   : > { %v7606_v30 = vpop.f32.mrb[201].mxu0 }
 0x454   : > { %v11701_v7 = vadd.f32 %v7606_v30, %v7605_v6  ;;  %v7608_v18 = vpop.f32.mrb[202].mxu0 }
 0x455   : > { %v7609_v54 = vpop.f32.mrb[203].mxu0 }
 0x456   : > { %v11703_v13 = vadd.f32 %v7609_v54, %v7608_v18 }
 0x459   : > { %8218 = vmatmul.mubr.bf16.gmra.mrb[120].mxu1 %v12617_v23 }
 0x45a   : > { %v7611_v57 = vpop.f32.mrb[204].mxu0  ;;  %8221 = vmatprep.mubr.bf16.mxu1 %v12632_v45 }
 0x45b   : > { %v7612_v48 = vpop.f32.mrb[205].mxu0 }
 0x45c   : > { %v11707_v4 = vadd.f32 %v7612_v48, %v7611_v57  ;;  %v7614_v52 = vpop.f32.mrb[206].mxu0 }
 0x45d   : > { %v7615_v39 = vpop.f32.mrb[207].mxu0 }
 0x45e   : > { %v11709_v14 = vadd.f32 %v7615_v39, %v7614_v52 }
 0x461   : > { %8222 = vmatmul.mubr.bf16.gmra.mrb[124].mxu1 %v7058_v61 }
 0x462   : > { %v7617_v2 = vpop.f32.mrb[208].mxu0 }
 0x463   : > { %v7618_v28 = vpop.f32.mrb[209].mxu0 }
 0x464   : > { %v11714_v34 = vadd.f32 %v7618_v28, %v7617_v2  ;;  %v7620_v51 = vpop.f32.mrb[210].mxu0 }
 0x465   : > { %v7621_v23 = vpop.f32.mrb[211].mxu0 }
 0x466   : > { %v11716_v25 = vadd.f32 %v7621_v23, %v7620_v51 }
 0x46a   : > { %v7623_v9 = vpop.f32.mrb[212].mxu0 }
 0x46b   : > { %v7624_v62 = vpop.f32.mrb[213].mxu0 }
 0x46c   : > { %v11718_v46 = vadd.f32 %v7624_v62, %v7623_v9  ;;  %v7626_v36 = vpop.f32.mrb[214].mxu0 }
 0x46d   : > { %v7627_v47 = vpop.f32.mrb[215].mxu0 }
 0x46e   : > { %v11720_v10 = vadd.f32 %v7627_v47, %v7626_v36 }
 0x472   : > { %v7629_v8 = vpop.f32.mrb[216].mxu0 }
 0x473   : > { %v7630_v21 = vpop.f32.mrb[217].mxu0 }
 0x474   : > { %v11722_v26 = vadd.f32 %v7630_v21, %v7629_v8  ;;  %v7632_v27 = vpop.f32.mrb[218].mxu0 }
 0x475   : > { %v7633_v61 = vpop.f32.mrb[219].mxu0 }
 0x476   : > { %v11724_v16 = vadd.f32 %v7633_v61, %v7632_v27 }
 0x47a   : > { %v7635_v11 = vpop.f32.mrb[220].mxu0 }
 0x47b   : > { %v7636_v33 = vpop.f32.mrb[221].mxu0 }
 0x47c   : > { %v11726_v20 = vadd.f32 %v7636_v33, %v7635_v11  ;;  %v7638_v43 = vpop.f32.mrb[222].mxu0  ;;  %v7817_v41 = vpop.f32.mrb[128].mxu1 }
 0x47d   : > { %v7639_v53 = vpop.f32.mrb[223].mxu0  ;;  %v7818_v15 = vpop.f32.mrb[129].mxu1 }
 0x47e   : > { %v11728_v58 = vadd.f32 %v7639_v53, %v7638_v43  ;;  %v7819_v0 = vadd.f32 %v7818_v15, %v7817_v41  ;;  %v7820_v17 = vpop.f32.mrb[130].mxu1 }
 0x47f   : > { %v7821_v49 = vpop.f32.mrb[131].mxu1 }
 0x480   : > { %v7822_v63 = vadd.f32 %v7821_v49, %v7820_v17 }
 0x482   : > { %v7681_v19 = vpop.f32.mrb[224].mxu0 }
 0x483   : > { %v7682_v6 = vpop.f32.mrb[225].mxu0 }
 0x484   : > { %v7683_v30 = vadd.f32 %v7682_v6, %v7681_v19  ;;  %v7684_v18 = vpop.f32.mrb[226].mxu0  ;;  %v7823_v54 = vpop.f32.mrb[132].mxu1 }
 0x485   : > { %v7685_v57 = vpop.f32.mrb[227].mxu0  ;;  %v7824_v45 = vpop.f32.mrb[133].mxu1 }
 0x486   : > { %v8356_v48 = vadd.f32 %v7683_v30, %v11623_v12  ;;  %v7686_v52 = vadd.f32 %v7685_v57, %v7684_v18  ;;  %v7825_v39 = vadd.f32 %v7824_v45, %v7823_v54  ;;  %v7826_v2 = vpop.f32.mrb[134].mxu1 }
 0x487   : > { %v7827_v28 = vpop.f32.mrb[135].mxu1 }
 0x488   : > { %v8362_v51 = vadd.f32 %v7686_v52, %v11627_v55  ;;  %v7828_v23 = vadd.f32 %v7827_v28, %v7826_v2  ;;  %v11732_v9 = vadd.f32 %v8356_v48, %v7819_v0 }
 0x48a   : > { %v7687_v62 = vpop.f32.mrb[228].mxu0  ;;  %v11734_v36 = vadd.f32 %v8362_v51, %v7822_v63 }
 0x48b   : > { %v7688_v47 = vpop.f32.mrb[229].mxu0 }
 0x48c   : > { %v7689_v8 = vadd.f32 %v7688_v47, %v7687_v62  ;;  %v7690_v21 = vpop.f32.mrb[230].mxu0  ;;  %v7829_v27 = vpop.f32.mrb[136].mxu1 }
 0x48d   : > { %v7691_v61 = vpop.f32.mrb[231].mxu0  ;;  %v7830_v11 = vpop.f32.mrb[137].mxu1 }
 0x48e   : > { %v8353_v12 = vadd.f32 %v7689_v8, %v11635_v1  ;;  %v7692_v33 = vadd.f32 %v7691_v61, %v7690_v21  ;;  %v7831_v43 = vadd.f32 %v7830_v11, %v7829_v27  ;;  %v7832_v41 = vpop.f32.mrb[138].mxu1 }
 0x48f   : > { %v7833_v53 = vpop.f32.mrb[139].mxu1 }
 0x490   : > { %v8359_v55 = vadd.f32 %v7692_v33, %v11637_v24  ;;  %v7834_v15 = vadd.f32 %v7833_v53, %v7832_v41  ;;  %v11738_v0 = vadd.f32 %v8353_v12, %v7825_v39 }
 0x492   : > { %v7693_v17 = vpop.f32.mrb[232].mxu0  ;;  %v11740_v49 = vadd.f32 %v8359_v55, %v7828_v23 }
 0x493   : > { %v7694_v63 = vpop.f32.mrb[233].mxu0 }
 0x494   : > { %v7695_v19 = vadd.f32 %v7694_v63, %v7693_v17  ;;  %v7696_v6 = vpop.f32.mrb[234].mxu0  ;;  %v7835_v30 = vpop.f32.mrb[140].mxu1 }
 0x495   : > { %v7697_v18 = vpop.f32.mrb[235].mxu0  ;;  %v7836_v54 = vpop.f32.mrb[141].mxu1 }
 0x496   : > { %v8368_v1 = vadd.f32 %v7695_v19, %v11644_v32  ;;  %v7698_v57 = vadd.f32 %v7697_v18, %v7696_v6  ;;  %v7837_v45 = vadd.f32 %v7836_v54, %v7835_v30  ;;  %v7838_v48 = vpop.f32.mrb[142].mxu1 }
 0x497   : > { %v7839_v52 = vpop.f32.mrb[143].mxu1 }
 0x498   : > { %v8374_v24 = vadd.f32 %v7698_v57, %v11648_v29  ;;  %v7840_v2 = vadd.f32 %v7839_v52, %v7838_v48  ;;  %v11744_v39 = vadd.f32 %v8368_v1, %v7831_v43 }
 0x49a   : > { %v7699_v28 = vpop.f32.mrb[236].mxu0  ;;  %v11746_v51 = vadd.f32 %v8374_v24, %v7834_v15 }
 0x49b   : > { %v7700_v23 = vpop.f32.mrb[237].mxu0 }
 0x49c   : > { %v7701_v62 = vadd.f32 %v7700_v23, %v7699_v28  ;;  %v7702_v47 = vpop.f32.mrb[238].mxu0  ;;  %v7841_v8 = vpop.f32.mrb[144].mxu1 }
 0x49d   : > { %v7703_v21 = vpop.f32.mrb[239].mxu0  ;;  %v7842_v27 = vpop.f32.mrb[145].mxu1 }
 0x49e   : > { %v8365_v32 = vadd.f32 %v7701_v62, %v11655_v56  ;;  %v7704_v61 = vadd.f32 %v7703_v21, %v7702_v47  ;;  %v7843_v11 = vadd.f32 %v7842_v27, %v7841_v8  ;;  %v7844_v12 = vpop.f32.mrb[146].mxu1 }
 0x49f   : > { %v7845_v33 = vpop.f32.mrb[147].mxu1 }
 0x4a0   : > { %v8371_v29 = vadd.f32 %v7704_v61, %v11657_v37  ;;  %v7846_v41 = vadd.f32 %v7845_v33, %v7844_v12  ;;  %v11750_v43 = vadd.f32 %v8365_v32, %v7837_v45 }
 0x4a2   : > { %v7705_v53 = vpop.f32.mrb[240].mxu0  ;;  %v11752_v55 = vadd.f32 %v8371_v29, %v7840_v2 }
 0x4a3   : > { %v7706_v15 = vpop.f32.mrb[241].mxu0 }
 0x4a4   : > { %v7707_v17 = vadd.f32 %v7706_v15, %v7705_v53  ;;  %v7708_v63 = vpop.f32.mrb[242].mxu0  ;;  %v7847_v19 = vpop.f32.mrb[148].mxu1 }
 0x4a5   : > { %v7709_v6 = vpop.f32.mrb[243].mxu0  ;;  %v7848_v30 = vpop.f32.mrb[149].mxu1 }
 0x4a6   : > { %v8380_v56 = vadd.f32 %v7707_v17, %v11664_v40  ;;  %v7710_v18 = vadd.f32 %v7709_v6, %v7708_v63  ;;  %v7849_v54 = vadd.f32 %v7848_v30, %v7847_v19  ;;  %v7850_v1 = vpop.f32.mrb[150].mxu1 }
 0x4a7   : > { %v7851_v57 = vpop.f32.mrb[151].mxu1 }
 0x4a8   : > { %v8386_v37 = vadd.f32 %v7710_v18, %v11666_v3  ;;  %v7852_v48 = vadd.f32 %v7851_v57, %v7850_v1  ;;  %v11756_v45 = vadd.f32 %v8380_v56, %v7843_v11 }
 0x4aa   : > { %v7711_v52 = vpop.f32.mrb[244].mxu0  ;;  %v11758_v24 = vadd.f32 %v8386_v37, %v7846_v41 }
 0x4ab   : > { %v7712_v2 = vpop.f32.mrb[245].mxu0 }
 0x4ac   : > { %v7713_v28 = vadd.f32 %v7712_v2, %v7711_v52  ;;  %v7714_v23 = vpop.f32.mrb[246].mxu0  ;;  %v7853_v62 = vpop.f32.mrb[152].mxu1 }
 0x4ad   : > { %v7715_v47 = vpop.f32.mrb[247].mxu0  ;;  %v7854_v8 = vpop.f32.mrb[153].mxu1 }
 0x4ae   : > { %v8377_v40 = vadd.f32 %v7713_v28, %v11671_v35  ;;  %v7716_v21 = vadd.f32 %v7715_v47, %v7714_v23  ;;  %v7855_v27 = vadd.f32 %v7854_v8, %v7853_v62  ;;  %v7856_v32 = vpop.f32.mrb[154].mxu1 }
 0x4af   : > { %v7857_v61 = vpop.f32.mrb[155].mxu1 }
 0x4b0   : > { %v8383_v3 = vadd.f32 %v7716_v21, %v11673_v22  ;;  %v7858_v12 = vadd.f32 %v7857_v61, %v7856_v32  ;;  %v11762_v11 = vadd.f32 %v8377_v40, %v7849_v54 }
 0x4b2   : > { %v7717_v33 = vpop.f32.mrb[248].mxu0  ;;  %v11764_v29 = vadd.f32 %v8383_v3, %v7852_v48 }
 0x4b3   : > { %v7718_v41 = vpop.f32.mrb[249].mxu0 }
 0x4b4   : > { %v7719_v53 = vadd.f32 %v7718_v41, %v7717_v33  ;;  %v7720_v15 = vpop.f32.mrb[250].mxu0  ;;  %v7859_v17 = vpop.f32.mrb[156].mxu1 }
 0x4b5   : > { %v7721_v63 = vpop.f32.mrb[251].mxu0  ;;  %v7860_v19 = vpop.f32.mrb[157].mxu1 }
 0x4b6   : > { %v8392_v35 = vadd.f32 %v7719_v53, %v11677_v60  ;;  %v7722_v6 = vadd.f32 %v7721_v63, %v7720_v15  ;;  %v7861_v30 = vadd.f32 %v7860_v19, %v7859_v17  ;;  %v7862_v56 = vpop.f32.mrb[158].mxu1 }
 0x4b7   : > { %v7863_v18 = vpop.f32.mrb[159].mxu1 }
 0x4b8   : > { %v8398_v22 = vadd.f32 %v7722_v6, %v11679_v44  ;;  %v7864_v1 = vadd.f32 %v7863_v18, %v7862_v56  ;;  %v11768_v54 = vadd.f32 %v8392_v35, %v7855_v27 }
 0x4ba   : > { %v7723_v57 = vpop.f32.mrb[252].mxu0  ;;  %v11770_v37 = vadd.f32 %v8398_v22, %v7858_v12 }
 0x4bb   : > { %v7724_v48 = vpop.f32.mrb[253].mxu0 }
 0x4bc   : > { %v7725_v52 = vadd.f32 %v7724_v48, %v7723_v57  ;;  %v7726_v2 = vpop.f32.mrb[254].mxu0  ;;  %v7865_v28 = vpop.f32.mrb[160].mxu1 }
 0x4bd   : > { %v7727_v23 = vpop.f32.mrb[255].mxu0  ;;  %v7866_v62 = vpop.f32.mrb[161].mxu1 }
 0x4be   : > { %v8389_v60 = vadd.f32 %v7725_v52, %v11683_v50  ;;  %v7728_v47 = vadd.f32 %v7727_v23, %v7726_v2  ;;  %v7867_v8 = vadd.f32 %v7866_v62, %v7865_v28  ;;  %v7868_v40 = vpop.f32.mrb[162].mxu1 }
 0x4bf   : > { %v7869_v21 = vpop.f32.mrb[163].mxu1 }
 0x4c0   : > { %v8395_v44 = vadd.f32 %v7728_v47, %v11685_v5  ;;  %v7870_v32 = vadd.f32 %v7869_v21, %v7868_v40  ;;  %v11774_v27 = vadd.f32 %v8389_v60, %v7861_v30 }
 0x4c2   : > { %v7729_v61 = vpop.f32.mrb[0].mxu0  ;;  %v11776_v3 = vadd.f32 %v8395_v44, %v7864_v1 }
 0x4c3   : > { %v7730_v12 = vpop.f32.mrb[1].mxu0 }
 0x4c4   : > { %v7731_v33 = vadd.f32 %v7730_v12, %v7729_v61  ;;  %v7732_v41 = vpop.f32.mrb[2].mxu0  ;;  %v7871_v53 = vpop.f32.mrb[164].mxu1 }
 0x4c5   : > { %v7733_v15 = vpop.f32.mrb[3].mxu0  ;;  %v7872_v17 = vpop.f32.mrb[165].mxu1 }
 0x4c6   : > { %v8404_v50 = vadd.f32 %v7731_v33, %v11689_v59  ;;  %v7734_v63 = vadd.f32 %v7733_v15, %v7732_v41  ;;  %v7873_v19 = vadd.f32 %v7872_v17, %v7871_v53  ;;  %v7874_v35 = vpop.f32.mrb[166].mxu1 }
 0x4c7   : > { %v7875_v6 = vpop.f32.mrb[167].mxu1 }
 0x4c8   : > { %v8410_v5 = vadd.f32 %v7734_v63, %v11691_v38  ;;  %v7876_v56 = vadd.f32 %v7875_v6, %v7874_v35  ;;  %v11780_v30 = vadd.f32 %v8404_v50, %v7867_v8 }
 0x4ca   : > { %v7735_v18 = vpop.f32.mrb[4].mxu0  ;;  %v11782_v22 = vadd.f32 %v8410_v5, %v7870_v32 }
 0x4cb   : > { %v7736_v1 = vpop.f32.mrb[5].mxu0 }
 0x4cc   : > { %v7737_v57 = vadd.f32 %v7736_v1, %v7735_v18  ;;  %v7738_v48 = vpop.f32.mrb[6].mxu0  ;;  %v7877_v52 = vpop.f32.mrb[168].mxu1 }
 0x4cd   : > { %v7739_v2 = vpop.f32.mrb[7].mxu0  ;;  %v7878_v28 = vpop.f32.mrb[169].mxu1 }
 0x4ce   : > { %v8401_v59 = vadd.f32 %v7737_v57, %v11695_v42  ;;  %v7740_v23 = vadd.f32 %v7739_v2, %v7738_v48  ;;  %v7879_v62 = vadd.f32 %v7878_v28, %v7877_v52  ;;  %v7880_v60 = vpop.f32.mrb[170].mxu1 }
 0x4cf   : > { %v7881_v47 = vpop.f32.mrb[171].mxu1 }
 0x4d0   : > { %v8407_v38 = vadd.f32 %v7740_v23, %v11697_v31  ;;  %v7882_v40 = vadd.f32 %v7881_v47, %v7880_v60  ;;  %v11786_v8 = vadd.f32 %v8401_v59, %v7873_v19 }
 0x4d2   : > { %v7741_v21 = vpop.f32.mrb[8].mxu0  ;;  %v11788_v44 = vadd.f32 %v8407_v38, %v7876_v56 }
 0x4d3   : > { %v7742_v32 = vpop.f32.mrb[9].mxu0 }
 0x4d4   : > { %v7743_v61 = vadd.f32 %v7742_v32, %v7741_v21  ;;  %v7744_v12 = vpop.f32.mrb[10].mxu0  ;;  %v7883_v33 = vpop.f32.mrb[172].mxu1 }
 0x4d5   : > { %v7745_v41 = vpop.f32.mrb[11].mxu0  ;;  %v7884_v53 = vpop.f32.mrb[173].mxu1 }
 0x4d6   : > { %v8416_v42 = vadd.f32 %v7743_v61, %v11701_v7  ;;  %v7746_v15 = vadd.f32 %v7745_v41, %v7744_v12  ;;  %v7885_v17 = vadd.f32 %v7884_v53, %v7883_v33  ;;  %v7886_v50 = vpop.f32.mrb[174].mxu1 }
 0x4d7   : > { %v7887_v63 = vpop.f32.mrb[175].mxu1 }
 0x4d8   : > { %v8422_v31 = vadd.f32 %v7746_v15, %v11703_v13  ;;  %v7888_v35 = vadd.f32 %v7887_v63, %v7886_v50  ;;  %v11792_v19 = vadd.f32 %v8416_v42, %v7879_v62 }
 0x4da   : > { %v7747_v6 = vpop.f32.mrb[12].mxu0  ;;  %v11794_v5 = vadd.f32 %v8422_v31, %v7882_v40 }
 0x4db   : > { %v7748_v56 = vpop.f32.mrb[13].mxu0 }
 0x4dc   : > { %v7749_v18 = vadd.f32 %v7748_v56, %v7747_v6  ;;  %v7750_v1 = vpop.f32.mrb[14].mxu0  ;;  %v7889_v57 = vpop.f32.mrb[176].mxu1 }
 0x4dd   : > { %v7751_v48 = vpop.f32.mrb[15].mxu0  ;;  %v7890_v52 = vpop.f32.mrb[177].mxu1 }
 0x4de   : > { %v8413_v7 = vadd.f32 %v7749_v18, %v11707_v4  ;;  %v7752_v2 = vadd.f32 %v7751_v48, %v7750_v1  ;;  %v7891_v28 = vadd.f32 %v7890_v52, %v7889_v57  ;;  %v7892_v59 = vpop.f32.mrb[178].mxu1 }
 0x4df   : > { %v7893_v23 = vpop.f32.mrb[179].mxu1 }
 0x4e0   : > { %v8419_v13 = vadd.f32 %v7752_v2, %v11709_v14  ;;  %v7894_v60 = vadd.f32 %v7893_v23, %v7892_v59  ;;  %v11798_v62 = vadd.f32 %v8413_v7, %v7885_v17 }
 0x4e2   : > { %v7753_v47 = vpop.f32.mrb[16].mxu0  ;;  %v11800_v38 = vadd.f32 %v8419_v13, %v7888_v35 }
 0x4e3   : > { %v7754_v40 = vpop.f32.mrb[17].mxu0 }
 0x4e4   : > { %v7755_v21 = vadd.f32 %v7754_v40, %v7753_v47  ;;  %v7756_v32 = vpop.f32.mrb[18].mxu0  ;;  %v7895_v61 = vpop.f32.mrb[180].mxu1 }
 0x4e5   : > { %v7757_v12 = vpop.f32.mrb[19].mxu0  ;;  %v7896_v33 = vpop.f32.mrb[181].mxu1 }
 0x4e6   : > { %v8428_v4 = vadd.f32 %v7755_v21, %v11714_v34  ;;  %v7758_v41 = vadd.f32 %v7757_v12, %v7756_v32  ;;  %v7897_v53 = vadd.f32 %v7896_v33, %v7895_v61  ;;  %v7898_v42 = vpop.f32.mrb[182].mxu1 }
 0x4e7   : > { %v7899_v15 = vpop.f32.mrb[183].mxu1 }
 0x4e8   : > { %v8434_v14 = vadd.f32 %v7758_v41, %v11716_v25  ;;  %v7900_v50 = vadd.f32 %v7899_v15, %v7898_v42  ;;  %v11804_v17 = vadd.f32 %v8428_v4, %v7891_v28 }
 0x4ea   : > { %v7759_v63 = vpop.f32.mrb[20].mxu0  ;;  %v11806_v31 = vadd.f32 %v8434_v14, %v7894_v60 }
 0x4eb   : > { %v7760_v35 = vpop.f32.mrb[21].mxu0 }
 0x4ec   : > { %v7761_v6 = vadd.f32 %v7760_v35, %v7759_v63  ;;  %v7762_v56 = vpop.f32.mrb[22].mxu0  ;;  %v7901_v18 = vpop.f32.mrb[184].mxu1 }
 0x4ed   : > { %v7763_v1 = vpop.f32.mrb[23].mxu0  ;;  %v7902_v57 = vpop.f32.mrb[185].mxu1 }
 0x4ee   : > { %v8425_v34 = vadd.f32 %v7761_v6, %v11718_v46  ;;  %v7764_v48 = vadd.f32 %v7763_v1, %v7762_v56  ;;  %v7903_v52 = vadd.f32 %v7902_v57, %v7901_v18  ;;  %v7904_v7 = vpop.f32.mrb[186].mxu1 }
 0x4ef   : > { %v7905_v2 = vpop.f32.mrb[187].mxu1 }
 0x4f0   : > { %v8431_v25 = vadd.f32 %v7764_v48, %v11720_v10  ;;  %v7906_v59 = vadd.f32 %v7905_v2, %v7904_v7  ;;  %v11810_v28 = vadd.f32 %v8425_v34, %v7897_v53 }
 0x4f2   : > { %v7765_v23 = vpop.f32.mrb[24].mxu0  ;;  %v11812_v13 = vadd.f32 %v8431_v25, %v7900_v50 }
 0x4f3   : > { %v7766_v60 = vpop.f32.mrb[25].mxu0 }
 0x4f4   : > { %v7767_v47 = vadd.f32 %v7766_v60, %v7765_v23  ;;  %v7768_v40 = vpop.f32.mrb[26].mxu0  ;;  %v7907_v21 = vpop.f32.mrb[188].mxu1 }
 0x4f5   : > { %v7769_v32 = vpop.f32.mrb[27].mxu0  ;;  %v7908_v61 = vpop.f32.mrb[189].mxu1 }
 0x4f6   : > { %v8440_v46 = vadd.f32 %v7767_v47, %v11722_v26  ;;  %v7770_v12 = vadd.f32 %v7769_v32, %v7768_v40  ;;  %v7909_v33 = vadd.f32 %v7908_v61, %v7907_v21  ;;  %v7910_v4 = vpop.f32.mrb[190].mxu1 }
 0x4f7   : > { %v7911_v41 = vpop.f32.mrb[191].mxu1 }
 0x4f8   : > { %v8446_v10 = vadd.f32 %v7770_v12, %v11724_v16  ;;  %v7912_v42 = vadd.f32 %v7911_v41, %v7910_v4  ;;  %v11816_v53 = vadd.f32 %v8440_v46, %v7903_v52 }
 0x4fa   : > { %v7771_v15 = vpop.f32.mrb[28].mxu0  ;;  %v11818_v14 = vadd.f32 %v8446_v10, %v7906_v59 }
 0x4fb   : > { %v7772_v50 = vpop.f32.mrb[29].mxu0 }
 0x4fc   : > { %v7773_v63 = vadd.f32 %v7772_v50, %v7771_v15  ;;  %v7774_v35 = vpop.f32.mrb[30].mxu0  ;;  %v8195_v6 = vpop.f32.mrb[96].mxu1 }
 0x4fd   : > { %v11821_v56 = vadd.f32 %v11738_v0, %v8195_v6  ;;  %v7775_v26 = vpop.f32.mrb[31].mxu0  ;;  %v6009_v18 = vpop.f32.mrb[97].mxu1 }
 0x4fe   : > { %v8437_v1 = vadd.f32 %v7773_v63, %v11726_v20  ;;  %v7776_v57 = vadd.f32 %v7775_v26, %v7774_v35  ;;  %v11825_v16 = vadd.f32 %v11732_v9, %v6009_v18  ;;  %v8196_v34 = vpop.f32.mrb[98].mxu1 }
 0x4ff   : > { %v11828_v48 = vadd.f32 %v11740_v49, %v8196_v34  ;;  %v6012_v52 = vpop.f32.mrb[99].mxu1  ;;  %v6208_v49 = vmul.f32 %v11821_v56, %v11821_v56 }
 0x500   : > { %v8443_v7 = vadd.f32 %v7776_v57, %v11728_v58  ;;  %v11832_v2 = vadd.f32 %v11734_v36, %v6012_v52  ;;  %v11834_v0 = vadd.f32 %v8437_v1, %v7909_v33  ;;  %v6206_v25 = vmul.f32 %v11825_v16, %v11825_v16 }
 0x501   : > { %v6209_v40 = vmul.f32 %v11828_v48, %v11828_v48 }
 0x502   : > { %v6168_v20 = vadd.f32 %v11832_v2, %v11825_v16  ;;  %v6207_v9 = vmul.f32 %v11832_v2, %v11832_v2  ;;  %v11842_v59 = vadd.f32 %v8443_v7, %v7912_v42 }
 0x504   : > { %v6169_v58 = vadd.f32 %v11821_v56, %v6168_v20  ;;  %v6238_v36 = vadd.f32 %v6207_v9, %v6206_v25  ;;  %v8199_v23 = vpop.f32.mrb[100].mxu1 }
 0x505   : > { %v11848_v60 = vadd.f32 %v11750_v43, %v8199_v23  ;;  %v6025_v47 = vpop.f32.mrb[101].mxu1 }
 0x506   : > { %v6239_v21 = vadd.f32 %v6238_v36, %v6208_v49  ;;  %v11853_v32 = vadd.f32 %v11744_v39, %v6025_v47  ;;  %v6170_v61 = vadd.f32 %v11828_v48, %v6169_v58  ;;  %v8200_v46 = vpop.f32.mrb[102].mxu1 }
 0x507   : > { %v11857_v12 = vadd.f32 %v11752_v55, %v8200_v46  ;;  %v6028_v33 = vpop.f32.mrb[103].mxu1  ;;  %v6212_v55 = vmul.f32 %v11848_v60, %v11848_v60 }
 0x508   : > { %v6171_v4 = vadd.f32 %v11853_v32, %v6170_v61  ;;  %v6210_v43 = vmul.f32 %v11853_v32, %v11853_v32  ;;  %v6240_v41 = vadd.f32 %v6239_v21, %v6209_v40  ;;  %v11863_v10 = vadd.f32 %v11746_v51, %v6028_v33 }
 0x509   : > { %v6213_v51 = vmul.f32 %v11857_v12, %v11857_v12 }
 0x50a   : > { %v6241_v42 = vadd.f32 %v6240_v41, %v6210_v43  ;;  %v6172_v39 = vadd.f32 %v11863_v10, %v6171_v4  ;;  %v6211_v15 = vmul.f32 %v11863_v10, %v11863_v10 }
 0x50c   : > { %v6173_v50 = vadd.f32 %v11848_v60, %v6172_v39  ;;  %v6242_v63 = vadd.f32 %v6241_v42, %v6211_v15  ;;  %v8203_v35 = vpop.f32.mrb[104].mxu1 }
 0x50d   : > { %v11872_v6 = vadd.f32 %v11762_v11, %v8203_v35  ;;  %v6041_v26 = vpop.f32.mrb[105].mxu1 }
 0x50e   : > { %v6243_v18 = vadd.f32 %v6242_v63, %v6212_v55  ;;  %v11877_v1 = vadd.f32 %v11756_v45, %v6041_v26  ;;  %v6174_v57 = vadd.f32 %v11857_v12, %v6173_v50  ;;  %v8204_v34 = vpop.f32.mrb[106].mxu1 }
 0x50f   : > { %v11881_v52 = vadd.f32 %v11764_v29, %v8204_v34  ;;  %v6044_v7 = vpop.f32.mrb[107].mxu1  ;;  %v6216_v29 = vmul.f32 %v11872_v6, %v11872_v6 }
 0x510   : > { %v6175_v25 = vadd.f32 %v11877_v1, %v6174_v57  ;;  %v6214_v11 = vmul.f32 %v11877_v1, %v11877_v1  ;;  %v6244_v20 = vadd.f32 %v6243_v18, %v6213_v51  ;;  %v11887_v9 = vadd.f32 %v11758_v24, %v6044_v7 }
 0x511   : > { %v6217_v24 = vmul.f32 %v11881_v52, %v11881_v52 }
 0x512   : > { %v6245_v49 = vadd.f32 %v6244_v20, %v6214_v11  ;;  %v6176_v45 = vadd.f32 %v11887_v9, %v6175_v25  ;;  %v6215_v58 = vmul.f32 %v11887_v9, %v11887_v9 }
 0x514   : > { %v6177_v36 = vadd.f32 %v11872_v6, %v6176_v45  ;;  %v6246_v23 = vadd.f32 %v6245_v49, %v6215_v58  ;;  %v8207_v47 = vpop.f32.mrb[108].mxu1 }
 0x515   : > { %v11896_v40 = vadd.f32 %v11774_v27, %v8207_v47  ;;  %v6057_v21 = vpop.f32.mrb[109].mxu1 }
 0x516   : > { %v6247_v61 = vadd.f32 %v6246_v23, %v6216_v29  ;;  %v11901_v46 = vadd.f32 %v11768_v54, %v6057_v21  ;;  %v6178_v33 = vadd.f32 %v11881_v52, %v6177_v36  ;;  %v8208_v4 = vpop.f32.mrb[110].mxu1 }
 0x517   : > { %v11905_v43 = vadd.f32 %v11776_v3, %v8208_v4  ;;  %v6060_v41 = vpop.f32.mrb[111].mxu1  ;;  %v6220_v3 = vmul.f32 %v11896_v40, %v11896_v40 }
 0x518   : > { %v6179_v42 = vadd.f32 %v11901_v46, %v6178_v33  ;;  %v6218_v27 = vmul.f32 %v11901_v46, %v11901_v46  ;;  %v6248_v39 = vadd.f32 %v6247_v61, %v6217_v24  ;;  %v11911_v15 = vadd.f32 %v11770_v37, %v6060_v41 }
 0x519   : > { %v6221_v37 = vmul.f32 %v11905_v43, %v11905_v43 }
 0x51a   : > { %v6249_v55 = vadd.f32 %v6248_v39, %v6218_v27  ;;  %v6180_v54 = vadd.f32 %v11911_v15, %v6179_v42  ;;  %v6219_v50 = vmul.f32 %v11911_v15, %v11911_v15 }
 0x51c   : > { %v6181_v63 = vadd.f32 %v11896_v40, %v6180_v54  ;;  %v6250_v35 = vadd.f32 %v6249_v55, %v6219_v50  ;;  %v8211_v26 = vpop.f32.mrb[112].mxu1 }
 0x51d   : > { %v11920_v51 = vadd.f32 %v11786_v8, %v8211_v26  ;;  %v6073_v18 = vpop.f32.mrb[113].mxu1 }
 0x51e   : > { %v6251_v57 = vadd.f32 %v6250_v35, %v6220_v3  ;;  %v11925_v34 = vadd.f32 %v11780_v30, %v6073_v18  ;;  %v6182_v7 = vadd.f32 %v11905_v43, %v6181_v63  ;;  %v8212_v25 = vpop.f32.mrb[114].mxu1 }
 0x51f   : > { %12633 = vst [vmem:[#allocation28_spill] sm:$0xff] %v11920_v51  ;;  %v11929_v11 = vadd.f32 %v11788_v44, %v8212_v25  ;;  %v6076_v20 = vpop.f32.mrb[115].mxu1  ;;  %v6224_v44 = vmul.f32 %v11920_v51, %v11920_v51 }
 0x520   : > { %v6183_v49 = vadd.f32 %v11925_v34, %v6182_v7  ;;  %v6222_v8 = vmul.f32 %v11925_v34, %v11925_v34  ;;  %v6252_v45 = vadd.f32 %v6251_v57, %v6221_v37  ;;  %v11935_v58 = vadd.f32 %v11782_v22, %v6076_v20 }
 0x521   : > { %12634 = vst [vmem:[#allocation9_spill] sm:$0xff] %v11929_v11  ;;  %v6225_v22 = vmul.f32 %v11929_v11, %v11929_v11 }
 0x522   : > { %v6253_v29 = vadd.f32 %v6252_v45, %v6222_v8  ;;  %v6184_v30 = vadd.f32 %v11935_v58, %v6183_v49  ;;  %v6223_v36 = vmul.f32 %v11935_v58, %v11935_v58 }
 0x524   : > { %v6185_v23 = vadd.f32 %v11920_v51, %v6184_v30  ;;  %v6254_v47 = vadd.f32 %v6253_v29, %v6223_v36  ;;  %v8215_v21 = vpop.f32.mrb[116].mxu1 }
 0x525   : > { %v11944_v24 = vadd.f32 %v11798_v62, %v8215_v21  ;;  %v6089_v61 = vpop.f32.mrb[117].mxu1 }
 0x526   : > { %v6255_v33 = vadd.f32 %v6254_v47, %v6224_v44  ;;  %v11949_v4 = vadd.f32 %v11792_v19, %v6089_v61  ;;  %v6186_v41 = vadd.f32 %v11929_v11, %v6185_v23  ;;  %v8216_v42 = vpop.f32.mrb[118].mxu1 }
 0x527   : > { %12635 = vst [vmem:[#allocation19_spill] sm:$0xff] %v11944_v24  ;;  %v11953_v27 = vadd.f32 %v11800_v38, %v8216_v42  ;;  %v6092_v39 = vpop.f32.mrb[119].mxu1  ;;  %v6228_v38 = vmul.f32 %v11944_v24, %v11944_v24 }
 0x528   : > { %12636 = vst [vmem:[#allocation21_spill] sm:$0xff] %v11949_v4  ;;  %v6187_v55 = vadd.f32 %v11949_v4, %v6186_v41  ;;  %v6226_v62 = vmul.f32 %v11949_v4, %v11949_v4  ;;  %v6256_v54 = vadd.f32 %v6255_v33, %v6225_v22  ;;  %v11959_v50 = vadd.f32 %v11794_v5, %v6092_v39 }
 0x529   : > { %12637 = vst [vmem:[#allocation23_spill] sm:$0xff] %v11953_v27  ;;  %v6229_v5 = vmul.f32 %v11953_v27, %v11953_v27 }
 0x52a   : > { %12638 = vst [vmem:[#allocation10_spill] sm:$0xff] %v11959_v50  ;;  %v6257_v3 = vadd.f32 %v6256_v54, %v6226_v62  ;;  %v6188_v19 = vadd.f32 %v11959_v50, %v6187_v55  ;;  %v6227_v63 = vmul.f32 %v11959_v50, %v11959_v50  ;;  %v8813_v62 = vld [vmem:[%s9072_s26 + $0x14] sm:$0x1] }
 0x52b   : > { %v6360_v54 = vunpack.c.l.bf16 %v8813_v62  ;;  %v12054_v62 = vld [vmem:[%s9072_s26 + $0x80] sm:$0x1] }
 0x52c   : > { %v6189_v35 = vadd.f32 %v11944_v24, %v6188_v19  ;;  %v6258_v26 = vadd.f32 %v6257_v3, %v6227_v63  ;;  %v8219_v18 = vpop.f32.mrb[120].mxu1 }
 0x52d   : > { %v11968_v37 = vadd.f32 %v11810_v28, %v8219_v18  ;;  %v6105_v57 = vpop.f32.mrb[121].mxu1  ;;  %v12013_v18 = vrot.slane %v6360_v54, 1 }
 0x52e   : > { %v6259_v7 = vadd.f32 %v6258_v26, %v6228_v38  ;;  %v11973_v25 = vadd.f32 %v11804_v17, %v6105_v57  ;;  %v6190_v20 = vadd.f32 %v11953_v27, %v6189_v35  ;;  %v8220_v49 = vpop.f32.mrb[122].mxu1  ;;  %v12016_v57 = vld [vmem:[%s9072_s26 + $0x20] sm:$0x1] }
 0x52f   : > { %12639 = vst [vmem:[#allocation11_spill] sm:$0xff] %v11968_v37  ;;  %v11977_v8 = vadd.f32 %v11812_v13, %v8220_v49  ;;  %v6108_v45 = vpop.f32.mrb[123].mxu1  ;;  %v6232_v13 = vmul.f32 %v11968_v37, %v11968_v37 }
 0x530   : > { %12640 = vst [vmem:[#allocation12_spill] sm:$0xff] %v11973_v25  ;;  %v6191_v29 = vadd.f32 %v11973_v25, %v6190_v20  ;;  %v6230_v28 = vmul.f32 %v11973_v25, %v11973_v25  ;;  %v6260_v30 = vadd.f32 %v6259_v7, %v6229_v5  ;;  %v11983_v36 = vadd.f32 %v11806_v31, %v6108_v45  ;;  %v12020_v7 = vld [vmem:[%s9072_s26 + $0x2c] sm:$0x1] }
 0x531   : > { %12641 = vst [vmem:[#allocation27_spill] sm:$0xff] %v11977_v8  ;;  %v6233_v31 = vmul.f32 %v11977_v8, %v11977_v8  ;;  %v6363_v5 = vunpack.c.l.bf16 %v12016_v57 }
 0x532   : > { %12642 = vst [vmem:[#allocation13_spill] sm:$0xff] %v11983_v36  ;;  %v6261_v44 = vadd.f32 %v6260_v30, %v6230_v28  ;;  %v6192_v17 = vadd.f32 %v11983_v36, %v6191_v29  ;;  %v6231_v23 = vmul.f32 %v11983_v36, %v11983_v36  ;;  %v12027_v29 = vld [vmem:[%s9072_s26 + $0x38] sm:$0x1]  ;;  %v12031_v30 = vld [vmem:[%s9072_s26 + $0x44] sm:$0x1]  ;;  %v12646_v36 = vld [vmem:[#allocation26_spill] sm:$0xff] }
 0x533   : > { %v6369_v28 = vunpack.c.l.bf16 %v12027_v29 }
 0x534   : > { %v6193_v47 = vadd.f32 %v11968_v37, %v6192_v17  ;;  %v6262_v21 = vadd.f32 %v6261_v44, %v6231_v23  ;;  %v8223_v61 = vpop.f32.mrb[124].mxu1  ;;  %v12035_v17 = vld [vmem:[%s9072_s26 + $0x50] sm:$0x1] }
 0x535   : > { %v11992_v22 = vadd.f32 %v11834_v0, %v8223_v61  ;;  %v6121_v33 = vpop.f32.mrb[125].mxu1  ;;  %v8831_v61 = vld [vmem:[%s9072_s26 + $0x10] sm:$0xf]  ;;  %v6473_v11 = vrot.slane %v6369_v28, 1 }
 0x536   : > { %v6263_v41 = vadd.f32 %v6262_v21, %v6232_v13  ;;  %v11997_v42 = vadd.f32 %v11816_v53, %v6121_v33  ;;  %v6194_v39 = vadd.f32 %v11977_v8, %v6193_v47  ;;  %v8224_v55 = vpop.f32.mrb[126].mxu1  ;;  %v12039_v13 = vld [vmem:[%s9072_s26 + $0x5c] sm:$0x1]  ;;  %v12043_v21 = vld [vmem:[%s9072_s26 + $0x68] sm:$0x1]  ;;  %v6359_v44 = vunpack.c.l.bf16 %v8831_v61 }
 0x537   : > { %12643 = vst [vmem:[#allocation18_spill] sm:$0xff] %v11992_v22  ;;  %v12002_v3 = vadd.f32 %v11842_v59, %v8224_v55  ;;  %v6124_v0 = vpop.f32.mrb[127].mxu1  ;;  %v6236_v20 = vmul.f32 %v11992_v22, %v11992_v22  ;;  %v8829_v55 = vld [vmem:[%s9072_s26 + $0x1c] sm:$0xf]  ;;  %v8830_v47 = vld [vmem:[%s9072_s26 + $0xc] sm:$0xf] }
 0x538   : > { %12644 = vst [vmem:[#allocation29_spill] sm:$0xff] %v11997_v42  ;;  %v6195_v19 = vadd.f32 %v11997_v42, %v6194_v39  ;;  %v6234_v63 = vmul.f32 %v11997_v42, %v11997_v42  ;;  %v6264_v38 = vadd.f32 %v6263_v41, %v6233_v31  ;;  %v12008_v53 = vadd.f32 %v11818_v14, %v6124_v0  ;;  %v12050_v39 = vld [vmem:[%s9072_s26 + $0x74] sm:$0x1]  ;;  %v12058_v0 = vld [vmem:[%s9072_s26 + $0x8c] sm:$0x1] }
 0x539   : > { %12645 = vst [vmem:[#allocation17_spill] sm:$0xff] %v12002_v3  ;;  %v6237_v33 = vmul.f32 %v12002_v3, %v12002_v3  ;;  %v6362_v54 = vunpack.c.l.bf16 %v8829_v55  ;;  %v8832_v23 = vld [vmem:[%s9072_s26 + $0x30] sm:$0xf]  ;;  %v8835_v42 = vld [vmem:[%s9072_s26 + $0x24] sm:$0xf]  ;;  %v12647_v55 = vunpack.c.l.bf16 %v12020_v7 }
 0x53a   : > { %v6265_v35 = vadd.f32 %v6264_v38, %v6234_v63  ;;  %v6196_v26 = vadd.f32 %v12008_v53, %v6195_v19  ;;  %v6235_v59 = vmul.f32 %v12008_v53, %v12008_v53  ;;  %v12062_v63 = vld [vmem:[%s9072_s26 + $0x98] sm:$0x1]  ;;  %v6367_v57 = vunpack.c.l.bf16 %v8832_v23 }
 0x53b   : > { %v8828_v19 = vld [vmem:[%s9072_s26 + $0x18] sm:$0xf]  ;;  %v6364_v8 = vunpack.c.l.bf16 %v8835_v42  ;;  %v6461_v27 = vrot.slane %v6362_v54, 1  ;;  %v6468_v51 = vrot.slane %v12647_v55, 1 }
 0x53c   : > { %v6197_v49 = vadd.f32 %v11992_v22, %v6196_v26  ;;  %v6266_v45 = vadd.f32 %v6265_v35, %v6235_v59  ;;  %v12066_v35 = vld [vmem:[%s9072_s26 + $0xa4] sm:$0x1]  ;;  %v12070_v59 = vld [vmem:[%s9072_s26 + $0xb0] sm:$0x1]  ;;  %v6361_v38 = vunpack.c.l.bf16 %v8828_v19  ;;  %v6358_v26 = vunpack.c.l.bf16 %v8830_v47  ;;  %v8834_v22 = vld [vmem:[%s9072_s26 + $0x34] sm:$0xf] }
 0x53d   : > { %v6368_v29 = vunpack.c.l.bf16 %v8834_v22  ;;  %v8836_v19 = vld [vmem:[%s9072_s26 + $0x28] sm:$0xf]  ;;  %v6470_v24 = vrot.slane %v6367_v57, 1  ;;  %v6465_v4 = vrot.slane %v6364_v8, 1  ;;  %v8838_v8 = vld [vmem:[%s9072_s26 + $0x4c] sm:$0xf] }
 0x53e   : > { %v6198_v31 = vadd.f32 %v12002_v3, %v6197_v49  ;;  %v6267_v41 = vadd.f32 %v6266_v45, %v6236_v20  ;;  %v12074_v45 = vld [vmem:[%s9072_s26 + $0xbc] sm:$0x1]  ;;  %v6365_v37 = vunpack.c.l.bf16 %v8836_v19  ;;  %v6460_v61 = vrot.slane %v6361_v38, 1  ;;  %v8847_v19 = vld [vmem:[%s9072_s26 + $0x6c] sm:$0xf] }
 0x53f   : > { %v6455_v23 = vrot.slane %v6358_v26, 1  ;;  %v6471_v22 = vrot.slane %v6368_v29, 1 }
 0x540   : > { %v6199_v20 = vrot.slane %v6198_v31, 4  ;;  %v6268_v49 = vadd.f32 %v6267_v41, %v6237_v33  ;;  %v12083_v33 = vld [vmem:[%s9072_s26 + $0xc8] sm:$0x1]  ;;  %v6466_v42 = vrot.slane %v6365_v37, 1  ;;  %v12094_v38 = vsel %vm6454_vm15, %v6460_v61, %v6461_v27 }
 0x541   : > { %12648 = vst [vmem:[#allocation15_spill] sm:$0xff] %v12094_v38  ;;  %v6374_v37 = vunpack.c.l.bf16 %v8838_v8  ;;  %v12109_v26 = vsel %vm6454_vm15, %v6470_v24, %v6471_v22  ;;  %v12115_v57 = vsel %vm6454_vm15, %v6471_v22, %v6473_v11  ;;  %v8842_v11 = vld [vmem:[%s9072_s26 + $0x64] sm:$0xf]  ;;  %v8843_v22 = vld [vmem:[%s9072_s26 + $0x54] sm:$0xf] }
 0x542   : > { %v6200_v14 = vadd.f32 %v6199_v20, %v6198_v31  ;;  %v6269_v3 = vrot.slane %v6268_v49, 4  ;;  %v6463_v31 = vrot.slane %v6363_v5, 1  ;;  %v6456_v20 = vrot.slane %v6359_v44, 1  ;;  %12650 = vst [vmem:[#allocation16_spill] sm:$0xff] %v12109_v26  ;;  %12652 = vst [vmem:[#allocation22_spill] sm:$0xff] %v12115_v57 }
 0x543   : > { %v12119_v55 = vsel %vm6454_vm15, %v6466_v42, %v6468_v51  ;;  %v8848_v57 = vld [vmem:[%s9072_s26 + $0x70] sm:$0xf] }
 0x544   : > { %v6201_v47 = vrot.slane %v6200_v14, 2  ;;  %v6270_v25 = vadd.f32 %v6269_v3, %v6268_v49  ;;  %v12097_v5 = vsel %vm6454_vm15, %v6461_v27, %v6463_v31  ;;  %v12102_v28 = vsel %vm6454_vm15, %v6455_v23, %v6456_v20  ;;  %v8839_v49 = vld [vmem:[%s9072_s26 + $0x3c] sm:$0xf]  ;;  %12653 = vst [vmem:[#allocation24_spill] sm:$0xff] %v12119_v55 }
 0x545   : > { %12649 = vst [vmem:[#allocation14_spill] sm:$0xff] %v12097_v5  ;;  %v12106_v7 = vsel %vm6454_vm15, %v6456_v20, %v12013_v18  ;;  %v12112_v27 = vsel %vm6454_vm15, %v6465_v4, %v6466_v42  ;;  %v6370_v29 = vunpack.c.l.bf16 %v8839_v49  ;;  %v8840_v18 = vld [vmem:[%s9072_s26 + $0x40] sm:$0xf]  ;;  %v6481_v23 = vrot.slane %v6374_v37, 1  ;;  %v8846_v49 = vld [vmem:[%s9072_s26 + $0x7c] sm:$0xf] }
 0x546   : > { %v6202_v41 = vadd.f32 %v6201_v47, %v6200_v14  ;;  %v6271_v50 = vrot.slane %v6270_v25, 2  ;;  %v8837_v14 = vld [vmem:[%s9072_s26 + $0x48] sm:$0xf]  ;;  %12651 = vst [vmem:[#allocation20_spill] sm:$0xff] %v12112_v27  ;;  %v8841_v4 = vld [vmem:[%s9072_s26 + $0x60] sm:$0xf]  ;;  %v6380_v20 = vunpack.c.l.bf16 %v8842_v11  ;;  %v6382_v11 = vunpack.c.l.bf16 %v8847_v19 }
 0x547   : > { %v6373_v44 = vunpack.c.l.bf16 %v8837_v14  ;;  %v6379_v31 = vunpack.c.l.bf16 %v8841_v4  ;;  %v8844_v14 = vld [vmem:[%s9072_s26 + $0x58] sm:$0xf]  ;;  %v6383_v26 = vunpack.c.l.bf16 %v8848_v57 }
 0x548   : > { %v6203_v3 = vrot.slane %v6202_v41, 1  ;;  %v6272_v54 = vadd.f32 %v6271_v50, %v6270_v25  ;;  %v6377_v51 = vunpack.c.l.bf16 %v8844_v14  ;;  %v12655_v14 = vunpack.c.l.bf16 %v12031_v30 }
 0x549   : > { %v6480_v61 = vrot.slane %v6373_v44, 1  ;;  %v6490_v55 = vrot.slane %v6379_v31, 1  ;;  %v6491_v27 = vrot.slane %v6380_v20, 1  ;;  %v12658_v30 = vunpack.c.l.bf16 %v12054_v62 }
 0x54a   : > { %v6204_v50 = vadd.f32 %v6203_v3, %v6202_v41  ;;  %v6273_v25 = vrot.slane %v6272_v54, 1  ;;  %v6371_v41 = vunpack.c.l.bf16 %v8840_v18  ;;  %v6376_v3 = vunpack.c.l.bf16 %v8843_v22 }
 0x54b   : > { %v6386_v18 = vunpack.c.l.bf16 %v8846_v49  ;;  %v12143_v19 = vsel %vm6454_vm15, %v6480_v61, %v6481_v23  ;;  %v6503_v31 = vrot.slane %v12658_v30, 1 }
 0x54c   : > { %v12122_v47 = vmul.f32 0.00390625, %v6204_v50  ;;  %v6274_v24 = vadd.f32 %v6273_v25, %v6272_v54  ;;  %v6475_v50 = vrot.slane %v6370_v29, 1  ;;  %v12654_v54 = vunpack.c.l.bf16 %v12035_v17  ;;  %v8845_v25 = vld [vmem:[%s9072_s26 + $0x78] sm:$0xf] }
 0x54d   : > { %v6385_v37 = vunpack.c.l.bf16 %v8845_v25  ;;  %v6476_v4 = vrot.slane %v6371_v41, 1  ;;  %v12656_v29 = vunpack.c.l.bf16 %v12043_v21  ;;  %v6485_v17 = vrot.slane %v6376_v3, 1 }
 0x54e   : > { %v6275_v42 = vmul.f32 0.00390625, %v6274_v24  ;;  %v6276_v8 = vmul.f32 %v12122_v47, %v12122_v47  ;;  %v6483_v44 = vrot.slane %v12654_v54, 1  ;;  %v6478_v24 = vrot.slane %v12655_v14, 1  ;;  %v8854_v14 = vld [vmem:[%s9072_s26 + $0xac] sm:$0xf] }
 0x54f   : > { %v6493_v5 = vrot.slane %v12656_v29, 1  ;;  %v6486_v54 = vrot.slane %v6377_v51, 1  ;;  %v12657_v25 = vunpack.c.l.bf16 %v12039_v13  ;;  %v6500_v57 = vrot.slane %v6385_v37, 1  ;;  %v8855_v29 = vld [vmem:[%s9072_s26 + $0x9c] sm:$0xf] }
 0x550   : > { %v6277_v22 = vsub.f32 %v6275_v42, %v6276_v8  ;;  %v6501_v42 = vrot.slane %v6386_v18, 1  ;;  %v12148_v20 = vsel %vm6454_vm15, %v6481_v23, %v6483_v44  ;;  %v6495_v21 = vrot.slane %v6382_v11, 1  ;;  %v8849_v8 = vld [vmem:[%s9072_s26 + $0x90] sm:$0xf]  ;;  %v8850_v44 = vld [vmem:[%s9072_s26 + $0x94] sm:$0xf] }
 0x551   : > { %v6488_v38 = vrot.slane %v12657_v25, 1  ;;  %v6496_v3 = vrot.slane %v6383_v26, 1  ;;  %v12151_v13 = vsel %vm6454_vm15, %v6475_v50, %v6476_v4  ;;  %v12154_v61 = vsel %vm6454_vm15, %v6476_v4, %v6478_v24  ;;  %v8852_v18 = vld [vmem:[%s9072_s26 + $0x88] sm:$0xf] }
 0x552   : > { %v6278_v41 = vadd.f32 1e-05, %v6277_v22  ;;  %v12157_v51 = vsel %vm6454_vm15, %v6490_v55, %v6491_v27  ;;  %v12160_v62 = vsel %vm6454_vm15, %v6491_v27, %v6493_v5  ;;  %v12163_v23 = vsel %vm6454_vm15, %v6485_v17, %v6486_v54  ;;  %v8851_v27 = vld [vmem:[%s9072_s26 + $0x84] sm:$0xf]  ;;  %v8853_v11 = vld [vmem:[%s9072_s26 + $0xa8] sm:$0xf] }
 0x553   : > { %12659 = vst [vmem:[#allocation25_spill] sm:$0xff] %v12157_v51  ;;  %12660 = vst [vmem:[#allocation26_spill] sm:$0xff] %v12160_v62  ;;  %v12166_v26 = vsel %vm6454_vm15, %v6486_v54, %v6488_v38  ;;  %v6391_v50 = vunpack.c.l.bf16 %v8849_v8  ;;  %v6392_v37 = vunpack.c.l.bf16 %v8850_v44  ;;  %v12171_v49 = vsel %vm6454_vm15, %v6500_v57, %v6501_v42 }
 0x554   : > { %8782 = vrsqrt.f32 %v6278_v41  ;;  %12661 = vst [vmem:[#allocation30_spill] sm:$0xff] %v12163_v23  ;;  %12662 = vst [vmem:[#allocation31_spill] sm:$0xff] %v12166_v26  ;;  %v12174_v5 = vsel %vm6454_vm15, %v6501_v42, %v6503_v31  ;;  %v6388_v55 = vunpack.c.l.bf16 %v8851_v27  ;;  %v6389_v4 = vunpack.c.l.bf16 %v8852_v18  ;;  %v8856_v41 = vld [vmem:[%s9072_s26 + $0xa0] sm:$0xf]  ;;  %v8858_v31 = vld [vmem:[%s9072_s26 + $0xc4] sm:$0xf] }
 0x555   : > { %12663 = vst [vmem:[#allocation32_spill] sm:$0xff] %v12171_v49  ;;  %12664 = vst [vmem:[#allocation33_spill] sm:$0xff] %v12174_v5  ;;  %v12179_v38 = vsel %vm6454_vm15, %v6495_v21, %v6496_v3  ;;  %v6397_v22 = vunpack.c.l.bf16 %v8853_v11  ;;  %v6398_v24 = vunpack.c.l.bf16 %v8854_v14  ;;  %v6394_v17 = vunpack.c.l.bf16 %v8855_v29  ;;  %v8857_v42 = vld [vmem:[%s9072_s26 + $0xc0] sm:$0xf]  ;;  %v8859_v27 = vld [vmem:[%s9072_s26 + $0xb4] sm:$0xf] }
 0x556   : > { %12665 = vst [vmem:[#allocation34_spill] sm:$0xff] %v12179_v38  ;;  %v12666_v54 = vunpack.c.l.bf16 %v12050_v39  ;;  %v6395_v57 = vunpack.c.l.bf16 %v8856_v41  ;;  %v6403_v30 = vunpack.c.l.bf16 %v8857_v42  ;;  %v6404_v8 = vunpack.c.l.bf16 %v8858_v31  ;;  %v8860_v5 = vld [vmem:[%s9072_s26 + $0xb8] sm:$0xf] }
 0x557   : > { %v6510_v44 = vrot.slane %v6391_v50, 1  ;;  %v6511_v21 = vrot.slane %v6392_v37, 1  ;;  %v6400_v18 = vunpack.c.l.bf16 %v8859_v27  ;;  %v6401_v11 = vunpack.c.l.bf16 %v8860_v5 }
 0x558   : > { %v6498_v25 = vrot.slane %v12666_v54, 1  ;;  %v6505_v49 = vrot.slane %v6388_v55, 1  ;;  %v6506_v38 = vrot.slane %v6389_v4, 1  ;;  %v12667_v14 = vunpack.c.l.bf16 %v12062_v63 }
 0x559   : > { %v12668_v39 = vunpack.c.l.bf16 %v12058_v0  ;;  %v6520_v62 = vrot.slane %v6397_v22, 1  ;;  %v6521_v41 = vrot.slane %v6398_v24, 1  ;;  %v6515_v51 = vrot.slane %v6394_v17, 1  ;;  %v8861_v17 = vld [vmem:[%s12402_s2] sm:$0xf] }
 0x55a   : > { %v6513_v29 = vrot.slane %v12667_v14, 1  ;;  %v12669_v42 = vunpack.c.l.bf16 %v12070_v59  ;;  %v6516_v50 = vrot.slane %v6395_v57, 1  ;;  %v12670_v37 = vunpack.c.l.bf16 %v12066_v35 }
 0x55b   : > { %v6508_v54 = vrot.slane %v12668_v39, 1  ;;  %v6530_v26 = vrot.slane %v6403_v30, 1  ;;  %v6531_v5 = vrot.slane %v6404_v8, 1  ;;  %v6525_v4 = vrot.slane %v6400_v18, 1 }
 0x55c   : > { %v6523_v31 = vrot.slane %v12669_v42, 1  ;;  %v6518_v27 = vrot.slane %v12670_v37, 1  ;;  %v6526_v23 = vrot.slane %v6401_v11, 1  ;;  %v12671_v63 = vunpack.c.l.bf16 %v12083_v33 }
 0x55d   : > { %v12672_v0 = vunpack.c.l.bf16 %v12074_v45  ;;  %v12204_v24 = vsel %vm6454_vm15, %v6496_v3, %v6498_v25  ;;  %v12207_v59 = vsel %vm6454_vm15, %v6510_v44, %v6511_v21  ;;  %v12210_v35 = vsel %vm6454_vm15, %v6511_v21, %v6513_v29 }
 0x55e   : > { %v8783_v55 = vpop.eup %8782  ;;  %v6533_v14 = vrot.slane %v12671_v63, 1  ;;  %v12216_v33 = vsel %vm6454_vm15, %v6505_v49, %v6506_v38  ;;  %v12219_v45 = vsel %vm6454_vm15, %v6506_v38, %v6508_v54  ;;  %v12222_v3 = vsel %vm6454_vm15, %v6520_v62, %v6521_v41  ;;  %v12684_v63 = vld [vmem:[#allocation10_spill] sm:$0xff] }
 0x55f   : > { %v6528_v22 = vrot.slane %v12672_v0, 1  ;;  %v6280_v57 = vmul.f32 %v8861_v17, %v8783_v55  ;;  %12673 = vst [vmem:[#allocation35_spill] sm:$0xff] %v12222_v3  ;;  %v12225_v25 = vsel %vm6454_vm15, %v6521_v41, %v6523_v31  ;;  %v12228_v30 = vsel %vm6454_vm15, %v6515_v51, %v6516_v50  ;;  %v12683_v55 = vld [vmem:[#allocation21_spill] sm:$0xff] }
 0x560   : > { %12674 = vst [vmem:[#allocation36_spill] sm:$0xff] %v12225_v25  ;;  %v12231_v8 = vsel %vm6454_vm15, %v6516_v50, %v6518_v27  ;;  %v12676_v44 = vsub.s32 2, %v12646_v36  ;;  %v12237_v38 = vsel %vm6454_vm15, %v6530_v26, %v6531_v5  ;;  %v12240_v62 = vsel %vm6454_vm15, %v6525_v4, %v6526_v23 }
 0x561   : > { %12675 = vst [vmem:[#allocation37_spill] sm:$0xff] %v12231_v8  ;;  %v6317_v21 = vmul.f32 %v6280_v57, %v12122_v47  ;;  %12677 = vst [vmem:[#allocation38_spill] sm:$0xff] %v12237_v38  ;;  %v12243_v18 = vsel %vm6454_vm15, %v6531_v5, %v6533_v14  ;;  %v6529_v51 = vsel %vm6454_vm15, %v6526_v23, %v6528_v22  ;;  %v12685_v14 = vld [vmem:[#allocation19_spill] sm:$0xff] }
 0x562   : > { %v6284_v49 = vrot.slane %v6280_v57, %v12676_v44  ;;  %12678 = vst [vmem:[#allocation39_spill] sm:$0xff] %v12240_v62  ;;  %12679 = vst [vmem:[#allocation40_spill] sm:$0xff] %v12243_v18 }
 0x563   : > { %v6319_v29 = vrot.slane %v6317_v21, 7  ;;  %v12690_v21 = vld [vmem:[#allocation27_spill] sm:$0xff] }
 0x564   : > { %v6314_v11 = vmul.f32 %v12008_v53, %v6284_v49  ;;  %v6285_v39 = vmul.f32 %v11825_v16, %v6284_v49  ;;  %v6286_v54 = vmul.f32 %v11832_v2, %v6284_v49  ;;  %v6287_v47 = vmul.f32 %v11821_v56, %v6284_v49 }
 0x565   : > { %v6288_v26 = vmul.f32 %v11828_v48, %v6284_v49  ;;  %v6289_v41 = vmul.f32 %v11853_v32, %v6284_v49  ;;  %v6290_v42 = vmul.f32 %v11863_v10, %v6284_v49  ;;  %v6321_v31 = vsub.f32 %v8861_v17, %v6319_v29 }
 0x566   : > { %v6291_v23 = vmul.f32 %v11848_v60, %v6284_v49  ;;  %v6292_v53 = vmul.f32 %v11857_v12, %v6284_v49  ;;  %v6293_v50 = vmul.f32 %v11877_v1, %v6284_v49  ;;  %v6294_v16 = vmul.f32 %v11887_v9, %v6284_v49 }
 0x567   : > { %v6295_v2 = vmul.f32 %v11872_v6, %v6284_v49  ;;  %v6296_v37 = vmul.f32 %v11881_v52, %v6284_v49  ;;  %v6297_v56 = vmul.f32 %v11901_v46, %v6284_v49  ;;  %v12680_v48 = vsub.s32 3, %v12646_v36  ;;  %v12681_v6 = vld [vmem:[#allocation28_spill] sm:$0xff]  ;;  %v12682_v52 = vld [vmem:[#allocation9_spill] sm:$0xff] }
 0x568   : > { %v6298_v10 = vmul.f32 %v11911_v15, %v6284_v49  ;;  %v6299_v60 = vmul.f32 %v11896_v40, %v6284_v49  ;;  %v6300_v12 = vmul.f32 %v11905_v43, %v6284_v49  ;;  %v6301_v1 = vmul.f32 %v11925_v34, %v6284_v49  ;;  %v12686_v15 = vld [vmem:[#allocation23_spill] sm:$0xff]  ;;  %v12687_v40 = vld [vmem:[#allocation12_spill] sm:$0xff]  ;;  %v12688_v43 = vld [vmem:[#allocation13_spill] sm:$0xff] }
 0x569   : > { %v6325_v32 = vrot.slane %v6321_v31, %v12680_v48  ;;  %v6302_v9 = vmul.f32 %v11935_v58, %v6284_v49  ;;  %v6303_v27 = vmul.f32 %v12681_v6, %v6284_v49  ;;  %v6304_v5 = vmul.f32 %v12682_v52, %v6284_v49  ;;  %v12689_v34 = vld [vmem:[#allocation11_spill] sm:$0xff]  ;;  %v12691_v31 = vld [vmem:[#allocation29_spill] sm:$0xff] }
 0x56a   : > { %v6305_v4 = vmul.f32 %v12683_v55, %v6284_v49  ;;  %v6306_v36 = vmul.f32 %v12684_v63, %v6284_v49  ;;  %v6307_v0 = vmul.f32 %v12685_v14, %v6284_v49  ;;  %v6308_v22 = vmul.f32 %v12686_v15, %v6284_v49  ;;  %v12693_v52 = vld [vmem:[#allocation17_spill] sm:$0xff] }
 0x56b   : > { %v6355_v46 = vadd.f32 %v6325_v32, %v6314_v11  ;;  %v6309_v17 = vmul.f32 %v12687_v40, %v6284_v49  ;;  %v6310_v57 = vmul.f32 %v12688_v43, %v6284_v49  ;;  %v6311_v44 = vmul.f32 %v12689_v34, %v6284_v49  ;;  %v12692_v11 = vld [vmem:[#allocation18_spill] sm:$0xff] }
 0x56c   : > { %v6312_v29 = vmul.f32 %v12690_v21, %v6284_v49  ;;  %v6313_v48 = vmul.f32 %v12691_v31, %v6284_v49  ;;  %v6315_v6 = vmul.f32 %v12692_v11, %v6284_v49  ;;  %v6316_v55 = vmul.f32 %v12693_v52, %v6284_v49 }
 0x56d   : > { %v6596_v58 = vadd.f32 %v6529_v51, %v6355_v46  ;;  %v6326_v63 = vadd.f32 %v6325_v32, %v6285_v39  ;;  %v6327_v18 = vadd.f32 %v6325_v32, %v6286_v54  ;;  %v6328_v14 = vadd.f32 %v6325_v32, %v6287_v47 }
 0x56e   : > { %v6329_v15 = vadd.f32 %v6325_v32, %v6288_v26  ;;  %v6330_v40 = vadd.f32 %v6325_v32, %v6289_v41  ;;  %v6331_v43 = vadd.f32 %v6325_v32, %v6290_v42  ;;  %v6332_v34 = vadd.f32 %v6325_v32, %v6291_v23 }
 0x56f   : > { %6628 = vst [vmem:[%s12283_s6 + $0xe8] sm:$0xff] %v6596_v58  ;;  %v6333_v51 = vadd.f32 %v6325_v32, %v6292_v53  ;;  %v6334_v46 = vadd.f32 %v6325_v32, %v6293_v50  ;;  %v6335_v21 = vadd.f32 %v6325_v32, %v6294_v16  ;;  %v6336_v38 = vadd.f32 %v6325_v32, %v6295_v2 }
 0x570   : > { %v6337_v31 = vadd.f32 %v6325_v32, %v6296_v37  ;;  %v6338_v62 = vadd.f32 %v6325_v32, %v6297_v56  ;;  %v6339_v11 = vadd.f32 %v6325_v32, %v6298_v10  ;;  %v6340_v25 = vadd.f32 %v6325_v32, %v6299_v60  ;;  %v12694_v10 = vld [vmem:[#allocation15_spill] sm:$0xff] }
 0x571   : > { %v6341_v49 = vadd.f32 %v6325_v32, %v6300_v12  ;;  %v6342_v39 = vadd.f32 %v6325_v32, %v6301_v1  ;;  %v6343_v54 = vadd.f32 %v6325_v32, %v6302_v9  ;;  %v6344_v47 = vadd.f32 %v6325_v32, %v6303_v27  ;;  %v12695_v12 = vld [vmem:[#allocation14_spill] sm:$0xff]  ;;  %v12696_v9 = vld [vmem:[#allocation20_spill] sm:$0xff] }
 0x572   : > { %v6345_v52 = vadd.f32 %v6325_v32, %v6304_v5  ;;  %v6346_v3 = vadd.f32 %v6325_v32, %v6305_v4  ;;  %v6347_v8 = vadd.f32 %v6325_v32, %v6306_v36  ;;  %v6348_v58 = vadd.f32 %v6325_v32, %v6307_v0  ;;  %v12697_v5 = vld [vmem:[#allocation24_spill] sm:$0xff] }
 0x573   : > { %v6349_v26 = vadd.f32 %v6325_v32, %v6308_v22  ;;  %v6350_v41 = vadd.f32 %v6325_v32, %v6309_v17  ;;  %v6351_v42 = vadd.f32 %v6325_v32, %v6310_v57  ;;  %v6352_v23 = vadd.f32 %v6325_v32, %v6311_v44  ;;  %v12698_v36 = vld [vmem:[#allocation16_spill] sm:$0xff]  ;;  %v12699_v22 = vld [vmem:[#allocation22_spill] sm:$0xff] }
 0x574   : > { %v6353_v53 = vadd.f32 %v6325_v32, %v6312_v29  ;;  %v6354_v50 = vadd.f32 %v6325_v32, %v6313_v48  ;;  %v6356_v16 = vadd.f32 %v6325_v32, %v6315_v6  ;;  %v6357_v2 = vadd.f32 %v6325_v32, %v6316_v55  ;;  %v12700_v57 = vld [vmem:[#allocation30_spill] sm:$0xff]  ;;  %v12701_v29 = vld [vmem:[#allocation31_spill] sm:$0xff] }
 0x575   : > { %v6567_v37 = vadd.f32 %v12102_v28, %v6326_v63  ;;  %v6568_v56 = vadd.f32 %v12106_v7, %v6327_v18  ;;  %v6569_v60 = vadd.f32 %v12694_v10, %v6328_v14  ;;  %v6570_v1 = vadd.f32 %v12695_v12, %v6329_v15  ;;  %v12706_v14 = vld [vmem:[#allocation33_spill] sm:$0xff] }
 0x576   : > { %v6571_v27 = vadd.f32 %v12696_v9, %v6330_v40  ;;  %v6572_v4 = vadd.f32 %v12697_v5, %v6331_v43  ;;  %v6573_v0 = vadd.f32 %v12698_v36, %v6332_v34  ;;  %v6574_v32 = vadd.f32 %v12699_v22, %v6333_v51  ;;  %v12707_v51 = vld [vmem:[#allocation37_spill] sm:$0xff] }
 0x577   : > { %v6575_v28 = vadd.f32 %v12151_v13, %v6334_v46  ;;  %v6576_v7 = vadd.f32 %v12154_v61, %v6335_v21  ;;  %v6577_v18 = vadd.f32 %v12143_v19, %v6336_v38  ;;  %v6578_v17 = vadd.f32 %v12148_v20, %v6337_v31  ;;  %6599 = vst [vmem:[%s12283_s6] sm:$0xff] %v6567_v37  ;;  %v12702_v13 = vld [vmem:[#allocation25_spill] sm:$0xff]  ;;  %v12703_v61 = vld [vmem:[#allocation26_spill] sm:$0xff]  ;;  %v12708_v21 = vld [vmem:[#allocation35_spill] sm:$0xff] }
 0x578   : > { %6600 = vst [vmem:[%s12283_s6 + $0x8] sm:$0xff] %v6568_v56  ;;  %6601 = vst [vmem:[%s12283_s6 + $0x10] sm:$0xff] %v6569_v60  ;;  %v6579_v44 = vadd.f32 %v12700_v57, %v6338_v62  ;;  %v6580_v48 = vadd.f32 %v12701_v29, %v6339_v11  ;;  %v6581_v6 = vadd.f32 %v12702_v13, %v6340_v25  ;;  %v12704_v19 = vld [vmem:[#allocation34_spill] sm:$0xff]  ;;  %v12705_v62 = vld [vmem:[#allocation32_spill] sm:$0xff] }
 0x579   : > { %6602 = vst [vmem:[%s12283_s6 + $0x18] sm:$0xff] %v6570_v1  ;;  %v6582_v55 = vadd.f32 %v12703_v61, %v6341_v49  ;;  %6603 = vst [vmem:[%s12283_s6 + $0x20] sm:$0xff] %v6571_v27  ;;  %v6583_v20 = vadd.f32 %v12704_v19, %v6342_v39  ;;  %v6584_v38 = vadd.f32 %v12204_v24, %v6343_v54  ;;  %v12712_v31 = vld [vmem:[#allocation40_spill] sm:$0xff] }
 0x57a   : > { %6604 = vst [vmem:[%s12283_s6 + $0x28] sm:$0xff] %v6572_v4  ;;  %6605 = vst [vmem:[%s12283_s6 + $0x30] sm:$0xff] %v6573_v0  ;;  %v6585_v63 = vadd.f32 %v12705_v62, %v6344_v47  ;;  %v6586_v25 = vadd.f32 %v12706_v14, %v6345_v52  ;;  %v6587_v15 = vadd.f32 %v12216_v33, %v6346_v3 }
 0x57b   : > { %6606 = vst [vmem:[%s12283_s6 + $0x38] sm:$0xff] %v6574_v32  ;;  %6607 = vst [vmem:[%s12283_s6 + $0x40] sm:$0xff] %v6575_v28  ;;  %v6588_v40 = vadd.f32 %v12219_v45, %v6347_v8  ;;  %v6589_v43 = vadd.f32 %v12207_v59, %v6348_v58  ;;  %v6590_v24 = vadd.f32 %v12210_v35, %v6349_v26  ;;  %v12709_v45 = vld [vmem:[#allocation36_spill] sm:$0xff]  ;;  %v12710_v35 = vld [vmem:[#allocation39_spill] sm:$0xff] }
 0x57c   : > { %6608 = vst [vmem:[%s12283_s6 + $0x48] sm:$0xff] %v6576_v7  ;;  %6609 = vst [vmem:[%s12283_s6 + $0x50] sm:$0xff] %v6577_v18  ;;  %v6591_v34 = vadd.f32 %v12228_v30, %v6350_v41  ;;  %v6592_v46 = vadd.f32 %v12707_v51, %v6351_v42  ;;  %v6593_v33 = vadd.f32 %v12708_v21, %v6352_v23  ;;  %v12711_v30 = vld [vmem:[#allocation38_spill] sm:$0xff] }
 0x57d   : > { %6610 = vst [vmem:[%s12283_s6 + $0x58] sm:$0xff] %v6578_v17  ;;  %6611 = vst [vmem:[%s12283_s6 + $0x60] sm:$0xff] %v6579_v44  ;;  %v6594_v59 = vadd.f32 %v12709_v45, %v6353_v53  ;;  %v6595_v3 = vadd.f32 %v12710_v35, %v6354_v50  ;;  %v6597_v8 = vadd.f32 %v12711_v30, %v6356_v16 }
 0x57e   : > { %6612 = vst [vmem:[%s12283_s6 + $0x68] sm:$0xff] %v6580_v48  ;;  %6613 = vst [vmem:[%s12283_s6 + $0x70] sm:$0xff] %v6581_v6  ;;  %v6598_v11 = vadd.f32 %v12712_v31, %v6357_v2 }
 0x57f   : > { %6614 = vst [vmem:[%s12283_s6 + $0x78] sm:$0xff] %v6582_v55  ;;  %6615 = vst [vmem:[%s12283_s6 + $0x80] sm:$0xff] %v6583_v20 }
 0x580   : > { %6616 = vst [vmem:[%s12283_s6 + $0x88] sm:$0xff] %v6584_v38  ;;  %6617 = vst [vmem:[%s12283_s6 + $0x90] sm:$0xff] %v6585_v63 }
 0x581   : > { %6618 = vst [vmem:[%s12283_s6 + $0x98] sm:$0xff] %v6586_v25  ;;  %6619 = vst [vmem:[%s12283_s6 + $0xa0] sm:$0xff] %v6587_v15 }
 0x582   : > { %6620 = vst [vmem:[%s12283_s6 + $0xa8] sm:$0xff] %v6588_v40  ;;  %6621 = vst [vmem:[%s12283_s6 + $0xb0] sm:$0xff] %v6589_v43 }
 0x583   : > { %6622 = vst [vmem:[%s12283_s6 + $0xb8] sm:$0xff] %v6590_v24  ;;  %6623 = vst [vmem:[%s12283_s6 + $0xc0] sm:$0xff] %v6591_v34 }
 0x584   : > { %6624 = vst [vmem:[%s12283_s6 + $0xc8] sm:$0xff] %v6592_v46  ;;  %6625 = vst [vmem:[%s12283_s6 + $0xd0] sm:$0xff] %v6593_v33 }
 0x585   : > { %6626 = vst [vmem:[%s12283_s6 + $0xd8] sm:$0xff] %v6594_v59  ;;  %6627 = vst [vmem:[%s12283_s6 + $0xe0] sm:$0xff] %v6595_v3 }
 0x586   : > { %6629 = vst [vmem:[%s12283_s6 + $0xf0] sm:$0xff] %v6597_v8  ;;  %6630 = vst [vmem:[%s12283_s6 + $0xf8] sm:$0xff] %v6598_v11 }
 0x587   : > { %8903 = shalt.err (!%p8900_p7)
}
 0x588   : > { %s8904_s25 = scalar_lea.hbm %s12339_s10, 4096  ;;  %s8908_s28 = scalar_lea.hbm %s12403_s3, 8192 }
 0x589   : > { %p8905_p8 = scmp.ne.s32.totalorder %s12339_s10, %s8904_s25  ;;  %p8909_p1 = scmp.lt.u32.totalorder %s12339_s10, %s12403_s3 }
 0x58a   : > { %p8910_p0 = scmp.lt.u32.totalorder %s8908_s28, %s8904_s25  ;;  %p8912_p6 = scmp.lt.u32.totalorder %s8904_s25, %s12339_s10 }
 0x58b   : > { %p8906_p11 = pnand %p8905_p8, %p12713_p9 }
 0x58c   : > { %p8911_p5 = por %p8910_p0, %p8909_p1 }
 0x58d   : > { %p8907_p13 = pneg %p8906_p11 }
 0x58e   : > { %p8913_p10 = por %p8912_p6, %p8911_p5 }
 0x590   : > { %p8914_p12 = pnand %p8913_p10, %p8907_p13 }
 0x592   : > { %8917 = shalt.err (!%p8914_p12)
}
 0x593   : > { %s8962_s4 = smov 128   ;;  %s8963_s5 = smov 8  }
 0x594   : > { %8550 = dma.vmem_to_hbm [thread:$0]  (%p12713_p9), %s12341_s8, 4096, %s12339_s10, %s12359_s11, %s8962_s4, %s8962_s4, %s8963_s5  }
 0x595 PF: > { %p8562_p2 = scmp.ge.s32.totalorder %s8956_s15, 2  ;;  %s6660_s6 = sand.u32 1, %s8944_s12  }
 0x596   : > { %p12714_p3 = scmp.ne.s32.totalorder %s12483_s23, 0  ;;  %s6661_s7 = scalar_lea.sflag [#allocation5], %s6660_s6 }
 0x598   : > { %p8557_p4 = pnand %p8562_p2, %p12714_p3 }
 0x59a   : > { %8939 = dma.done.wait (!%p8557_p4), %s6661_s7, 4096  }
 0x59b   : > { %8941 = vsyncadd (!%p8557_p4), %s6661_s7, 4294963200  ;;  %p14_p7 = scmp.ge.s32.totalorder %s9009_s18, 4   ;;  %s12715_s12 = smov %s8948_s13 }
 0x59c   : > { %s12716_s13 = smov %s8952_s14  ;;  %s12717_s14 = smov %s9020_s21 }
 0x59d   : > { %s12718_s15 = smov %s9009_s18  ;;  %16 = sbr.rel (!%p14_p7) target bundleno = 4 (0x4), region = 74 }
 0x5a4   :  { %6666 = vsyncpa [#allocation4], 1 }
 0x5a5   :  { %6668 = vsyncpa [#allocation4 + $0x1], 1 }
 0x5a6   :  { %6669 = vsyncpa [#allocation5], 1 }
 0x5a7   :  { %6671 = vsyncpa [#allocation5 + $0x1], 1 }

</bundles_post_ra>
